<compile_context>
chip_gen: v5e
topology: v5e:2x2
jax: 0.10.0
libtpu: 0.0.40
codegen_flags: <defaults>
</compile_context>

<pallas_src>
import functools
import math

import jax
import jax.numpy as jnp
from jax.experimental import pallas as pl
from jax.experimental.pallas import tpu as pltpu

NEG_INF = -1e9
VMEM_LIMIT = 32 * 1024 * 1024   # explicit scoped-VMEM budget, safe on v5e/v6e/v7x


# ----------------------------------------------------------------------------
# In-kernel helpers (traced inside Pallas kernels)
# ----------------------------------------------------------------------------
def _layernorm_f32(x, g, b, eps):
    mean = jnp.mean(x, axis=-1, keepdims=True)
    var = jnp.mean((x - mean) ** 2, axis=-1, keepdims=True)
    return (x - mean) * jax.lax.rsqrt(var + eps) * g + b


def _mm(x, w):
    # bf16 operands on the MXU (weights are already bf16 in HBM), f32 accumulate.
    return jnp.dot(x.astype(jnp.bfloat16), w, preferred_element_type=jnp.float32)


def _apply_act(y, act):
    if act == "gelu":
        # NOTE: tanh-approx GELU (GPT-2 style); PyTorch nn.GELU default is erf.
        return jax.nn.gelu(y, approximate=True)
    if act == "relu":
        return jnp.maximum(y, 0.0)
    return y


def _mha_outproj(qkv_f32, wo_ref, allowed, num_heads, scale, exact_softmax, prob_ref):
    """Multi-head attention fused with the output projection (concat-free).

    qkv_f32: (T, 3*D) f32 projection output.  The qkv tile is cast to bf16
    once (scale folded into Q before the cast); each head's context is folded
    directly into the output projection (ctx_h @ W_o[h*Dh:(h+1)*Dh, :]) and
    accumulated, so there is no XLU concatenate and the caller gets one
    lane-dense (T, D) f32 result (bias not yet added).
    """
    T = qkv_f32.shape[0]
    D = qkv_f32.shape[1] // 3
    H = num_heads
    Dh = D // H
    q = (qkv_f32[:, :D] * scale).astype(jnp.bfloat16)      # scale folded into Q
    kv = qkv_f32[:, D:].astype(jnp.bfloat16)                # single cast of K|V
    acc = jnp.zeros((T, D), jnp.float32)
    for hh in range(H):                                     # short static unroll
        qh = q[:, hh * Dh:(hh + 1) * Dh]
        kh = kv[:, hh * Dh:(hh + 1) * Dh]
        vh = kv[:, D + hh * Dh:D + (hh + 1) * Dh]
        s = jax.lax.dot_general(qh, kh, (((1,), (1,)), ((), ())),
                                preferred_element_type=jnp.float32)      # (T, T)
        s = jnp.where(allowed, s, NEG_INF)
        m = jnp.max(s, axis=-1, keepdims=True)
        e = jnp.exp(s - m)
        denom = jnp.sum(e, axis=-1, keepdims=True)
        if exact_softmax:
            p = e / denom                            # exact: probs are an output
        else:
            p = e * pl.reciprocal(denom, approx=True)        # EUP slot, ~free
        if prob_ref is not None:
            prob_ref[0, hh] = p
        ctx = jnp.dot(p.astype(jnp.bfloat16), vh,
                      preferred_element_type=jnp.float32)                # (T, Dh)
        acc = acc + jnp.dot(ctx.astype(jnp.bfloat16),
                            wo_ref[hh * Dh:(hh + 1) * Dh, :],
                            preferred_element_type=jnp.float32)          # (T, D)
    return acc


# ----------------------------------------------------------------------------
# Fused attention-block kernels (grid = one batch element per step)
# ----------------------------------------------------------------------------
def _gpt_attn_block_kernel(h_ref, mask_ref, g_ref, be_ref, wqkv_ref, bqkv_ref,
                           wo_ref, bo_ref, o_ref, *, num_heads, scale, eps):
    """Pre-norm causal attention block: out = h + W_o · MHA(LN1(h) · W_qkv)."""
    T, _ = h_ref.shape[1], h_ref.shape[2]
    h = h_ref[0].astype(jnp.float32)                                    # (T, D)
    xn = _layernorm_f32(h, g_ref[...], be_ref[...], eps)
    qkv = _mm(xn, wqkv_ref[...]) + bqkv_ref[...]                        # (T, 3D)
    # causal + key-padding mask built in-kernel from the (1, T) key mask.
    key_ok = mask_ref[0] != 0                                           # (1, T)
    row = jax.lax.broadcasted_iota(jnp.int32, (T, T), 0)
    col = jax.lax.broadcasted_iota(jnp.int32, (T, T), 1)
    allowed = jnp.logical_and(key_ok, col <= row)                       # (T, T)
    attn = _mha_outproj(qkv, wo_ref, allowed, num_heads, scale,
                        exact_softmax=False, prob_ref=None)
    o_ref[0] = (h + attn + bo_ref[...]).astype(o_ref.dtype)


def _seg_attn_block_kernel(h_ref, mask_ref, wqkv_ref, bqkv_ref, wo_ref, bo_ref,
                           g_ref, be_ref, o_ref, p_ref, *, num_heads, scale, eps):
    """Post-norm encoder attention: out = LN1(h + W_o · MHA(h · W_qkv)); probs out."""
    h = h_ref[0].astype(jnp.float32)                                    # (T, D)
    qkv = jnp.dot(h_ref[0], wqkv_ref[...],
                  preferred_element_type=jnp.float32) + bqkv_ref[...]   # (T, 3D)
    allowed = mask_ref[0] != 0                                          # (1, T)
    attn = _mha_outproj(qkv, wo_ref, allowed, num_heads, scale,
                        exact_softmax=True, prob_ref=p_ref)
    o_ref[0] = _layernorm_f32(h + attn + bo_ref[...],
                              g_ref[...], be_ref[...], eps).astype(o_ref.dtype)


def pallas_gpt_attn_block(h, key_mask, ln_g, ln_b, w_qkv, b_qkv, w_o, b_o,
                          num_heads, scale, eps=1e-5):
    """h:(N,T,D) bf16, key_mask:(N,1,T) int32 -> (N,T,D) bf16."""
    N, T, D = h.shape
    return pl.pallas_call(
        functools.partial(_gpt_attn_block_kernel, num_heads=num_heads,
                          scale=scale, eps=eps),
        out_shape=jax.ShapeDtypeStruct((N, T, D), jnp.bfloat16),
        grid=(N,),
        in_specs=[
            pl.BlockSpec((1, T, D), lambda i: (i, 0, 0)),
            pl.BlockSpec((1, 1, T), lambda i: (i, 0, 0)),
            pl.BlockSpec((1, D), lambda i: (0, 0)),
            pl.BlockSpec((1, D), lambda i: (0, 0)),
            pl.BlockSpec((D, 3 * D), lambda i: (0, 0)),
            pl.BlockSpec((1, 3 * D), lambda i: (0, 0)),
            pl.BlockSpec((D, D), lambda i: (0, 0)),
            pl.BlockSpec((1, D), lambda i: (0, 0)),
        ],
        out_specs=pl.BlockSpec((1, T, D), lambda i: (i, 0, 0)),
        compiler_params=pltpu.CompilerParams(
            dimension_semantics=("parallel",), vmem_limit_bytes=VMEM_LIMIT),
    )(h, key_mask, ln_g.reshape(1, D), ln_b.reshape(1, D),
      w_qkv, b_qkv.reshape(1, 3 * D), w_o, b_o.reshape(1, D))


def pallas_seg_attn_block(h, key_mask, w_qkv, b_qkv, w_o, b_o, ln_g, ln_b,
                          num_heads, scale, eps=1e-5):
    """h:(B,T,D) bf16, key_mask:(B,1,T) int32 -> ((B,T,D) bf16, probs:(B,H,T,T) f32)."""
    B, T, D = h.shape
    out_shapes = (jax.ShapeDtypeStruct((B, T, D), jnp.bfloat16),
                  jax.ShapeDtypeStruct((B, num_heads, T, T), jnp.float32))
    out_specs = (pl.BlockSpec((1, T, D), lambda i: (i, 0, 0)),
                 pl.BlockSpec((1, num_heads, T, T), lambda i: (i, 0, 0, 0)))
    return pl.pallas_call(
        functools.partial(_seg_attn_block_kernel, num_heads=num_heads,
                          scale=scale, eps=eps),
        out_shape=out_shapes,
        grid=(B,),
        in_specs=[
            pl.BlockSpec((1, T, D), lambda i: (i, 0, 0)),
            pl.BlockSpec((1, 1, T), lambda i: (i, 0, 0)),
            pl.BlockSpec((D, 3 * D), lambda i: (0, 0)),
            pl.BlockSpec((1, 3 * D), lambda i: (0, 0)),
            pl.BlockSpec((D, D), lambda i: (0, 0)),
            pl.BlockSpec((1, D), lambda i: (0, 0)),
            pl.BlockSpec((1, D), lambda i: (0, 0)),
            pl.BlockSpec((1, D), lambda i: (0, 0)),
        ],
        out_specs=out_specs,
        compiler_params=pltpu.CompilerParams(
            dimension_semantics=("parallel",), vmem_limit_bytes=VMEM_LIMIT),
    )(h, key_mask, w_qkv, b_qkv.reshape(1, 3 * D), w_o, b_o.reshape(1, D),
      ln_g.reshape(1, D), ln_b.reshape(1, D))


# ----------------------------------------------------------------------------
# Row-wise (token-parallel) fused kernels
#   Argument order: row-tiled refs, then grid-resident refs, then out.
# ----------------------------------------------------------------------------
def _ln_linear_kernel(x_ref, g_ref, be_ref, w_ref, b_ref, o_ref, *, act, eps):
    xn = _layernorm_f32(x_ref[...].astype(jnp.float32), g_ref[...], be_ref[...], eps)
    y = _mm(xn, w_ref[...]) + b_ref[...]
    o_ref[...] = _apply_act(y, act).astype(o_ref.dtype)


def _double_ln_linear_kernel(x_ref, g1_ref, b1_ref, g2_ref, b2_ref, w_ref, b_ref,
                             o_ref, *, eps):
    # fused epilogue: GPT ln_f -> norm_seq -> proj  (all per-row)
    x = x_ref[...].astype(jnp.float32)
    x = _layernorm_f32(x, g1_ref[...], b1_ref[...], eps)
    x = _layernorm_f32(x, g2_ref[...], b2_ref[...], eps)
    o_ref[...] = (_mm(x, w_ref[...]) + b_ref[...]).astype(o_ref.dtype)


def _pre_mlp_kernel(h_ref, g_ref, be_ref, w1_ref, b1_ref, w2_ref, b2_ref, o_ref,
                    *, act, eps):
    # pre-norm MLP block: out = h + FC2(act(FC1(LN(h))))   (D_FF stays on-chip)
    h = h_ref[...].astype(jnp.float32)
    xn = _layernorm_f32(h, g_ref[...], be_ref[...], eps)
    f = _apply_act(_mm(xn, w1_ref[...]) + b1_ref[...], act)
    y = _mm(f, w2_ref[...]) + b2_ref[...]     # f re-cast to bf16 once inside _mm
    o_ref[...] = (h + y).astype(o_ref.dtype)


def _post_mlp_kernel(h_ref, w1_ref, b1_ref, w2_ref, b2_ref, g_ref, be_ref, o_ref,
                     *, act, eps):
    # post-norm MLP block: out = LN(h + FC2(act(FC1(h))))
    h = h_ref[...].astype(jnp.float32)
    f = _apply_act(_mm(h, w1_ref[...]) + b1_ref[...], act)
    y = _mm(f, w2_ref[...]) + b2_ref[...]
    o_ref[...] = _layernorm_f32(h + y, g_ref[...], be_ref[...], eps).astype(o_ref.dtype)


def _row_tile(m, max_tile=512):
    """Largest row tile (multiple of 8, <= max_tile) that divides m into >=2
    grid steps, so a "parallel" row axis can be sharded over v7x's two
    TensorCores; falls back to the full row count (grid of 1) otherwise.
    max_tile bounds the tm * D_FF f32 intermediate against the VMEM budget."""
    for t in (512, 256, 128, 64, 32, 16, 8):
        if t <= max_tile and m % t == 0 and m // t >= 2:
            return t
    return m


def _rowwise(kernel, row_arrays, shared_arrays, out_cols, out_dtype=jnp.bfloat16):
    """Row-tiled pallas_call: row_arrays tiled over rows, shared_arrays resident."""
    m = row_arrays[0].shape[0]
    tm = _row_tile(m)
    in_specs = (
        [pl.BlockSpec((tm, a.shape[1]), lambda i: (i, 0)) for a in row_arrays]
        + [pl.BlockSpec(a.shape, lambda i: (0, 0)) for a in shared_arrays]
    )
    return pl.pallas_call(
        kernel,
        out_shape=jax.ShapeDtypeStruct((m, out_cols), out_dtype),
        grid=(m // tm,),
        in_specs=in_specs,
        out_specs=pl.BlockSpec((tm, out_cols), lambda i: (i, 0)),
        compiler_params=pltpu.CompilerParams(
            dimension_semantics=("parallel",), vmem_limit_bytes=VMEM_LIMIT),
    )(*row_arrays, *shared_arrays)


def pallas_ln_linear(x, g, be, w, b, act="none", eps=1e-5, out_dtype=jnp.bfloat16):
    d = x.shape[1]
    n = w.shape[1]
    return _rowwise(functools.partial(_ln_linear_kernel, act=act, eps=eps),
                    [x], [g.reshape(1, d), be.reshape(1, d), w, b.reshape(1, n)],
                    n, out_dtype)


def pallas_double_ln_linear(x, g1, b1, g2, b2, w, b, eps=1e-5):
    d = x.shape[1]
    n = w.shape[1]
    return _rowwise(functools.partial(_double_ln_linear_kernel, eps=eps),
                    [x],
                    [g1.reshape(1, d), b1.reshape(1, d),
                     g2.reshape(1, d), b2.reshape(1, d), w, b.reshape(1, n)], n)


def pallas_mlp_prenorm(h, g, be, w1, b1, w2, b2, act="gelu", eps=1e-5):
    d = h.shape[1]
    return _rowwise(functools.partial(_pre_mlp_kernel, act=act, eps=eps),
                    [h],
                    [g.reshape(1, d), be.reshape(1, d),
                     w1, b1.reshape(1, -1), w2, b2.reshape(1, d)], d)


def pallas_mlp_postnorm(h, w1, b1, w2, b2, g, be, act="relu", eps=1e-5):
    d = h.shape[1]
    return _rowwise(functools.partial(_post_mlp_kernel, act=act, eps=eps),
                    [h],
                    [w1, b1.reshape(1, -1), w2, b2.reshape(1, d),
                     g.reshape(1, d), be.reshape(1, d)], d)


# ----------------------------------------------------------------------------
# Model configuration (small demo shapes consistent with the module)
# ----------------------------------------------------------------------------
NUM_CLASSES = 5
VOCAB = 50
SEG_SEQLEN = 8        # seg_seqlen
NUM_SEGMENTS = 4
BATCH = 2
EMBED = 32            # embed_dim
N_LAYERS = 2          # num_layers
N_HEADS = 4           # num_heads
MLP_RATIO = 4.0
EMBED_SEG = 16        # embed_dim_seg
N_LAYERS_SEG = 1      # num_layers_seg
N_HEADS_SEG = 2       # num_heads_seg
D_FF_GPT = int(EMBED * MLP_RATIO)      # 128
D_FF_SEG = int(EMBED * MLP_RATIO)      # d_ff = int(embed_dim * mlp_ratio) = 128


# ----------------------------------------------------------------------------
# Deterministic parameter init (projection weights stored bf16, stats f32)
# ----------------------------------------------------------------------------
def _w(key, shape, scale=0.02, dtype=jnp.bfloat16):
    return (scale * jax.random.normal(key, shape, dtype=jnp.float32)).astype(dtype)


def init_params(key):
    keys = iter(jax.random.split(key, 64))
    gpt = {
        "wte": _w(next(keys), (VOCAB, EMBED), dtype=jnp.float32),
        "wpe": _w(next(keys), (SEG_SEQLEN, EMBED), dtype=jnp.float32),
        "lnf_g": jnp.ones((EMBED,), jnp.float32),
        "lnf_b": jnp.zeros((EMBED,), jnp.float32),
        "layers": [],
    }
    for _ in range(N_LAYERS):
        gpt["layers"].append({
            "ln1_g": jnp.ones((EMBED,), jnp.float32),
            "ln1_b": jnp.zeros((EMBED,), jnp.float32),
            "w_qkv": _w(next(keys), (EMBED, 3 * EMBED)),
            "b_qkv": jnp.zeros((3 * EMBED,), jnp.float32),
            "w_o": _w(next(keys), (EMBED, EMBED)),
            "b_o": jnp.zeros((EMBED,), jnp.float32),
            "ln2_g": jnp.ones((EMBED,), jnp.float32),
            "ln2_b": jnp.zeros((EMBED,), jnp.float32),
            "w_fc1": _w(next(keys), (EMBED, D_FF_GPT)),
            "b_fc1": jnp.zeros((D_FF_GPT,), jnp.float32),
            "w_fc2": _w(next(keys), (D_FF_GPT, EMBED)),
            "b_fc2": jnp.zeros((EMBED,), jnp.float32),
        })
    p = {"gpt": gpt}
    p["norm_seq_g"] = jnp.ones((EMBED,), jnp.float32)
    p["norm_seq_b"] = jnp.zeros((EMBED,), jnp.float32)
    p["proj_w"] = _w(next(keys), (EMBED, EMBED_SEG))
    p["proj_b"] = jnp.zeros((EMBED_SEG,), jnp.float32)
    p["cls_token"] = jnp.zeros((1, 1, EMBED_SEG), jnp.float32)   # nn.Parameter(zeros)
    p["seg_layers"] = []
    for _ in range(N_LAYERS_SEG):
        p["seg_layers"].append({
            "w_qkv": _w(next(keys), (EMBED_SEG, 3 * EMBED_SEG)),
            "b_qkv": jnp.zeros((3 * EMBED_SEG,), jnp.float32),
            "w_o": _w(next(keys), (EMBED_SEG, EMBED_SEG)),
            "b_o": jnp.zeros((EMBED_SEG,), jnp.float32),
            "ln1_g": jnp.ones((EMBED_SEG,), jnp.float32),
            "ln1_b": jnp.zeros((EMBED_SEG,), jnp.float32),
            "w_fc1": _w(next(keys), (EMBED_SEG, D_FF_SEG)),
            "b_fc1": jnp.zeros((D_FF_SEG,), jnp.float32),
            "w_fc2": _w(next(keys), (D_FF_SEG, EMBED_SEG)),
            "b_fc2": jnp.zeros((EMBED_SEG,), jnp.float32),
            "ln2_g": jnp.ones((EMBED_SEG,), jnp.float32),
            "ln2_b": jnp.zeros((EMBED_SEG,), jnp.float32),
        })
    p["norm_seg_g"] = jnp.ones((EMBED_SEG,), jnp.float32)
    p["norm_seg_b"] = jnp.zeros((EMBED_SEG,), jnp.float32)
    p["fc_w"] = _w(next(keys), (EMBED_SEG, NUM_CLASSES))
    p["fc_b"] = jnp.zeros((NUM_CLASSES,), jnp.float32)
    return p


# ----------------------------------------------------------------------------
# Sub-forwards
# ----------------------------------------------------------------------------
def sincos_pe(T, D):
    pos = jnp.arange(T, dtype=jnp.float32)[:, None]
    i = jnp.arange(D // 2, dtype=jnp.float32)[None, :]
    inv = jnp.exp(-(2.0 * i / D) * jnp.log(10000.0))
    ang = pos * inv
    pe = jnp.zeros((T, D), jnp.float32)
    pe = pe.at[:, 0::2].set(jnp.sin(ang))
    pe = pe.at[:, 1::2].set(jnp.cos(ang))
    return pe


def gpt_forward(gp, ids, mask):
    """ids:(N,L) int32, mask:(N,L) float -> hidden (N,L,EMBED) bf16, pre-ln_f."""
    N, L = ids.shape
    D = EMBED
    scale = 1.0 / math.sqrt(D // N_HEADS)
    h = (jnp.take(gp["wte"], ids, axis=0)
         + gp["wpe"][None, :L, :]).astype(jnp.bfloat16)                 # (N,L,D)
    key_mask = mask.reshape(N, 1, L).astype(jnp.int32)

    for lp in gp["layers"]:
        # fused LN1 + QKV + causal MHA + out-proj + residual  (1 pallas_call)
        h = pallas_gpt_attn_block(h, key_mask, lp["ln1_g"], lp["ln1_b"],
                                  lp["w_qkv"], lp["b_qkv"], lp["w_o"], lp["b_o"],
                                  N_HEADS, scale)
        # fused LN2 + FC1 + GELU + FC2 + residual                (1 pallas_call)
        h = pallas_mlp_prenorm(h.reshape(N * L, D), lp["ln2_g"], lp["ln2_b"],
                               lp["w_fc1"], lp["b_fc1"], lp["w_fc2"], lp["b_fc2"],
                               act="gelu").reshape(N, L, D)
    # GPT final LayerNorm (ln_f) is applied by the caller after the
    # per-segment gather (per-row op, so gather-then-LN == LN-then-gather).
    return h


def model_forward(params, x, input_mask):
    """x:(B,S,L) int32 ids, input_mask:(B,S,L) -> (logits:(B,C), attn_weights)."""
    B, S, L = x.shape
    Ds, Hs = EMBED_SEG, N_HEADS_SEG
    scale_seg = 1.0 / math.sqrt(Ds // Hs)

    xf = x.reshape(B * S, L)
    maskf = input_mask.reshape(B * S, L).astype(jnp.float32)
    seg_mask = (jnp.sum(input_mask, axis=-1) > 0).astype(jnp.float32)      # (B,S)
    input_lengths = (jnp.sum(maskf, axis=-1) - 1.0).astype(jnp.int32)      # (B*S,)
    input_lengths = jnp.where(input_lengths < 0, input_lengths + L, input_lengths)

    h_tok = gpt_forward(params["gpt"], xf, maskf)                          # (B*S,L,D)
    # Gather last valid token per segment, then fused ln_f + norm_seq + proj.
    h_last = h_tok[jnp.arange(B * S), input_lengths]                       # (B*S,D)
    h_seg = pallas_double_ln_linear(h_last,
                                    params["gpt"]["lnf_g"], params["gpt"]["lnf_b"],
                                    params["norm_seq_g"], params["norm_seq_b"],
                                    params["proj_w"], params["proj_b"])
    h_seg = h_seg.reshape(B, S, Ds).astype(jnp.float32)

    cls = jnp.broadcast_to(params["cls_token"], (B, 1, Ds))
    h = jnp.concatenate([cls, h_seg], axis=1)                              # (B,T,Ds)
    seg_mask = jnp.concatenate([jnp.ones((B, 1), jnp.float32), seg_mask], axis=1)
    T = S + 1
    h = (h + sincos_pe(T, Ds)[None]).astype(jnp.bfloat16)
    seg_key_mask = seg_mask.reshape(B, 1, T).astype(jnp.int32)

    attn_weights = []
    for lp in params["seg_layers"]:
        # fused QKV + MHA (+probs) + out-proj + residual + LN1  (1 pallas_call)
        h, p_attn = pallas_seg_attn_block(h, seg_key_mask,
                                          lp["w_qkv"], lp["b_qkv"],
                                          lp["w_o"], lp["b_o"],
                                          lp["ln1_g"], lp["ln1_b"], Hs, scale_seg)
        attn_weights.append(p_attn)                                        # (B,Hs,T,T)
        # fused FC1 + ReLU + FC2 + residual + LN2                (1 pallas_call)
        h = pallas_mlp_postnorm(h.reshape(B * T, Ds),
                                lp["w_fc1"], lp["b_fc1"],
                                lp["w_fc2"], lp["b_fc2"],
                                lp["ln2_g"], lp["ln2_b"],
                                act="relu").reshape(B, T, Ds)

    cls_rows = h[:, 0, :]                                                  # (B,Ds)
    # fused norm_seg + classifier head
    logits = pallas_ln_linear(cls_rows, params["norm_seg_g"], params["norm_seg_b"],
                              params["fc_w"], params["fc_b"],
                              out_dtype=jnp.float32)                       # (B,C)
    return logits, attn_weights


# ----------------------------------------------------------------------------
# Demo
# ----------------------------------------------------------------------------
if __name__ == "__main__":
    key = jax.random.PRNGKey(0)
    kp, kx, kl = jax.random.split(key, 3)
    params = init_params(kp)

    x = jax.random.randint(kx, (BATCH, NUM_SEGMENTS, SEG_SEQLEN), 0, VOCAB,
                           dtype=jnp.int32)
    lens = jax.random.randint(kl, (BATCH, NUM_SEGMENTS), 1, SEG_SEQLEN + 1)
    input_mask = (jnp.arange(SEG_SEQLEN)[None, None, :] < lens[..., None]).astype(jnp.float32)

    fwd = jax.jit(model_forward)
    logits, attn_weights = fwd(params, x, input_mask)
    jax.block_until_ready(logits)
    jax.block_until_ready(attn_weights)

    assert logits.shape == (BATCH, NUM_CLASSES)
    assert attn_weights[0].shape == (BATCH, N_HEADS_SEG, NUM_SEGMENTS + 1, NUM_SEGMENTS + 1)
    print("KERNEL_OK")
</pallas_src>

<mosaic_0001>
module attributes {stable_mosaic.version = 11 : i64} {
  func.func @_gpt_attn_block_kernel(%arg0: i32, %arg1: memref<1x8x32xbf16, #tpu.memory_space<vmem>>, %arg2: memref<1x1x8xi32, #tpu.memory_space<vmem>>, %arg3: memref<1x32xf32, #tpu.memory_space<vmem>>, %arg4: memref<1x32xf32, #tpu.memory_space<vmem>>, %arg5: memref<32x96xbf16, #tpu.memory_space<vmem>>, %arg6: memref<1x96xf32, #tpu.memory_space<vmem>>, %arg7: memref<32x32xbf16, #tpu.memory_space<vmem>>, %arg8: memref<1x32xf32, #tpu.memory_space<vmem>>, %arg9: memref<1x8x32xbf16, #tpu.memory_space<vmem>>) attributes {dimension_semantics = [#tpu.dimension_semantics<parallel>], iteration_bounds = array<i64: 8>, scalar_prefetch = 0 : i64, scratch_operands = 0 : i64, tpu.core_type = #tpu.core_type<tc>, window_params = [{transform_indices = @transform_0, window_bounds = array<i64: 1, 8, 32>}, {transform_indices = @transform_1, window_bounds = array<i64: 1, 1, 8>}, {pipeline_mode = #tpu.pipeline_mode<synchronous>, transform_indices = @transform_2, window_bounds = array<i64: 1, 32>}, {pipeline_mode = #tpu.pipeline_mode<synchronous>, transform_indices = @transform_3, window_bounds = array<i64: 1, 32>}, {pipeline_mode = #tpu.pipeline_mode<synchronous>, transform_indices = @transform_4, window_bounds = array<i64: 32, 96>}, {pipeline_mode = #tpu.pipeline_mode<synchronous>, transform_indices = @transform_5, window_bounds = array<i64: 1, 96>}, {pipeline_mode = #tpu.pipeline_mode<synchronous>, transform_indices = @transform_6, window_bounds = array<i64: 32, 32>}, {pipeline_mode = #tpu.pipeline_mode<synchronous>, transform_indices = @transform_7, window_bounds = array<i64: 1, 32>}, {transform_indices = @transform_8, window_bounds = array<i64: 1, 8, 32>}]} {
    %c0 = arith.constant 0 : index
    %c0_0 = arith.constant 0 : index
    %c0_1 = arith.constant 0 : index
    %0 = vector.load %arg1[%c0, %c0_0, %c0_1] : memref<1x8x32xbf16, #tpu.memory_space<vmem>>, vector<1x8x32xbf16>
    %1 = vector.shape_cast %0 : vector<1x8x32xbf16> to vector<8x32xbf16>
    %2 = arith.extf %1 : vector<8x32xbf16> to vector<8x32xf32>
    %c0_2 = arith.constant 0 : index
    %c0_3 = arith.constant 0 : index
    %3 = vector.load %arg3[%c0_2, %c0_3] : memref<1x32xf32, #tpu.memory_space<vmem>>, vector<1x32xf32>
    %c0_4 = arith.constant 0 : index
    %c0_5 = arith.constant 0 : index
    %4 = vector.load %arg4[%c0_4, %c0_5] : memref<1x32xf32, #tpu.memory_space<vmem>>, vector<1x32xf32>
    %cst = arith.constant dense<0.000000e+00> : vector<8xf32>
    %5 = vector.multi_reduction <add>, %2, %cst [1] : vector<8x32xf32> to vector<8xf32>
    %6 = vector.shape_cast %5 : vector<8xf32> to vector<8x1xf32>
    %cst_6 = arith.constant 3.200000e+01 : f32
    %7 = vector.broadcast %cst_6 : f32 to vector<8x1xf32>
    %8 = arith.divf %6, %7 : vector<8x1xf32>
    %9 = vector.broadcast %8 : vector<8x1xf32> to vector<8x32xf32>
    %10 = arith.subf %2, %9 : vector<8x32xf32>
    %11 = arith.mulf %10, %10 : vector<8x32xf32>
    %cst_7 = arith.constant dense<0.000000e+00> : vector<8xf32>
    %12 = vector.multi_reduction <add>, %11, %cst_7 [1] : vector<8x32xf32> to vector<8xf32>
    %13 = vector.shape_cast %12 : vector<8xf32> to vector<8x1xf32>
    %cst_8 = arith.constant 3.200000e+01 : f32
    %14 = vector.broadcast %cst_8 : f32 to vector<8x1xf32>
    %15 = arith.divf %13, %14 : vector<8x1xf32>
    %16 = vector.broadcast %8 : vector<8x1xf32> to vector<8x32xf32>
    %17 = arith.subf %2, %16 : vector<8x32xf32>
    %cst_9 = arith.constant 9.99999974E-6 : f32
    %18 = vector.broadcast %cst_9 : f32 to vector<8x1xf32>
    %19 = arith.addf %15, %18 : vector<8x1xf32>
    %20 = math.rsqrt %19 : vector<8x1xf32>
    %21 = vector.broadcast %20 : vector<8x1xf32> to vector<8x32xf32>
    %22 = arith.mulf %17, %21 : vector<8x32xf32>
    %23 = vector.broadcast %3 : vector<1x32xf32> to vector<8x32xf32>
    %24 = arith.mulf %22, %23 : vector<8x32xf32>
    %25 = vector.broadcast %4 : vector<1x32xf32> to vector<8x32xf32>
    %26 = arith.addf %24, %25 : vector<8x32xf32>
    %c0_10 = arith.constant 0 : index
    %c0_11 = arith.constant 0 : index
    %27 = vector.load %arg5[%c0_10, %c0_11] : memref<32x96xbf16, #tpu.memory_space<vmem>>, vector<32x96xbf16>
    %28 = arith.truncf %26 : vector<8x32xf32> to vector<8x32xbf16>
    %cst_12 = arith.constant dense<0.000000e+00> : vector<8x96xf32>
    %29 = tpu.matmul %28, %27, %cst_12 {dimension_numbers = #tpu.dot_dimension_numbers<[1], [0], [0], [1], [0, 0, 1, 1], [], []>} : vector<8x32xbf16>, vector<32x96xbf16>, vector<8x96xf32> -> vector<8x96xf32>
    %c0_13 = arith.constant 0 : index
    %c0_14 = arith.constant 0 : index
    %30 = vector.load %arg6[%c0_13, %c0_14] : memref<1x96xf32, #tpu.memory_space<vmem>>, vector<1x96xf32>
    %31 = vector.broadcast %30 : vector<1x96xf32> to vector<8x96xf32>
    %32 = arith.addf %29, %31 : vector<8x96xf32>
    %c0_15 = arith.constant 0 : index
    %c0_16 = arith.constant 0 : index
    %c0_17 = arith.constant 0 : index
    %33 = vector.load %arg2[%c0_15, %c0_16, %c0_17] : memref<1x1x8xi32, #tpu.memory_space<vmem>>, vector<1x1x8xi32>
    %34 = vector.shape_cast %33 : vector<1x1x8xi32> to vector<1x8xi32>
    %c0_i32 = arith.constant 0 : i32
    %35 = vector.broadcast %c0_i32 : i32 to vector<1x8xi32>
    %36 = arith.cmpi ne, %34, %35 : vector<1x8xi32>
    %37 = tpu.iota {dimensions = array<i32: 0>} : vector<8x8xi32>
    %38 = tpu.iota {dimensions = array<i32: 1>} : vector<8x8xi32>
    %39 = arith.cmpi sle, %38, %37 : vector<8x8xi32>
    %40 = vector.broadcast %36 : vector<1x8xi1> to vector<8x8xi1>
    %41 = arith.andi %40, %39 : vector<8x8xi1>
    %42 = vector.extract_strided_slice %32 {offsets = [0, 0], sizes = [8, 32], strides = [1, 1]} : vector<8x96xf32> to vector<8x32xf32>
    %cst_18 = arith.constant 0.353553385 : f32
    %43 = vector.broadcast %cst_18 : f32 to vector<8x32xf32>
    %44 = arith.mulf %42, %43 : vector<8x32xf32>
    %45 = arith.truncf %44 : vector<8x32xf32> to vector<8x32xbf16>
    %46 = vector.extract_strided_slice %32 {offsets = [0, 32], sizes = [8, 64], strides = [1, 1]} : vector<8x96xf32> to vector<8x64xf32>
    %47 = arith.truncf %46 : vector<8x64xf32> to vector<8x64xbf16>
    %cst_19 = arith.constant 0.000000e+00 : f32
    %48 = vector.broadcast %cst_19 : f32 to vector<8x32xf32>
    %49 = vector.extract_strided_slice %45 {offsets = [0, 0], sizes = [8, 8], strides = [1, 1]} : vector<8x32xbf16> to vector<8x8xbf16>
    %50 = vector.extract_strided_slice %47 {offsets = [0, 0], sizes = [8, 8], strides = [1, 1]} : vector<8x64xbf16> to vector<8x8xbf16>
    %51 = vector.extract_strided_slice %47 {offsets = [0, 32], sizes = [8, 8], strides = [1, 1]} : vector<8x64xbf16> to vector<8x8xbf16>
    %cst_20 = arith.constant dense<0.000000e+00> : vector<8x8xf32>
    %52 = tpu.matmul %49, %50, %cst_20 {dimension_numbers = #tpu.dot_dimension_numbers<[1], [1], [0], [0], [0, 0, 1, 0], [], []>} : vector<8x8xbf16>, vector<8x8xbf16>, vector<8x8xf32> -> vector<8x8xf32>
    %cst_21 = arith.constant -1.000000e+09 : f32
    %53 = vector.broadcast %cst_21 : f32 to vector<8x8xf32>
    %54 = arith.select %41, %52, %53 : vector<8x8xi1>, vector<8x8xf32>
    %cst_22 = arith.constant dense<0xFF800000> : vector<8xf32>
    %55 = vector.multi_reduction <maximumf>, %54, %cst_22 [1] : vector<8x8xf32> to vector<8xf32>
    %56 = vector.shape_cast %55 : vector<8xf32> to vector<8x1xf32>
    %57 = vector.broadcast %56 : vector<8x1xf32> to vector<8x8xf32>
    %58 = arith.subf %54, %57 : vector<8x8xf32>
    %59 = math.exp %58 : vector<8x8xf32>
    %cst_23 = arith.constant dense<0.000000e+00> : vector<8xf32>
    %60 = vector.multi_reduction <add>, %59, %cst_23 [1] : vector<8x8xf32> to vector<8xf32>
    %61 = vector.shape_cast %60 : vector<8xf32> to vector<8x1xf32>
    %62 = tpu.reciprocal %61 {approx = true} : vector<8x1xf32> -> vector<8x1xf32>
    %63 = vector.broadcast %62 : vector<8x1xf32> to vector<8x8xf32>
    %64 = arith.mulf %59, %63 : vector<8x8xf32>
    %65 = arith.truncf %64 : vector<8x8xf32> to vector<8x8xbf16>
    %cst_24 = arith.constant dense<0.000000e+00> : vector<8x8xf32>
    %66 = tpu.matmul %65, %51, %cst_24 {dimension_numbers = #tpu.dot_dimension_numbers<[1], [0], [0], [1], [0, 0, 1, 1], [], []>} : vector<8x8xbf16>, vector<8x8xbf16>, vector<8x8xf32> -> vector<8x8xf32>
    %67 = arith.truncf %66 : vector<8x8xf32> to vector<8x8xbf16>
    %c0_25 = arith.constant 0 : index
    %c0_26 = arith.constant 0 : index
    %68 = vector.load %arg7[%c0_25, %c0_26] : memref<32x32xbf16, #tpu.memory_space<vmem>>, vector<8x32xbf16>
    %cst_27 = arith.constant dense<0.000000e+00> : vector<8x32xf32>
    %69 = tpu.matmul %67, %68, %cst_27 {dimension_numbers = #tpu.dot_dimension_numbers<[1], [0], [0], [1], [0, 0, 1, 1], [], []>} : vector<8x8xbf16>, vector<8x32xbf16>, vector<8x32xf32> -> vector<8x32xf32>
    %70 = arith.addf %48, %69 : vector<8x32xf32>
    %71 = vector.extract_strided_slice %45 {offsets = [0, 8], sizes = [8, 8], strides = [1, 1]} : vector<8x32xbf16> to vector<8x8xbf16>
    %72 = vector.extract_strided_slice %47 {offsets = [0, 8], sizes = [8, 8], strides = [1, 1]} : vector<8x64xbf16> to vector<8x8xbf16>
    %73 = vector.extract_strided_slice %47 {offsets = [0, 40], sizes = [8, 8], strides = [1, 1]} : vector<8x64xbf16> to vector<8x8xbf16>
    %cst_28 = arith.constant dense<0.000000e+00> : vector<8x8xf32>
    %74 = tpu.matmul %71, %72, %cst_28 {dimension_numbers = #tpu.dot_dimension_numbers<[1], [1], [0], [0], [0, 0, 1, 0], [], []>} : vector<8x8xbf16>, vector<8x8xbf16>, vector<8x8xf32> -> vector<8x8xf32>
    %cst_29 = arith.constant -1.000000e+09 : f32
    %75 = vector.broadcast %cst_29 : f32 to vector<8x8xf32>
    %76 = arith.select %41, %74, %75 : vector<8x8xi1>, vector<8x8xf32>
    %cst_30 = arith.constant dense<0xFF800000> : vector<8xf32>
    %77 = vector.multi_reduction <maximumf>, %76, %cst_30 [1] : vector<8x8xf32> to vector<8xf32>
    %78 = vector.shape_cast %77 : vector<8xf32> to vector<8x1xf32>
    %79 = vector.broadcast %78 : vector<8x1xf32> to vector<8x8xf32>
    %80 = arith.subf %76, %79 : vector<8x8xf32>
    %81 = math.exp %80 : vector<8x8xf32>
    %cst_31 = arith.constant dense<0.000000e+00> : vector<8xf32>
    %82 = vector.multi_reduction <add>, %81, %cst_31 [1] : vector<8x8xf32> to vector<8xf32>
    %83 = vector.shape_cast %82 : vector<8xf32> to vector<8x1xf32>
    %84 = tpu.reciprocal %83 {approx = true} : vector<8x1xf32> -> vector<8x1xf32>
    %85 = vector.broadcast %84 : vector<8x1xf32> to vector<8x8xf32>
    %86 = arith.mulf %81, %85 : vector<8x8xf32>
    %87 = arith.truncf %86 : vector<8x8xf32> to vector<8x8xbf16>
    %cst_32 = arith.constant dense<0.000000e+00> : vector<8x8xf32>
    %88 = tpu.matmul %87, %73, %cst_32 {dimension_numbers = #tpu.dot_dimension_numbers<[1], [0], [0], [1], [0, 0, 1, 1], [], []>} : vector<8x8xbf16>, vector<8x8xbf16>, vector<8x8xf32> -> vector<8x8xf32>
    %89 = arith.truncf %88 : vector<8x8xf32> to vector<8x8xbf16>
    %c8 = arith.constant 8 : index
    %c0_33 = arith.constant 0 : index
    %90 = vector.load %arg7[%c8, %c0_33] : memref<32x32xbf16, #tpu.memory_space<vmem>>, vector<8x32xbf16>
    %cst_34 = arith.constant dense<0.000000e+00> : vector<8x32xf32>
    %91 = tpu.matmul %89, %90, %cst_34 {dimension_numbers = #tpu.dot_dimension_numbers<[1], [0], [0], [1], [0, 0, 1, 1], [], []>} : vector<8x8xbf16>, vector<8x32xbf16>, vector<8x32xf32> -> vector<8x32xf32>
    %92 = arith.addf %70, %91 : vector<8x32xf32>
    %93 = vector.extract_strided_slice %45 {offsets = [0, 16], sizes = [8, 8], strides = [1, 1]} : vector<8x32xbf16> to vector<8x8xbf16>
    %94 = vector.extract_strided_slice %47 {offsets = [0, 16], sizes = [8, 8], strides = [1, 1]} : vector<8x64xbf16> to vector<8x8xbf16>
    %95 = vector.extract_strided_slice %47 {offsets = [0, 48], sizes = [8, 8], strides = [1, 1]} : vector<8x64xbf16> to vector<8x8xbf16>
    %cst_35 = arith.constant dense<0.000000e+00> : vector<8x8xf32>
    %96 = tpu.matmul %93, %94, %cst_35 {dimension_numbers = #tpu.dot_dimension_numbers<[1], [1], [0], [0], [0, 0, 1, 0], [], []>} : vector<8x8xbf16>, vector<8x8xbf16>, vector<8x8xf32> -> vector<8x8xf32>
    %cst_36 = arith.constant -1.000000e+09 : f32
    %97 = vector.broadcast %cst_36 : f32 to vector<8x8xf32>
    %98 = arith.select %41, %96, %97 : vector<8x8xi1>, vector<8x8xf32>
    %cst_37 = arith.constant dense<0xFF800000> : vector<8xf32>
    %99 = vector.multi_reduction <maximumf>, %98, %cst_37 [1] : vector<8x8xf32> to vector<8xf32>
    %100 = vector.shape_cast %99 : vector<8xf32> to vector<8x1xf32>
    %101 = vector.broadcast %100 : vector<8x1xf32> to vector<8x8xf32>
    %102 = arith.subf %98, %101 : vector<8x8xf32>
    %103 = math.exp %102 : vector<8x8xf32>
    %cst_38 = arith.constant dense<0.000000e+00> : vector<8xf32>
    %104 = vector.multi_reduction <add>, %103, %cst_38 [1] : vector<8x8xf32> to vector<8xf32>
    %105 = vector.shape_cast %104 : vector<8xf32> to vector<8x1xf32>
    %106 = tpu.reciprocal %105 {approx = true} : vector<8x1xf32> -> vector<8x1xf32>
    %107 = vector.broadcast %106 : vector<8x1xf32> to vector<8x8xf32>
    %108 = arith.mulf %103, %107 : vector<8x8xf32>
    %109 = arith.truncf %108 : vector<8x8xf32> to vector<8x8xbf16>
    %cst_39 = arith.constant dense<0.000000e+00> : vector<8x8xf32>
    %110 = tpu.matmul %109, %95, %cst_39 {dimension_numbers = #tpu.dot_dimension_numbers<[1], [0], [0], [1], [0, 0, 1, 1], [], []>} : vector<8x8xbf16>, vector<8x8xbf16>, vector<8x8xf32> -> vector<8x8xf32>
    %111 = arith.truncf %110 : vector<8x8xf32> to vector<8x8xbf16>
    %c16 = arith.constant 16 : index
    %c0_40 = arith.constant 0 : index
    %112 = vector.load %arg7[%c16, %c0_40] : memref<32x32xbf16, #tpu.memory_space<vmem>>, vector<8x32xbf16>
    %cst_41 = arith.constant dense<0.000000e+00> : vector<8x32xf32>
    %113 = tpu.matmul %111, %112, %cst_41 {dimension_numbers = #tpu.dot_dimension_numbers<[1], [0], [0], [1], [0, 0, 1, 1], [], []>} : vector<8x8xbf16>, vector<8x32xbf16>, vector<8x32xf32> -> vector<8x32xf32>
    %114 = arith.addf %92, %113 : vector<8x32xf32>
    %115 = vector.extract_strided_slice %45 {offsets = [0, 24], sizes = [8, 8], strides = [1, 1]} : vector<8x32xbf16> to vector<8x8xbf16>
    %116 = vector.extract_strided_slice %47 {offsets = [0, 24], sizes = [8, 8], strides = [1, 1]} : vector<8x64xbf16> to vector<8x8xbf16>
    %117 = vector.extract_strided_slice %47 {offsets = [0, 56], sizes = [8, 8], strides = [1, 1]} : vector<8x64xbf16> to vector<8x8xbf16>
    %cst_42 = arith.constant dense<0.000000e+00> : vector<8x8xf32>
    %118 = tpu.matmul %115, %116, %cst_42 {dimension_numbers = #tpu.dot_dimension_numbers<[1], [1], [0], [0], [0, 0, 1, 0], [], []>} : vector<8x8xbf16>, vector<8x8xbf16>, vector<8x8xf32> -> vector<8x8xf32>
    %cst_43 = arith.constant -1.000000e+09 : f32
    %119 = vector.broadcast %cst_43 : f32 to vector<8x8xf32>
    %120 = arith.select %41, %118, %119 : vector<8x8xi1>, vector<8x8xf32>
    %cst_44 = arith.constant dense<0xFF800000> : vector<8xf32>
    %121 = vector.multi_reduction <maximumf>, %120, %cst_44 [1] : vector<8x8xf32> to vector<8xf32>
    %122 = vector.shape_cast %121 : vector<8xf32> to vector<8x1xf32>
    %123 = vector.broadcast %122 : vector<8x1xf32> to vector<8x8xf32>
    %124 = arith.subf %120, %123 : vector<8x8xf32>
    %125 = math.exp %124 : vector<8x8xf32>
    %cst_45 = arith.constant dense<0.000000e+00> : vector<8xf32>
    %126 = vector.multi_reduction <add>, %125, %cst_45 [1] : vector<8x8xf32> to vector<8xf32>
    %127 = vector.shape_cast %126 : vector<8xf32> to vector<8x1xf32>
    %128 = tpu.reciprocal %127 {approx = true} : vector<8x1xf32> -> vector<8x1xf32>
    %129 = vector.broadcast %128 : vector<8x1xf32> to vector<8x8xf32>
    %130 = arith.mulf %125, %129 : vector<8x8xf32>
    %131 = arith.truncf %130 : vector<8x8xf32> to vector<8x8xbf16>
    %cst_46 = arith.constant dense<0.000000e+00> : vector<8x8xf32>
    %132 = tpu.matmul %131, %117, %cst_46 {dimension_numbers = #tpu.dot_dimension_numbers<[1], [0], [0], [1], [0, 0, 1, 1], [], []>} : vector<8x8xbf16>, vector<8x8xbf16>, vector<8x8xf32> -> vector<8x8xf32>
    %133 = arith.truncf %132 : vector<8x8xf32> to vector<8x8xbf16>
    %c24 = arith.constant 24 : index
    %c0_47 = arith.constant 0 : index
    %134 = vector.load %arg7[%c24, %c0_47] : memref<32x32xbf16, #tpu.memory_space<vmem>>, vector<8x32xbf16>
    %cst_48 = arith.constant dense<0.000000e+00> : vector<8x32xf32>
    %135 = tpu.matmul %133, %134, %cst_48 {dimension_numbers = #tpu.dot_dimension_numbers<[1], [0], [0], [1], [0, 0, 1, 1], [], []>} : vector<8x8xbf16>, vector<8x32xbf16>, vector<8x32xf32> -> vector<8x32xf32>
    %136 = arith.addf %114, %135 : vector<8x32xf32>
    %137 = arith.addf %2, %136 : vector<8x32xf32>
    %c0_49 = arith.constant 0 : index
    %c0_50 = arith.constant 0 : index
    %138 = vector.load %arg8[%c0_49, %c0_50] : memref<1x32xf32, #tpu.memory_space<vmem>>, vector<1x32xf32>
    %139 = vector.broadcast %138 : vector<1x32xf32> to vector<8x32xf32>
    %140 = arith.addf %137, %139 : vector<8x32xf32>
    %141 = arith.truncf %140 : vector<8x32xf32> to vector<8x32xbf16>
    %c0_51 = arith.constant 0 : index
    %c0_52 = arith.constant 0 : index
    %c0_53 = arith.constant 0 : index
    %142 = vector.load %arg9[%c0_51, %c0_52, %c0_53] : memref<1x8x32xbf16, #tpu.memory_space<vmem>>, vector<1x8x32xbf16>
    %143 = vector.shape_cast %142 : vector<1x8x32xbf16> to vector<8x32xbf16>
    %144 = vector.shape_cast %141 : vector<8x32xbf16> to vector<1x8x32xbf16>
    tpu.vector_store %arg9[%c0_51, %c0_52, %c0_53], %144 {strides = array<i32>} : memref<1x8x32xbf16, #tpu.memory_space<vmem>>, vector<1x8x32xbf16>,
    return
  }
  func.func @transform_0(%arg0: i32) -> (i32, i32, i32) {
    %c0_i32 = arith.constant 0 : i32
    %c0_i32_0 = arith.constant 0 : i32
    %c0_i32_1 = arith.constant 0 : i32
    return %arg0, %c0_i32, %c0_i32_0 : i32, i32, i32
  }
  func.func @transform_1(%arg0: i32) -> (i32, i32, i32) {
    %c0_i32 = arith.constant 0 : i32
    %c0_i32_0 = arith.constant 0 : i32
    %c0_i32_1 = arith.constant 0 : i32
    return %arg0, %c0_i32, %c0_i32_0 : i32, i32, i32
  }
  func.func @transform_2(%arg0: i32) -> (i32, i32) {
    %c0_i32 = arith.constant 0 : i32
    %c0_i32_0 = arith.constant 0 : i32
    %c0_i32_1 = arith.constant 0 : i32
    return %c0_i32, %c0_i32_0 : i32, i32
  }
  func.func @transform_3(%arg0: i32) -> (i32, i32) {
    %c0_i32 = arith.constant 0 : i32
    %c0_i32_0 = arith.constant 0 : i32
    %c0_i32_1 = arith.constant 0 : i32
    return %c0_i32, %c0_i32_0 : i32, i32
  }
  func.func @transform_4(%arg0: i32) -> (i32, i32) {
    %c0_i32 = arith.constant 0 : i32
    %c0_i32_0 = arith.constant 0 : i32
    %c0_i32_1 = arith.constant 0 : i32
    return %c0_i32, %c0_i32_0 : i32, i32
  }
  func.func @transform_5(%arg0: i32) -> (i32, i32) {
    %c0_i32 = arith.constant 0 : i32
    %c0_i32_0 = arith.constant 0 : i32
    %c0_i32_1 = arith.constant 0 : i32
    return %c0_i32, %c0_i32_0 : i32, i32
  }
  func.func @transform_6(%arg0: i32) -> (i32, i32) {
    %c0_i32 = arith.constant 0 : i32
    %c0_i32_0 = arith.constant 0 : i32
    %c0_i32_1 = arith.constant 0 : i32
    return %c0_i32, %c0_i32_0 : i32, i32
  }
  func.func @transform_7(%arg0: i32) -> (i32, i32) {
    %c0_i32 = arith.constant 0 : i32
    %c0_i32_0 = arith.constant 0 : i32
    %c0_i32_1 = arith.constant 0 : i32
    return %c0_i32, %c0_i32_0 : i32, i32
  }
  func.func @transform_8(%arg0: i32) -> (i32, i32, i32) {
    %c0_i32 = arith.constant 0 : i32
    %c0_i32_0 = arith.constant 0 : i32
    %c0_i32_1 = arith.constant 0 : i32
    return %arg0, %c0_i32, %c0_i32_0 : i32, i32, i32
  }
}

module attributes {stable_mosaic.version = 11 : i64} {
  func.func @_pre_mlp_kernel(%arg0: i32, %arg1: memref<32x32xbf16, #tpu.memory_space<vmem>>, %arg2: memref<1x32xf32, #tpu.memory_space<vmem>>, %arg3: memref<1x32xf32, #tpu.memory_space<vmem>>, %arg4: memref<32x128xbf16, #tpu.memory_space<vmem>>, %arg5: memref<1x128xf32, #tpu.memory_space<vmem>>, %arg6: memref<128x32xbf16, #tpu.memory_space<vmem>>, %arg7: memref<1x32xf32, #tpu.memory_space<vmem>>, %arg8: memref<32x32xbf16, #tpu.memory_space<vmem>>) attributes {dimension_semantics = [#tpu.dimension_semantics<parallel>], iteration_bounds = array<i64: 2>, scalar_prefetch = 0 : i64, scratch_operands = 0 : i64, tpu.core_type = #tpu.core_type<tc>, window_params = [{transform_indices = @transform_0, window_bounds = array<i64: 32, 32>}, {pipeline_mode = #tpu.pipeline_mode<synchronous>, transform_indices = @transform_1, window_bounds = array<i64: 1, 32>}, {pipeline_mode = #tpu.pipeline_mode<synchronous>, transform_indices = @transform_2, window_bounds = array<i64: 1, 32>}, {pipeline_mode = #tpu.pipeline_mode<synchronous>, transform_indices = @transform_3, window_bounds = array<i64: 32, 128>}, {pipeline_mode = #tpu.pipeline_mode<synchronous>, transform_indices = @transform_4, window_bounds = array<i64: 1, 128>}, {pipeline_mode = #tpu.pipeline_mode<synchronous>, transform_indices = @transform_5, window_bounds = array<i64: 128, 32>}, {pipeline_mode = #tpu.pipeline_mode<synchronous>, transform_indices = @transform_6, window_bounds = array<i64: 1, 32>}, {transform_indices = @transform_7, window_bounds = array<i64: 32, 32>}]} {
    %c0 = arith.constant 0 : index
    %c0_0 = arith.constant 0 : index
    %0 = vector.load %arg1[%c0, %c0_0] : memref<32x32xbf16, #tpu.memory_space<vmem>>, vector<32x32xbf16>
    %1 = arith.extf %0 : vector<32x32xbf16> to vector<32x32xf32>
    %c0_1 = arith.constant 0 : index
    %c0_2 = arith.constant 0 : index
    %2 = vector.load %arg2[%c0_1, %c0_2] : memref<1x32xf32, #tpu.memory_space<vmem>>, vector<1x32xf32>
    %c0_3 = arith.constant 0 : index
    %c0_4 = arith.constant 0 : index
    %3 = vector.load %arg3[%c0_3, %c0_4] : memref<1x32xf32, #tpu.memory_space<vmem>>, vector<1x32xf32>
    %cst = arith.constant dense<0.000000e+00> : vector<32xf32>
    %4 = vector.multi_reduction <add>, %1, %cst [1] : vector<32x32xf32> to vector<32xf32>
    %5 = vector.shape_cast %4 : vector<32xf32> to vector<32x1xf32>
    %cst_5 = arith.constant 3.200000e+01 : f32
    %6 = vector.broadcast %cst_5 : f32 to vector<32x1xf32>
    %7 = arith.divf %5, %6 : vector<32x1xf32>
    %8 = vector.broadcast %7 : vector<32x1xf32> to vector<32x32xf32>
    %9 = arith.subf %1, %8 : vector<32x32xf32>
    %10 = arith.mulf %9, %9 : vector<32x32xf32>
    %cst_6 = arith.constant dense<0.000000e+00> : vector<32xf32>
    %11 = vector.multi_reduction <add>, %10, %cst_6 [1] : vector<32x32xf32> to vector<32xf32>
    %12 = vector.shape_cast %11 : vector<32xf32> to vector<32x1xf32>
    %cst_7 = arith.constant 3.200000e+01 : f32
    %13 = vector.broadcast %cst_7 : f32 to vector<32x1xf32>
    %14 = arith.divf %12, %13 : vector<32x1xf32>
    %15 = vector.broadcast %7 : vector<32x1xf32> to vector<32x32xf32>
    %16 = arith.subf %1, %15 : vector<32x32xf32>
    %cst_8 = arith.constant 9.99999974E-6 : f32
    %17 = vector.broadcast %cst_8 : f32 to vector<32x1xf32>
    %18 = arith.addf %14, %17 : vector<32x1xf32>
    %19 = math.rsqrt %18 : vector<32x1xf32>
    %20 = vector.broadcast %19 : vector<32x1xf32> to vector<32x32xf32>
    %21 = arith.mulf %16, %20 : vector<32x32xf32>
    %22 = vector.broadcast %2 : vector<1x32xf32> to vector<32x32xf32>
    %23 = arith.mulf %21, %22 : vector<32x32xf32>
    %24 = vector.broadcast %3 : vector<1x32xf32> to vector<32x32xf32>
    %25 = arith.addf %23, %24 : vector<32x32xf32>
    %c0_9 = arith.constant 0 : index
    %c0_10 = arith.constant 0 : index
    %26 = vector.load %arg4[%c0_9, %c0_10] : memref<32x128xbf16, #tpu.memory_space<vmem>>, vector<32x128xbf16>
    %27 = arith.truncf %25 : vector<32x32xf32> to vector<32x32xbf16>
    %cst_11 = arith.constant dense<0.000000e+00> : vector<32x128xf32>
    %28 = tpu.matmul %27, %26, %cst_11 {dimension_numbers = #tpu.dot_dimension_numbers<[1], [0], [0], [1], [0, 0, 1, 1], [], []>} : vector<32x32xbf16>, vector<32x128xbf16>, vector<32x128xf32> -> vector<32x128xf32>
    %c0_12 = arith.constant 0 : index
    %c0_13 = arith.constant 0 : index
    %29 = vector.load %arg5[%c0_12, %c0_13] : memref<1x128xf32, #tpu.memory_space<vmem>>, vector<1x128xf32>
    %30 = vector.broadcast %29 : vector<1x128xf32> to vector<32x128xf32>
    %31 = arith.addf %28, %30 : vector<32x128xf32>
    %32 = arith.mulf %31, %31 : vector<32x128xf32>
    %33 = arith.mulf %31, %32 : vector<32x128xf32>
    %cst_14 = arith.constant 4.471500e-02 : f32
    %34 = vector.broadcast %cst_14 : f32 to vector<32x128xf32>
    %35 = arith.mulf %34, %33 : vector<32x128xf32>
    %36 = arith.addf %31, %35 : vector<32x128xf32>
    %cst_15 = arith.constant 0.797884583 : f32
    %37 = vector.broadcast %cst_15 : f32 to vector<32x128xf32>
    %38 = arith.mulf %37, %36 : vector<32x128xf32>
    %39 = math.tanh %38 : vector<32x128xf32>
    %cst_16 = arith.constant 1.000000e+00 : f32
    %40 = vector.broadcast %cst_16 : f32 to vector<32x128xf32>
    %41 = arith.addf %40, %39 : vector<32x128xf32>
    %cst_17 = arith.constant 5.000000e-01 : f32
    %42 = vector.broadcast %cst_17 : f32 to vector<32x128xf32>
    %43 = arith.mulf %42, %41 : vector<32x128xf32>
    %44 = arith.mulf %31, %43 : vector<32x128xf32>
    %c0_18 = arith.constant 0 : index
    %c0_19 = arith.constant 0 : index
    %45 = vector.load %arg6[%c0_18, %c0_19] : memref<128x32xbf16, #tpu.memory_space<vmem>>, vector<128x32xbf16>
    %46 = arith.truncf %44 : vector<32x128xf32> to vector<32x128xbf16>
    %cst_20 = arith.constant dense<0.000000e+00> : vector<32x32xf32>
    %47 = tpu.matmul %46, %45, %cst_20 {dimension_numbers = #tpu.dot_dimension_numbers<[1], [0], [0], [1], [0, 0, 1, 1], [], []>} : vector<32x128xbf16>, vector<128x32xbf16>, vector<32x32xf32> -> vector<32x32xf32>
    %c0_21 = arith.constant 0 : index
    %c0_22 = arith.constant 0 : index
    %48 = vector.load %arg7[%c0_21, %c0_22] : memref<1x32xf32, #tpu.memory_space<vmem>>, vector<1x32xf32>
    %49 = vector.broadcast %48 : vector<1x32xf32> to vector<32x32xf32>
    %50 = arith.addf %47, %49 : vector<32x32xf32>
    %51 = arith.addf %1, %50 : vector<32x32xf32>
    %52 = arith.truncf %51 : vector<32x32xf32> to vector<32x32xbf16>
    %c0_23 = arith.constant 0 : index
    %c0_24 = arith.constant 0 : index
    %53 = vector.load %arg8[%c0_23, %c0_24] : memref<32x32xbf16, #tpu.memory_space<vmem>>, vector<32x32xbf16>
    tpu.vector_store %arg8[%c0_23, %c0_24], %52 {strides = array<i32>} : memref<32x32xbf16, #tpu.memory_space<vmem>>, vector<32x32xbf16>,
    return
  }
  func.func @transform_0(%arg0: i32) -> (i32, i32) {
    %c0_i32 = arith.constant 0 : i32
    %c0_i32_0 = arith.constant 0 : i32
    return %arg0, %c0_i32 : i32, i32
  }
  func.func @transform_1(%arg0: i32) -> (i32, i32) {
    %c0_i32 = arith.constant 0 : i32
    %c0_i32_0 = arith.constant 0 : i32
    %c0_i32_1 = arith.constant 0 : i32
    return %c0_i32, %c0_i32_0 : i32, i32
  }
  func.func @transform_2(%arg0: i32) -> (i32, i32) {
    %c0_i32 = arith.constant 0 : i32
    %c0_i32_0 = arith.constant 0 : i32
    %c0_i32_1 = arith.constant 0 : i32
    return %c0_i32, %c0_i32_0 : i32, i32
  }
  func.func @transform_3(%arg0: i32) -> (i32, i32) {
    %c0_i32 = arith.constant 0 : i32
    %c0_i32_0 = arith.constant 0 : i32
    %c0_i32_1 = arith.constant 0 : i32
    return %c0_i32, %c0_i32_0 : i32, i32
  }
  func.func @transform_4(%arg0: i32) -> (i32, i32) {
    %c0_i32 = arith.constant 0 : i32
    %c0_i32_0 = arith.constant 0 : i32
    %c0_i32_1 = arith.constant 0 : i32
    return %c0_i32, %c0_i32_0 : i32, i32
  }
  func.func @transform_5(%arg0: i32) -> (i32, i32) {
    %c0_i32 = arith.constant 0 : i32
    %c0_i32_0 = arith.constant 0 : i32
    %c0_i32_1 = arith.constant 0 : i32
    return %c0_i32, %c0_i32_0 : i32, i32
  }
  func.func @transform_6(%arg0: i32) -> (i32, i32) {
    %c0_i32 = arith.constant 0 : i32
    %c0_i32_0 = arith.constant 0 : i32
    %c0_i32_1 = arith.constant 0 : i32
    return %c0_i32, %c0_i32_0 : i32, i32
  }
  func.func @transform_7(%arg0: i32) -> (i32, i32) {
    %c0_i32 = arith.constant 0 : i32
    %c0_i32_0 = arith.constant 0 : i32
    return %arg0, %c0_i32 : i32, i32
  }
}

module attributes {stable_mosaic.version = 11 : i64} {
  func.func @_double_ln_linear_kernel(%arg0: i32, %arg1: memref<8x32xbf16, #tpu.memory_space<vmem>>, %arg2: memref<1x32xf32, #tpu.memory_space<vmem>>, %arg3: memref<1x32xf32, #tpu.memory_space<vmem>>, %arg4: memref<1x32xf32, #tpu.memory_space<vmem>>, %arg5: memref<1x32xf32, #tpu.memory_space<vmem>>, %arg6: memref<32x16xbf16, #tpu.memory_space<vmem>>, %arg7: memref<1x16xf32, #tpu.memory_space<vmem>>, %arg8: memref<8x16xbf16, #tpu.memory_space<vmem>>) attributes {dimension_semantics = [#tpu.dimension_semantics<parallel>], iteration_bounds = array<i64: 1>, scalar_prefetch = 0 : i64, scratch_operands = 0 : i64, tpu.core_type = #tpu.core_type<tc>, window_params = [{transform_indices = @transform_0, window_bounds = array<i64: 8, 32>}, {pipeline_mode = #tpu.pipeline_mode<synchronous>, transform_indices = @transform_1, window_bounds = array<i64: 1, 32>}, {pipeline_mode = #tpu.pipeline_mode<synchronous>, transform_indices = @transform_2, window_bounds = array<i64: 1, 32>}, {pipeline_mode = #tpu.pipeline_mode<synchronous>, transform_indices = @transform_3, window_bounds = array<i64: 1, 32>}, {pipeline_mode = #tpu.pipeline_mode<synchronous>, transform_indices = @transform_4, window_bounds = array<i64: 1, 32>}, {pipeline_mode = #tpu.pipeline_mode<synchronous>, transform_indices = @transform_5, window_bounds = array<i64: 32, 16>}, {pipeline_mode = #tpu.pipeline_mode<synchronous>, transform_indices = @transform_6, window_bounds = array<i64: 1, 16>}, {transform_indices = @transform_7, window_bounds = array<i64: 8, 16>}]} {
    %c0 = arith.constant 0 : index
    %c0_0 = arith.constant 0 : index
    %0 = vector.load %arg1[%c0, %c0_0] : memref<8x32xbf16, #tpu.memory_space<vmem>>, vector<8x32xbf16>
    %1 = arith.extf %0 : vector<8x32xbf16> to vector<8x32xf32>
    %c0_1 = arith.constant 0 : index
    %c0_2 = arith.constant 0 : index
    %2 = vector.load %arg2[%c0_1, %c0_2] : memref<1x32xf32, #tpu.memory_space<vmem>>, vector<1x32xf32>
    %c0_3 = arith.constant 0 : index
    %c0_4 = arith.constant 0 : index
    %3 = vector.load %arg3[%c0_3, %c0_4] : memref<1x32xf32, #tpu.memory_space<vmem>>, vector<1x32xf32>
    %cst = arith.constant dense<0.000000e+00> : vector<8xf32>
    %4 = vector.multi_reduction <add>, %1, %cst [1] : vector<8x32xf32> to vector<8xf32>
    %5 = vector.shape_cast %4 : vector<8xf32> to vector<8x1xf32>
    %cst_5 = arith.constant 3.200000e+01 : f32
    %6 = vector.broadcast %cst_5 : f32 to vector<8x1xf32>
    %7 = arith.divf %5, %6 : vector<8x1xf32>
    %8 = vector.broadcast %7 : vector<8x1xf32> to vector<8x32xf32>
    %9 = arith.subf %1, %8 : vector<8x32xf32>
    %10 = arith.mulf %9, %9 : vector<8x32xf32>
    %cst_6 = arith.constant dense<0.000000e+00> : vector<8xf32>
    %11 = vector.multi_reduction <add>, %10, %cst_6 [1] : vector<8x32xf32> to vector<8xf32>
    %12 = vector.shape_cast %11 : vector<8xf32> to vector<8x1xf32>
    %cst_7 = arith.constant 3.200000e+01 : f32
    %13 = vector.broadcast %cst_7 : f32 to vector<8x1xf32>
    %14 = arith.divf %12, %13 : vector<8x1xf32>
    %15 = vector.broadcast %7 : vector<8x1xf32> to vector<8x32xf32>
    %16 = arith.subf %1, %15 : vector<8x32xf32>
    %cst_8 = arith.constant 9.99999974E-6 : f32
    %17 = vector.broadcast %cst_8 : f32 to vector<8x1xf32>
    %18 = arith.addf %14, %17 : vector<8x1xf32>
    %19 = math.rsqrt %18 : vector<8x1xf32>
    %20 = vector.broadcast %19 : vector<8x1xf32> to vector<8x32xf32>
    %21 = arith.mulf %16, %20 : vector<8x32xf32>
    %22 = vector.broadcast %2 : vector<1x32xf32> to vector<8x32xf32>
    %23 = arith.mulf %21, %22 : vector<8x32xf32>
    %24 = vector.broadcast %3 : vector<1x32xf32> to vector<8x32xf32>
    %25 = arith.addf %23, %24 : vector<8x32xf32>
    %c0_9 = arith.constant 0 : index
    %c0_10 = arith.constant 0 : index
    %26 = vector.load %arg4[%c0_9, %c0_10] : memref<1x32xf32, #tpu.memory_space<vmem>>, vector<1x32xf32>
    %c0_11 = arith.constant 0 : index
    %c0_12 = arith.constant 0 : index
    %27 = vector.load %arg5[%c0_11, %c0_12] : memref<1x32xf32, #tpu.memory_space<vmem>>, vector<1x32xf32>
    %cst_13 = arith.constant dense<0.000000e+00> : vector<8xf32>
    %28 = vector.multi_reduction <add>, %25, %cst_13 [1] : vector<8x32xf32> to vector<8xf32>
    %29 = vector.shape_cast %28 : vector<8xf32> to vector<8x1xf32>
    %cst_14 = arith.constant 3.200000e+01 : f32
    %30 = vector.broadcast %cst_14 : f32 to vector<8x1xf32>
    %31 = arith.divf %29, %30 : vector<8x1xf32>
    %32 = vector.broadcast %31 : vector<8x1xf32> to vector<8x32xf32>
    %33 = arith.subf %25, %32 : vector<8x32xf32>
    %34 = arith.mulf %33, %33 : vector<8x32xf32>
    %cst_15 = arith.constant dense<0.000000e+00> : vector<8xf32>
    %35 = vector.multi_reduction <add>, %34, %cst_15 [1] : vector<8x32xf32> to vector<8xf32>
    %36 = vector.shape_cast %35 : vector<8xf32> to vector<8x1xf32>
    %cst_16 = arith.constant 3.200000e+01 : f32
    %37 = vector.broadcast %cst_16 : f32 to vector<8x1xf32>
    %38 = arith.divf %36, %37 : vector<8x1xf32>
    %39 = vector.broadcast %31 : vector<8x1xf32> to vector<8x32xf32>
    %40 = arith.subf %25, %39 : vector<8x32xf32>
    %cst_17 = arith.constant 9.99999974E-6 : f32
    %41 = vector.broadcast %cst_17 : f32 to vector<8x1xf32>
    %42 = arith.addf %38, %41 : vector<8x1xf32>
    %43 = math.rsqrt %42 : vector<8x1xf32>
    %44 = vector.broadcast %43 : vector<8x1xf32> to vector<8x32xf32>
    %45 = arith.mulf %40, %44 : vector<8x32xf32>
    %46 = vector.broadcast %26 : vector<1x32xf32> to vector<8x32xf32>
    %47 = arith.mulf %45, %46 : vector<8x32xf32>
    %48 = vector.broadcast %27 : vector<1x32xf32> to vector<8x32xf32>
    %49 = arith.addf %47, %48 : vector<8x32xf32>
    %c0_18 = arith.constant 0 : index
    %c0_19 = arith.constant 0 : index
    %50 = vector.load %arg6[%c0_18, %c0_19] : memref<32x16xbf16, #tpu.memory_space<vmem>>, vector<32x16xbf16>
    %51 = arith.truncf %49 : vector<8x32xf32> to vector<8x32xbf16>
    %cst_20 = arith.constant dense<0.000000e+00> : vector<8x16xf32>
    %52 = tpu.matmul %51, %50, %cst_20 {dimension_numbers = #tpu.dot_dimension_numbers<[1], [0], [0], [1], [0, 0, 1, 1], [], []>} : vector<8x32xbf16>, vector<32x16xbf16>, vector<8x16xf32> -> vector<8x16xf32>
    %c0_21 = arith.constant 0 : index
    %c0_22 = arith.constant 0 : index
    %53 = vector.load %arg7[%c0_21, %c0_22] : memref<1x16xf32, #tpu.memory_space<vmem>>, vector<1x16xf32>
    %54 = vector.broadcast %53 : vector<1x16xf32> to vector<8x16xf32>
    %55 = arith.addf %52, %54 : vector<8x16xf32>
    %56 = arith.truncf %55 : vector<8x16xf32> to vector<8x16xbf16>
    %c0_23 = arith.constant 0 : index
    %c0_24 = arith.constant 0 : index
    %57 = vector.load %arg8[%c0_23, %c0_24] : memref<8x16xbf16, #tpu.memory_space<vmem>>, vector<8x16xbf16>
    tpu.vector_store %arg8[%c0_23, %c0_24], %56 {strides = array<i32>} : memref<8x16xbf16, #tpu.memory_space<vmem>>, vector<8x16xbf16>,
    return
  }
  func.func @transform_0(%arg0: i32) -> (i32, i32) {
    %c0_i32 = arith.constant 0 : i32
    %c0_i32_0 = arith.constant 0 : i32
    return %arg0, %c0_i32 : i32, i32
  }
  func.func @transform_1(%arg0: i32) -> (i32, i32) {
    %c0_i32 = arith.constant 0 : i32
    %c0_i32_0 = arith.constant 0 : i32
    %c0_i32_1 = arith.constant 0 : i32
    return %c0_i32, %c0_i32_0 : i32, i32
  }
  func.func @transform_2(%arg0: i32) -> (i32, i32) {
    %c0_i32 = arith.constant 0 : i32
    %c0_i32_0 = arith.constant 0 : i32
    %c0_i32_1 = arith.constant 0 : i32
    return %c0_i32, %c0_i32_0 : i32, i32
  }
  func.func @transform_3(%arg0: i32) -> (i32, i32) {
    %c0_i32 = arith.constant 0 : i32
    %c0_i32_0 = arith.constant 0 : i32
    %c0_i32_1 = arith.constant 0 : i32
    return %c0_i32, %c0_i32_0 : i32, i32
  }
  func.func @transform_4(%arg0: i32) -> (i32, i32) {
    %c0_i32 = arith.constant 0 : i32
    %c0_i32_0 = arith.constant 0 : i32
    %c0_i32_1 = arith.constant 0 : i32
    return %c0_i32, %c0_i32_0 : i32, i32
  }
  func.func @transform_5(%arg0: i32) -> (i32, i32) {
    %c0_i32 = arith.constant 0 : i32
    %c0_i32_0 = arith.constant 0 : i32
    %c0_i32_1 = arith.constant 0 : i32
    return %c0_i32, %c0_i32_0 : i32, i32
  }
  func.func @transform_6(%arg0: i32) -> (i32, i32) {
    %c0_i32 = arith.constant 0 : i32
    %c0_i32_0 = arith.constant 0 : i32
    %c0_i32_1 = arith.constant 0 : i32
    return %c0_i32, %c0_i32_0 : i32, i32
  }
  func.func @transform_7(%arg0: i32) -> (i32, i32) {
    %c0_i32 = arith.constant 0 : i32
    %c0_i32_0 = arith.constant 0 : i32
    return %arg0, %c0_i32 : i32, i32
  }
}

module attributes {stable_mosaic.version = 11 : i64} {
  func.func @_seg_attn_block_kernel(%arg0: i32, %arg1: memref<1x5x16xbf16, #tpu.memory_space<vmem>>, %arg2: memref<1x1x5xi32, #tpu.memory_space<vmem>>, %arg3: memref<16x48xbf16, #tpu.memory_space<vmem>>, %arg4: memref<1x48xf32, #tpu.memory_space<vmem>>, %arg5: memref<16x16xbf16, #tpu.memory_space<vmem>>, %arg6: memref<1x16xf32, #tpu.memory_space<vmem>>, %arg7: memref<1x16xf32, #tpu.memory_space<vmem>>, %arg8: memref<1x16xf32, #tpu.memory_space<vmem>>, %arg9: memref<1x5x16xbf16, #tpu.memory_space<vmem>>, %arg10: memref<1x2x5x5xf32, #tpu.memory_space<vmem>>) attributes {dimension_semantics = [#tpu.dimension_semantics<parallel>], iteration_bounds = array<i64: 2>, scalar_prefetch = 0 : i64, scratch_operands = 0 : i64, tpu.core_type = #tpu.core_type<tc>, window_params = [{transform_indices = @transform_0, window_bounds = array<i64: 1, 5, 16>}, {transform_indices = @transform_1, window_bounds = array<i64: 1, 1, 5>}, {pipeline_mode = #tpu.pipeline_mode<synchronous>, transform_indices = @transform_2, window_bounds = array<i64: 16, 48>}, {pipeline_mode = #tpu.pipeline_mode<synchronous>, transform_indices = @transform_3, window_bounds = array<i64: 1, 48>}, {pipeline_mode = #tpu.pipeline_mode<synchronous>, transform_indices = @transform_4, window_bounds = array<i64: 16, 16>}, {pipeline_mode = #tpu.pipeline_mode<synchronous>, transform_indices = @transform_5, window_bounds = array<i64: 1, 16>}, {pipeline_mode = #tpu.pipeline_mode<synchronous>, transform_indices = @transform_6, window_bounds = array<i64: 1, 16>}, {pipeline_mode = #tpu.pipeline_mode<synchronous>, transform_indices = @transform_7, window_bounds = array<i64: 1, 16>}, {transform_indices = @transform_8, window_bounds = array<i64: 1, 5, 16>}, {transform_indices = @transform_9, window_bounds = array<i64: 1, 2, 5, 5>}]} {
    %c0 = arith.constant 0 : index
    %c0_0 = arith.constant 0 : index
    %c0_1 = arith.constant 0 : index
    %0 = vector.load %arg1[%c0, %c0_0, %c0_1] : memref<1x5x16xbf16, #tpu.memory_space<vmem>>, vector<1x5x16xbf16>
    %1 = vector.shape_cast %0 : vector<1x5x16xbf16> to vector<5x16xbf16>
    %2 = arith.extf %1 : vector<5x16xbf16> to vector<5x16xf32>
    %c0_2 = arith.constant 0 : index
    %c0_3 = arith.constant 0 : index
    %c0_4 = arith.constant 0 : index
    %3 = vector.load %arg1[%c0_2, %c0_3, %c0_4] : memref<1x5x16xbf16, #tpu.memory_space<vmem>>, vector<1x5x16xbf16>
    %4 = vector.shape_cast %3 : vector<1x5x16xbf16> to vector<5x16xbf16>
    %c0_5 = arith.constant 0 : index
    %c0_6 = arith.constant 0 : index
    %5 = vector.load %arg3[%c0_5, %c0_6] : memref<16x48xbf16, #tpu.memory_space<vmem>>, vector<16x48xbf16>
    %cst = arith.constant dense<0.000000e+00> : vector<5x48xf32>
    %6 = tpu.matmul %4, %5, %cst {dimension_numbers = #tpu.dot_dimension_numbers<[1], [0], [0], [1], [0, 0, 1, 1], [], []>} : vector<5x16xbf16>, vector<16x48xbf16>, vector<5x48xf32> -> vector<5x48xf32>
    %c0_7 = arith.constant 0 : index
    %c0_8 = arith.constant 0 : index
    %7 = vector.load %arg4[%c0_7, %c0_8] : memref<1x48xf32, #tpu.memory_space<vmem>>, vector<1x48xf32>
    %8 = vector.broadcast %7 : vector<1x48xf32> to vector<5x48xf32>
    %9 = arith.addf %6, %8 : vector<5x48xf32>
    %c0_9 = arith.constant 0 : index
    %c0_10 = arith.constant 0 : index
    %c0_11 = arith.constant 0 : index
    %10 = vector.load %arg2[%c0_9, %c0_10, %c0_11] : memref<1x1x5xi32, #tpu.memory_space<vmem>>, vector<1x1x5xi32>
    %11 = vector.shape_cast %10 : vector<1x1x5xi32> to vector<1x5xi32>
    %c0_i32 = arith.constant 0 : i32
    %12 = vector.broadcast %c0_i32 : i32 to vector<1x5xi32>
    %13 = arith.cmpi ne, %11, %12 : vector<1x5xi32>
    %14 = vector.extract_strided_slice %9 {offsets = [0, 0], sizes = [5, 16], strides = [1, 1]} : vector<5x48xf32> to vector<5x16xf32>
    %cst_12 = arith.constant 0.353553385 : f32
    %15 = vector.broadcast %cst_12 : f32 to vector<5x16xf32>
    %16 = arith.mulf %14, %15 : vector<5x16xf32>
    %17 = arith.truncf %16 : vector<5x16xf32> to vector<5x16xbf16>
    %18 = vector.extract_strided_slice %9 {offsets = [0, 16], sizes = [5, 32], strides = [1, 1]} : vector<5x48xf32> to vector<5x32xf32>
    %19 = arith.truncf %18 : vector<5x32xf32> to vector<5x32xbf16>
    %cst_13 = arith.constant 0.000000e+00 : f32
    %20 = vector.broadcast %cst_13 : f32 to vector<5x16xf32>
    %21 = vector.extract_strided_slice %17 {offsets = [0, 0], sizes = [5, 8], strides = [1, 1]} : vector<5x16xbf16> to vector<5x8xbf16>
    %22 = vector.extract_strided_slice %19 {offsets = [0, 0], sizes = [5, 8], strides = [1, 1]} : vector<5x32xbf16> to vector<5x8xbf16>
    %23 = vector.extract_strided_slice %19 {offsets = [0, 16], sizes = [5, 8], strides = [1, 1]} : vector<5x32xbf16> to vector<5x8xbf16>
    %cst_14 = arith.constant dense<0.000000e+00> : vector<5x5xf32>
    %24 = tpu.matmul %21, %22, %cst_14 {dimension_numbers = #tpu.dot_dimension_numbers<[1], [1], [0], [0], [0, 0, 1, 0], [], []>} : vector<5x8xbf16>, vector<5x8xbf16>, vector<5x5xf32> -> vector<5x5xf32>
    %cst_15 = arith.constant -1.000000e+09 : f32
    %25 = vector.shape_cast %13 : vector<1x5xi1> to vector<1x5xi1>
    %26 = vector.broadcast %25 : vector<1x5xi1> to vector<5x5xi1>
    %27 = vector.broadcast %cst_15 : f32 to vector<5x5xf32>
    %28 = arith.select %26, %24, %27 : vector<5x5xi1>, vector<5x5xf32>
    %cst_16 = arith.constant dense<0xFF800000> : vector<5xf32>
    %29 = vector.multi_reduction <maximumf>, %28, %cst_16 [1] : vector<5x5xf32> to vector<5xf32>
    %30 = vector.shape_cast %29 : vector<5xf32> to vector<5x1xf32>
    %31 = vector.broadcast %30 : vector<5x1xf32> to vector<5x5xf32>
    %32 = arith.subf %28, %31 : vector<5x5xf32>
    %33 = math.exp %32 : vector<5x5xf32>
    %cst_17 = arith.constant dense<0.000000e+00> : vector<5xf32>
    %34 = vector.multi_reduction <add>, %33, %cst_17 [1] : vector<5x5xf32> to vector<5xf32>
    %35 = vector.shape_cast %34 : vector<5xf32> to vector<5x1xf32>
    %36 = vector.broadcast %35 : vector<5x1xf32> to vector<5x5xf32>
    %37 = arith.divf %33, %36 : vector<5x5xf32>
    %c0_18 = arith.constant 0 : index
    %c0_19 = arith.constant 0 : index
    %c0_20 = arith.constant 0 : index
    %c0_21 = arith.constant 0 : index
    %38 = vector.load %arg10[%c0_18, %c0_19, %c0_20, %c0_21] : memref<1x2x5x5xf32, #tpu.memory_space<vmem>>, vector<1x1x5x5xf32>
    %39 = vector.shape_cast %38 : vector<1x1x5x5xf32> to vector<5x5xf32>
    %40 = vector.shape_cast %37 : vector<5x5xf32> to vector<1x1x5x5xf32>
    tpu.vector_store %arg10[%c0_18, %c0_19, %c0_20, %c0_21], %40 {strides = array<i32>} : memref<1x2x5x5xf32, #tpu.memory_space<vmem>>, vector<1x1x5x5xf32>,
    %41 = arith.truncf %37 : vector<5x5xf32> to vector<5x5xbf16>
    %cst_22 = arith.constant dense<0.000000e+00> : vector<5x8xf32>
    %42 = tpu.matmul %41, %23, %cst_22 {dimension_numbers = #tpu.dot_dimension_numbers<[1], [0], [0], [1], [0, 0, 1, 1], [], []>} : vector<5x5xbf16>, vector<5x8xbf16>, vector<5x8xf32> -> vector<5x8xf32>
    %43 = arith.truncf %42 : vector<5x8xf32> to vector<5x8xbf16>
    %c0_23 = arith.constant 0 : index
    %c0_24 = arith.constant 0 : index
    %44 = vector.load %arg5[%c0_23, %c0_24] : memref<16x16xbf16, #tpu.memory_space<vmem>>, vector<8x16xbf16>
    %cst_25 = arith.constant dense<0.000000e+00> : vector<5x16xf32>
    %45 = tpu.matmul %43, %44, %cst_25 {dimension_numbers = #tpu.dot_dimension_numbers<[1], [0], [0], [1], [0, 0, 1, 1], [], []>} : vector<5x8xbf16>, vector<8x16xbf16>, vector<5x16xf32> -> vector<5x16xf32>
    %46 = arith.addf %20, %45 : vector<5x16xf32>
    %47 = vector.extract_strided_slice %17 {offsets = [0, 8], sizes = [5, 8], strides = [1, 1]} : vector<5x16xbf16> to vector<5x8xbf16>
    %48 = vector.extract_strided_slice %19 {offsets = [0, 8], sizes = [5, 8], strides = [1, 1]} : vector<5x32xbf16> to vector<5x8xbf16>
    %49 = vector.extract_strided_slice %19 {offsets = [0, 24], sizes = [5, 8], strides = [1, 1]} : vector<5x32xbf16> to vector<5x8xbf16>
    %cst_26 = arith.constant dense<0.000000e+00> : vector<5x5xf32>
    %50 = tpu.matmul %47, %48, %cst_26 {dimension_numbers = #tpu.dot_dimension_numbers<[1], [1], [0], [0], [0, 0, 1, 0], [], []>} : vector<5x8xbf16>, vector<5x8xbf16>, vector<5x5xf32> -> vector<5x5xf32>
    %cst_27 = arith.constant -1.000000e+09 : f32
    %51 = vector.shape_cast %13 : vector<1x5xi1> to vector<1x5xi1>
    %52 = vector.broadcast %51 : vector<1x5xi1> to vector<5x5xi1>
    %53 = vector.broadcast %cst_27 : f32 to vector<5x5xf32>
    %54 = arith.select %52, %50, %53 : vector<5x5xi1>, vector<5x5xf32>
    %cst_28 = arith.constant dense<0xFF800000> : vector<5xf32>
    %55 = vector.multi_reduction <maximumf>, %54, %cst_28 [1] : vector<5x5xf32> to vector<5xf32>
    %56 = vector.shape_cast %55 : vector<5xf32> to vector<5x1xf32>
    %57 = vector.broadcast %56 : vector<5x1xf32> to vector<5x5xf32>
    %58 = arith.subf %54, %57 : vector<5x5xf32>
    %59 = math.exp %58 : vector<5x5xf32>
    %cst_29 = arith.constant dense<0.000000e+00> : vector<5xf32>
    %60 = vector.multi_reduction <add>, %59, %cst_29 [1] : vector<5x5xf32> to vector<5xf32>
    %61 = vector.shape_cast %60 : vector<5xf32> to vector<5x1xf32>
    %62 = vector.broadcast %61 : vector<5x1xf32> to vector<5x5xf32>
    %63 = arith.divf %59, %62 : vector<5x5xf32>
    %c0_30 = arith.constant 0 : index
    %c1 = arith.constant 1 : index
    %c0_31 = arith.constant 0 : index
    %c0_32 = arith.constant 0 : index
    %64 = vector.load %arg10[%c0_30, %c1, %c0_31, %c0_32] : memref<1x2x5x5xf32, #tpu.memory_space<vmem>>, vector<1x1x5x5xf32>
    %65 = vector.shape_cast %64 : vector<1x1x5x5xf32> to vector<5x5xf32>
    %66 = vector.shape_cast %63 : vector<5x5xf32> to vector<1x1x5x5xf32>
    tpu.vector_store %arg10[%c0_30, %c1, %c0_31, %c0_32], %66 {strides = array<i32>} : memref<1x2x5x5xf32, #tpu.memory_space<vmem>>, vector<1x1x5x5xf32>,
    %67 = arith.truncf %63 : vector<5x5xf32> to vector<5x5xbf16>
    %cst_33 = arith.constant dense<0.000000e+00> : vector<5x8xf32>
    %68 = tpu.matmul %67, %49, %cst_33 {dimension_numbers = #tpu.dot_dimension_numbers<[1], [0], [0], [1], [0, 0, 1, 1], [], []>} : vector<5x5xbf16>, vector<5x8xbf16>, vector<5x8xf32> -> vector<5x8xf32>
    %69 = arith.truncf %68 : vector<5x8xf32> to vector<5x8xbf16>
    %c8 = arith.constant 8 : index
    %c0_34 = arith.constant 0 : index
    %70 = vector.load %arg5[%c8, %c0_34] : memref<16x16xbf16, #tpu.memory_space<vmem>>, vector<8x16xbf16>
    %cst_35 = arith.constant dense<0.000000e+00> : vector<5x16xf32>
    %71 = tpu.matmul %69, %70, %cst_35 {dimension_numbers = #tpu.dot_dimension_numbers<[1], [0], [0], [1], [0, 0, 1, 1], [], []>} : vector<5x8xbf16>, vector<8x16xbf16>, vector<5x16xf32> -> vector<5x16xf32>
    %72 = arith.addf %46, %71 : vector<5x16xf32>
    %73 = arith.addf %2, %72 : vector<5x16xf32>
    %c0_36 = arith.constant 0 : index
    %c0_37 = arith.constant 0 : index
    %74 = vector.load %arg6[%c0_36, %c0_37] : memref<1x16xf32, #tpu.memory_space<vmem>>, vector<1x16xf32>
    %75 = vector.broadcast %74 : vector<1x16xf32> to vector<5x16xf32>
    %76 = arith.addf %73, %75 : vector<5x16xf32>
    %c0_38 = arith.constant 0 : index
    %c0_39 = arith.constant 0 : index
    %77 = vector.load %arg7[%c0_38, %c0_39] : memref<1x16xf32, #tpu.memory_space<vmem>>, vector<1x16xf32>
    %c0_40 = arith.constant 0 : index
    %c0_41 = arith.constant 0 : index
    %78 = vector.load %arg8[%c0_40, %c0_41] : memref<1x16xf32, #tpu.memory_space<vmem>>, vector<1x16xf32>
    %cst_42 = arith.constant dense<0.000000e+00> : vector<5xf32>
    %79 = vector.multi_reduction <add>, %76, %cst_42 [1] : vector<5x16xf32> to vector<5xf32>
    %80 = vector.shape_cast %79 : vector<5xf32> to vector<5x1xf32>
    %cst_43 = arith.constant 1.600000e+01 : f32
    %81 = vector.broadcast %cst_43 : f32 to vector<5x1xf32>
    %82 = arith.divf %80, %81 : vector<5x1xf32>
    %83 = vector.broadcast %82 : vector<5x1xf32> to vector<5x16xf32>
    %84 = arith.subf %76, %83 : vector<5x16xf32>
    %85 = arith.mulf %84, %84 : vector<5x16xf32>
    %cst_44 = arith.constant dense<0.000000e+00> : vector<5xf32>
    %86 = vector.multi_reduction <add>, %85, %cst_44 [1] : vector<5x16xf32> to vector<5xf32>
    %87 = vector.shape_cast %86 : vector<5xf32> to vector<5x1xf32>
    %cst_45 = arith.constant 1.600000e+01 : f32
    %88 = vector.broadcast %cst_45 : f32 to vector<5x1xf32>
    %89 = arith.divf %87, %88 : vector<5x1xf32>
    %90 = vector.broadcast %82 : vector<5x1xf32> to vector<5x16xf32>
    %91 = arith.subf %76, %90 : vector<5x16xf32>
    %cst_46 = arith.constant 9.99999974E-6 : f32
    %92 = vector.broadcast %cst_46 : f32 to vector<5x1xf32>
    %93 = arith.addf %89, %92 : vector<5x1xf32>
    %94 = math.rsqrt %93 : vector<5x1xf32>
    %95 = vector.broadcast %94 : vector<5x1xf32> to vector<5x16xf32>
    %96 = arith.mulf %91, %95 : vector<5x16xf32>
    %97 = vector.broadcast %77 : vector<1x16xf32> to vector<5x16xf32>
    %98 = arith.mulf %96, %97 : vector<5x16xf32>
    %99 = vector.broadcast %78 : vector<1x16xf32> to vector<5x16xf32>
    %100 = arith.addf %98, %99 : vector<5x16xf32>
    %101 = arith.truncf %100 : vector<5x16xf32> to vector<5x16xbf16>
    %c0_47 = arith.constant 0 : index
    %c0_48 = arith.constant 0 : index
    %c0_49 = arith.constant 0 : index
    %102 = vector.load %arg9[%c0_47, %c0_48, %c0_49] : memref<1x5x16xbf16, #tpu.memory_space<vmem>>, vector<1x5x16xbf16>
    %103 = vector.shape_cast %102 : vector<1x5x16xbf16> to vector<5x16xbf16>
    %104 = vector.shape_cast %101 : vector<5x16xbf16> to vector<1x5x16xbf16>
    tpu.vector_store %arg9[%c0_47, %c0_48, %c0_49], %104 {strides = array<i32>} : memref<1x5x16xbf16, #tpu.memory_space<vmem>>, vector<1x5x16xbf16>,
    return
  }
  func.func @transform_0(%arg0: i32) -> (i32, i32, i32) {
    %c0_i32 = arith.constant 0 : i32
    %c0_i32_0 = arith.constant 0 : i32
    %c0_i32_1 = arith.constant 0 : i32
    return %arg0, %c0_i32, %c0_i32_0 : i32, i32, i32
  }
  func.func @transform_1(%arg0: i32) -> (i32, i32, i32) {
    %c0_i32 = arith.constant 0 : i32
    %c0_i32_0 = arith.constant 0 : i32
    %c0_i32_1 = arith.constant 0 : i32
    return %arg0, %c0_i32, %c0_i32_0 : i32, i32, i32
  }
  func.func @transform_2(%arg0: i32) -> (i32, i32) {
    %c0_i32 = arith.constant 0 : i32
    %c0_i32_0 = arith.constant 0 : i32
    %c0_i32_1 = arith.constant 0 : i32
    return %c0_i32, %c0_i32_0 : i32, i32
  }
  func.func @transform_3(%arg0: i32) -> (i32, i32) {
    %c0_i32 = arith.constant 0 : i32
    %c0_i32_0 = arith.constant 0 : i32
    %c0_i32_1 = arith.constant 0 : i32
    return %c0_i32, %c0_i32_0 : i32, i32
  }
  func.func @transform_4(%arg0: i32) -> (i32, i32) {
    %c0_i32 = arith.constant 0 : i32
    %c0_i32_0 = arith.constant 0 : i32
    %c0_i32_1 = arith.constant 0 : i32
    return %c0_i32, %c0_i32_0 : i32, i32
  }
  func.func @transform_5(%arg0: i32) -> (i32, i32) {
    %c0_i32 = arith.constant 0 : i32
    %c0_i32_0 = arith.constant 0 : i32
    %c0_i32_1 = arith.constant 0 : i32
    return %c0_i32, %c0_i32_0 : i32, i32
  }
  func.func @transform_6(%arg0: i32) -> (i32, i32) {
    %c0_i32 = arith.constant 0 : i32
    %c0_i32_0 = arith.constant 0 : i32
    %c0_i32_1 = arith.constant 0 : i32
    return %c0_i32, %c0_i32_0 : i32, i32
  }
  func.func @transform_7(%arg0: i32) -> (i32, i32) {
    %c0_i32 = arith.constant 0 : i32
    %c0_i32_0 = arith.constant 0 : i32
    %c0_i32_1 = arith.constant 0 : i32
    return %c0_i32, %c0_i32_0 : i32, i32
  }
  func.func @transform_8(%arg0: i32) -> (i32, i32, i32) {
    %c0_i32 = arith.constant 0 : i32
    %c0_i32_0 = arith.constant 0 : i32
    %c0_i32_1 = arith.constant 0 : i32
    return %arg0, %c0_i32, %c0_i32_0 : i32, i32, i32
  }
  func.func @transform_9(%arg0: i32) -> (i32, i32, i32, i32) {
    %c0_i32 = arith.constant 0 : i32
    %c0_i32_0 = arith.constant 0 : i32
    %c0_i32_1 = arith.constant 0 : i32
    %c0_i32_2 = arith.constant 0 : i32
    return %arg0, %c0_i32, %c0_i32_0, %c0_i32_1 : i32, i32, i32, i32
  }
}

module attributes {stable_mosaic.version = 11 : i64} {
  func.func @_ln_linear_kernel(%arg0: i32, %arg1: memref<2x16xbf16, #tpu.memory_space<vmem>>, %arg2: memref<1x16xf32, #tpu.memory_space<vmem>>, %arg3: memref<1x16xf32, #tpu.memory_space<vmem>>, %arg4: memref<16x5xbf16, #tpu.memory_space<vmem>>, %arg5: memref<1x5xf32, #tpu.memory_space<vmem>>, %arg6: memref<2x5xf32, #tpu.memory_space<vmem>>) attributes {dimension_semantics = [#tpu.dimension_semantics<parallel>], iteration_bounds = array<i64: 1>, scalar_prefetch = 0 : i64, scratch_operands = 0 : i64, tpu.core_type = #tpu.core_type<tc>, window_params = [{transform_indices = @transform_0, window_bounds = array<i64: 2, 16>}, {pipeline_mode = #tpu.pipeline_mode<synchronous>, transform_indices = @transform_1, window_bounds = array<i64: 1, 16>}, {pipeline_mode = #tpu.pipeline_mode<synchronous>, transform_indices = @transform_2, window_bounds = array<i64: 1, 16>}, {pipeline_mode = #tpu.pipeline_mode<synchronous>, transform_indices = @transform_3, window_bounds = array<i64: 16, 5>}, {pipeline_mode = #tpu.pipeline_mode<synchronous>, transform_indices = @transform_4, window_bounds = array<i64: 1, 5>}, {transform_indices = @transform_5, window_bounds = array<i64: 2, 5>}]} {
    %c0 = arith.constant 0 : index
    %c0_0 = arith.constant 0 : index
    %0 = vector.load %arg1[%c0, %c0_0] : memref<2x16xbf16, #tpu.memory_space<vmem>>, vector<2x16xbf16>
    %1 = arith.extf %0 : vector<2x16xbf16> to vector<2x16xf32>
    %c0_1 = arith.constant 0 : index
    %c0_2 = arith.constant 0 : index
    %2 = vector.load %arg2[%c0_1, %c0_2] : memref<1x16xf32, #tpu.memory_space<vmem>>, vector<1x16xf32>
    %c0_3 = arith.constant 0 : index
    %c0_4 = arith.constant 0 : index
    %3 = vector.load %arg3[%c0_3, %c0_4] : memref<1x16xf32, #tpu.memory_space<vmem>>, vector<1x16xf32>
    %cst = arith.constant dense<0.000000e+00> : vector<2xf32>
    %4 = vector.multi_reduction <add>, %1, %cst [1] : vector<2x16xf32> to vector<2xf32>
    %5 = vector.shape_cast %4 : vector<2xf32> to vector<2x1xf32>
    %cst_5 = arith.constant 1.600000e+01 : f32
    %6 = vector.broadcast %cst_5 : f32 to vector<2x1xf32>
    %7 = arith.divf %5, %6 : vector<2x1xf32>
    %8 = vector.broadcast %7 : vector<2x1xf32> to vector<2x16xf32>
    %9 = arith.subf %1, %8 : vector<2x16xf32>
    %10 = arith.mulf %9, %9 : vector<2x16xf32>
    %cst_6 = arith.constant dense<0.000000e+00> : vector<2xf32>
    %11 = vector.multi_reduction <add>, %10, %cst_6 [1] : vector<2x16xf32> to vector<2xf32>
    %12 = vector.shape_cast %11 : vector<2xf32> to vector<2x1xf32>
    %cst_7 = arith.constant 1.600000e+01 : f32
    %13 = vector.broadcast %cst_7 : f32 to vector<2x1xf32>
    %14 = arith.divf %12, %13 : vector<2x1xf32>
    %15 = vector.broadcast %7 : vector<2x1xf32> to vector<2x16xf32>
    %16 = arith.subf %1, %15 : vector<2x16xf32>
    %cst_8 = arith.constant 9.99999974E-6 : f32
    %17 = vector.broadcast %cst_8 : f32 to vector<2x1xf32>
    %18 = arith.addf %14, %17 : vector<2x1xf32>
    %19 = math.rsqrt %18 : vector<2x1xf32>
    %20 = vector.broadcast %19 : vector<2x1xf32> to vector<2x16xf32>
    %21 = arith.mulf %16, %20 : vector<2x16xf32>
    %22 = vector.broadcast %2 : vector<1x16xf32> to vector<2x16xf32>
    %23 = arith.mulf %21, %22 : vector<2x16xf32>
    %24 = vector.broadcast %3 : vector<1x16xf32> to vector<2x16xf32>
    %25 = arith.addf %23, %24 : vector<2x16xf32>
    %c0_9 = arith.constant 0 : index
    %c0_10 = arith.constant 0 : index
    %26 = vector.load %arg4[%c0_9, %c0_10] : memref<16x5xbf16, #tpu.memory_space<vmem>>, vector<16x5xbf16>
    %27 = arith.truncf %25 : vector<2x16xf32> to vector<2x16xbf16>
    %cst_11 = arith.constant dense<0.000000e+00> : vector<2x5xf32>
    %28 = tpu.matmul %27, %26, %cst_11 {dimension_numbers = #tpu.dot_dimension_numbers<[1], [0], [0], [1], [0, 0, 1, 1], [], []>} : vector<2x16xbf16>, vector<16x5xbf16>, vector<2x5xf32> -> vector<2x5xf32>
    %c0_12 = arith.constant 0 : index
    %c0_13 = arith.constant 0 : index
    %29 = vector.load %arg5[%c0_12, %c0_13] : memref<1x5xf32, #tpu.memory_space<vmem>>, vector<1x5xf32>
    %30 = vector.broadcast %29 : vector<1x5xf32> to vector<2x5xf32>
    %31 = arith.addf %28, %30 : vector<2x5xf32>
    %c0_14 = arith.constant 0 : index
    %c0_15 = arith.constant 0 : index
    %32 = vector.load %arg6[%c0_14, %c0_15] : memref<2x5xf32, #tpu.memory_space<vmem>>, vector<2x5xf32>
    tpu.vector_store %arg6[%c0_14, %c0_15], %31 {strides = array<i32>} : memref<2x5xf32, #tpu.memory_space<vmem>>, vector<2x5xf32>,
    return
  }
  func.func @transform_0(%arg0: i32) -> (i32, i32) {
    %c0_i32 = arith.constant 0 : i32
    %c0_i32_0 = arith.constant 0 : i32
    return %arg0, %c0_i32 : i32, i32
  }
  func.func @transform_1(%arg0: i32) -> (i32, i32) {
    %c0_i32 = arith.constant 0 : i32
    %c0_i32_0 = arith.constant 0 : i32
    %c0_i32_1 = arith.constant 0 : i32
    return %c0_i32, %c0_i32_0 : i32, i32
  }
  func.func @transform_2(%arg0: i32) -> (i32, i32) {
    %c0_i32 = arith.constant 0 : i32
    %c0_i32_0 = arith.constant 0 : i32
    %c0_i32_1 = arith.constant 0 : i32
    return %c0_i32, %c0_i32_0 : i32, i32
  }
  func.func @transform_3(%arg0: i32) -> (i32, i32) {
    %c0_i32 = arith.constant 0 : i32
    %c0_i32_0 = arith.constant 0 : i32
    %c0_i32_1 = arith.constant 0 : i32
    return %c0_i32, %c0_i32_0 : i32, i32
  }
  func.func @transform_4(%arg0: i32) -> (i32, i32) {
    %c0_i32 = arith.constant 0 : i32
    %c0_i32_0 = arith.constant 0 : i32
    %c0_i32_1 = arith.constant 0 : i32
    return %c0_i32, %c0_i32_0 : i32, i32
  }
  func.func @transform_5(%arg0: i32) -> (i32, i32) {
    %c0_i32 = arith.constant 0 : i32
    %c0_i32_0 = arith.constant 0 : i32
    return %arg0, %c0_i32 : i32, i32
  }
}

module attributes {stable_mosaic.version = 11 : i64} {
  func.func @_post_mlp_kernel(%arg0: i32, %arg1: memref<10x16xbf16, #tpu.memory_space<vmem>>, %arg2: memref<16x128xbf16, #tpu.memory_space<vmem>>, %arg3: memref<1x128xf32, #tpu.memory_space<vmem>>, %arg4: memref<128x16xbf16, #tpu.memory_space<vmem>>, %arg5: memref<1x16xf32, #tpu.memory_space<vmem>>, %arg6: memref<1x16xf32, #tpu.memory_space<vmem>>, %arg7: memref<1x16xf32, #tpu.memory_space<vmem>>, %arg8: memref<10x16xbf16, #tpu.memory_space<vmem>>) attributes {dimension_semantics = [#tpu.dimension_semantics<parallel>], iteration_bounds = array<i64: 1>, scalar_prefetch = 0 : i64, scratch_operands = 0 : i64, tpu.core_type = #tpu.core_type<tc>, window_params = [{transform_indices = @transform_0, window_bounds = array<i64: 10, 16>}, {pipeline_mode = #tpu.pipeline_mode<synchronous>, transform_indices = @transform_1, window_bounds = array<i64: 16, 128>}, {pipeline_mode = #tpu.pipeline_mode<synchronous>, transform_indices = @transform_2, window_bounds = array<i64: 1, 128>}, {pipeline_mode = #tpu.pipeline_mode<synchronous>, transform_indices = @transform_3, window_bounds = array<i64: 128, 16>}, {pipeline_mode = #tpu.pipeline_mode<synchronous>, transform_indices = @transform_4, window_bounds = array<i64: 1, 16>}, {pipeline_mode = #tpu.pipeline_mode<synchronous>, transform_indices = @transform_5, window_bounds = array<i64: 1, 16>}, {pipeline_mode = #tpu.pipeline_mode<synchronous>, transform_indices = @transform_6, window_bounds = array<i64: 1, 16>}, {transform_indices = @transform_7, window_bounds = array<i64: 10, 16>}]} {
    %c0 = arith.constant 0 : index
    %c0_0 = arith.constant 0 : index
    %0 = vector.load %arg1[%c0, %c0_0] : memref<10x16xbf16, #tpu.memory_space<vmem>>, vector<10x16xbf16>
    %1 = arith.extf %0 : vector<10x16xbf16> to vector<10x16xf32>
    %c0_1 = arith.constant 0 : index
    %c0_2 = arith.constant 0 : index
    %2 = vector.load %arg2[%c0_1, %c0_2] : memref<16x128xbf16, #tpu.memory_space<vmem>>, vector<16x128xbf16>
    %3 = arith.truncf %1 : vector<10x16xf32> to vector<10x16xbf16>
    %cst = arith.constant dense<0.000000e+00> : vector<10x128xf32>
    %4 = tpu.matmul %3, %2, %cst {dimension_numbers = #tpu.dot_dimension_numbers<[1], [0], [0], [1], [0, 0, 1, 1], [], []>} : vector<10x16xbf16>, vector<16x128xbf16>, vector<10x128xf32> -> vector<10x128xf32>
    %c0_3 = arith.constant 0 : index
    %c0_4 = arith.constant 0 : index
    %5 = vector.load %arg3[%c0_3, %c0_4] : memref<1x128xf32, #tpu.memory_space<vmem>>, vector<1x128xf32>
    %6 = vector.broadcast %5 : vector<1x128xf32> to vector<10x128xf32>
    %7 = arith.addf %4, %6 : vector<10x128xf32>
    %cst_5 = arith.constant 0.000000e+00 : f32
    %8 = vector.broadcast %cst_5 : f32 to vector<10x128xf32>
    %9 = arith.maximumf %7, %8 : vector<10x128xf32>
    %c0_6 = arith.constant 0 : index
    %c0_7 = arith.constant 0 : index
    %10 = vector.load %arg4[%c0_6, %c0_7] : memref<128x16xbf16, #tpu.memory_space<vmem>>, vector<128x16xbf16>
    %11 = arith.truncf %9 : vector<10x128xf32> to vector<10x128xbf16>
    %cst_8 = arith.constant dense<0.000000e+00> : vector<10x16xf32>
    %12 = tpu.matmul %11, %10, %cst_8 {dimension_numbers = #tpu.dot_dimension_numbers<[1], [0], [0], [1], [0, 0, 1, 1], [], []>} : vector<10x128xbf16>, vector<128x16xbf16>, vector<10x16xf32> -> vector<10x16xf32>
    %c0_9 = arith.constant 0 : index
    %c0_10 = arith.constant 0 : index
    %13 = vector.load %arg5[%c0_9, %c0_10] : memref<1x16xf32, #tpu.memory_space<vmem>>, vector<1x16xf32>
    %14 = vector.broadcast %13 : vector<1x16xf32> to vector<10x16xf32>
    %15 = arith.addf %12, %14 : vector<10x16xf32>
    %16 = arith.addf %1, %15 : vector<10x16xf32>
    %c0_11 = arith.constant 0 : index
    %c0_12 = arith.constant 0 : index
    %17 = vector.load %arg6[%c0_11, %c0_12] : memref<1x16xf32, #tpu.memory_space<vmem>>, vector<1x16xf32>
    %c0_13 = arith.constant 0 : index
    %c0_14 = arith.constant 0 : index
    %18 = vector.load %arg7[%c0_13, %c0_14] : memref<1x16xf32, #tpu.memory_space<vmem>>, vector<1x16xf32>
    %cst_15 = arith.constant dense<0.000000e+00> : vector<10xf32>
    %19 = vector.multi_reduction <add>, %16, %cst_15 [1] : vector<10x16xf32> to vector<10xf32>
    %20 = vector.shape_cast %19 : vector<10xf32> to vector<10x1xf32>
    %cst_16 = arith.constant 1.600000e+01 : f32
    %21 = vector.broadcast %cst_16 : f32 to vector<10x1xf32>
    %22 = arith.divf %20, %21 : vector<10x1xf32>
    %23 = vector.broadcast %22 : vector<10x1xf32> to vector<10x16xf32>
    %24 = arith.subf %16, %23 : vector<10x16xf32>
    %25 = arith.mulf %24, %24 : vector<10x16xf32>
    %cst_17 = arith.constant dense<0.000000e+00> : vector<10xf32>
    %26 = vector.multi_reduction <add>, %25, %cst_17 [1] : vector<10x16xf32> to vector<10xf32>
    %27 = vector.shape_cast %26 : vector<10xf32> to vector<10x1xf32>
    %cst_18 = arith.constant 1.600000e+01 : f32
    %28 = vector.broadcast %cst_18 : f32 to vector<10x1xf32>
    %29 = arith.divf %27, %28 : vector<10x1xf32>
    %30 = vector.broadcast %22 : vector<10x1xf32> to vector<10x16xf32>
    %31 = arith.subf %16, %30 : vector<10x16xf32>
    %cst_19 = arith.constant 9.99999974E-6 : f32
    %32 = vector.broadcast %cst_19 : f32 to vector<10x1xf32>
    %33 = arith.addf %29, %32 : vector<10x1xf32>
    %34 = math.rsqrt %33 : vector<10x1xf32>
    %35 = vector.broadcast %34 : vector<10x1xf32> to vector<10x16xf32>
    %36 = arith.mulf %31, %35 : vector<10x16xf32>
    %37 = vector.broadcast %17 : vector<1x16xf32> to vector<10x16xf32>
    %38 = arith.mulf %36, %37 : vector<10x16xf32>
    %39 = vector.broadcast %18 : vector<1x16xf32> to vector<10x16xf32>
    %40 = arith.addf %38, %39 : vector<10x16xf32>
    %41 = arith.truncf %40 : vector<10x16xf32> to vector<10x16xbf16>
    %c0_20 = arith.constant 0 : index
    %c0_21 = arith.constant 0 : index
    %42 = vector.load %arg8[%c0_20, %c0_21] : memref<10x16xbf16, #tpu.memory_space<vmem>>, vector<10x16xbf16>
    tpu.vector_store %arg8[%c0_20, %c0_21], %41 {strides = array<i32>} : memref<10x16xbf16, #tpu.memory_space<vmem>>, vector<10x16xbf16>,
    return
  }
  func.func @transform_0(%arg0: i32) -> (i32, i32) {
    %c0_i32 = arith.constant 0 : i32
    %c0_i32_0 = arith.constant 0 : i32
    return %arg0, %c0_i32 : i32, i32
  }
  func.func @transform_1(%arg0: i32) -> (i32, i32) {
    %c0_i32 = arith.constant 0 : i32
    %c0_i32_0 = arith.constant 0 : i32
    %c0_i32_1 = arith.constant 0 : i32
    return %c0_i32, %c0_i32_0 : i32, i32
  }
  func.func @transform_2(%arg0: i32) -> (i32, i32) {
    %c0_i32 = arith.constant 0 : i32
    %c0_i32_0 = arith.constant 0 : i32
    %c0_i32_1 = arith.constant 0 : i32
    return %c0_i32, %c0_i32_0 : i32, i32
  }
  func.func @transform_3(%arg0: i32) -> (i32, i32) {
    %c0_i32 = arith.constant 0 : i32
    %c0_i32_0 = arith.constant 0 : i32
    %c0_i32_1 = arith.constant 0 : i32
    return %c0_i32, %c0_i32_0 : i32, i32
  }
  func.func @transform_4(%arg0: i32) -> (i32, i32) {
    %c0_i32 = arith.constant 0 : i32
    %c0_i32_0 = arith.constant 0 : i32
    %c0_i32_1 = arith.constant 0 : i32
    return %c0_i32, %c0_i32_0 : i32, i32
  }
  func.func @transform_5(%arg0: i32) -> (i32, i32) {
    %c0_i32 = arith.constant 0 : i32
    %c0_i32_0 = arith.constant 0 : i32
    %c0_i32_1 = arith.constant 0 : i32
    return %c0_i32, %c0_i32_0 : i32, i32
  }
  func.func @transform_6(%arg0: i32) -> (i32, i32) {
    %c0_i32 = arith.constant 0 : i32
    %c0_i32_0 = arith.constant 0 : i32
    %c0_i32_1 = arith.constant 0 : i32
    return %c0_i32, %c0_i32_0 : i32, i32
  }
  func.func @transform_7(%arg0: i32) -> (i32, i32) {
    %c0_i32 = arith.constant 0 : i32
    %c0_i32_0 = arith.constant 0 : i32
    return %arg0, %c0_i32 : i32, i32
  }
}

</mosaic_0001>

<bundles_post_ra>
// kernel: model_forward.12
= control target key start
LH: loop header
LB: loop body
LE: loop exit
PB: predicated region body
PF: predicated region fallthrough
CT: control target
= control target key end

     0   :  { %vm31_vm0 = vcmask 261120   ;;  %v168_v3 = vmov 32.0   ;;  %vm139_vm8 = vcmask 125952   ;;  %s241_s0 = inlined_call_operand.vmem [shape: bf16[8,32], index: 0, kind: input, shape index: {}]   ;;  %s242_s1 = inlined_call_operand.vmem [shape: f32[1,32], index: 1, kind: input, shape index: {}]   ;;  %s243_s2 = inlined_call_operand.vmem [shape: f32[1,32], index: 2, kind: input, shape index: {}]   ;;  %s244_s3 = inlined_call_operand.vmem [shape: f32[1,32], index: 3, kind: input, shape index: {}]   ;;  %s245_s4 = inlined_call_operand.vmem [shape: f32[1,32], index: 4, kind: input, shape index: {}]   ;;  %s246_s6 = inlined_call_operand.vmem [shape: f32[1,16], index: 6, kind: input, shape index: {}]   ;;  %s247_s5 = inlined_call_operand.vmem [shape: bf16[32,16], index: 5, kind: input, shape index: {}]   ;;  %s248_s7 = inlined_call_operand.vmem [shape: bf16[8,16], index: 7, kind: output, shape index: {}]  }
   0x1   :  { %v27_v0 = vld [vmem:[%s241_s0] sm:$0xf]  ;;  %162 = vrcp.f32 %v168_v3  ;;  %v155_v36 = vld [vmem:[%s247_s5 + $0x8] sm:$0xff] }
   0x2   :  { %v28_v1 = vunpack.c.l.bf16 %v27_v0  ;;  %v157_v24 = vld [vmem:[%s242_s1] ss:$0 sm:$0xff]  ;;  %131 = vmatpush.bf16.msra.mxu0 %v155_v36 }
   0x3   :  { %v158_v27 = vld [vmem:[%s243_s2] ss:$0 sm:$0xff] }
   0x4   :  { %v32_v2 = vsel %vm31_vm0, %v28_v1, 0.0  ;;  %v154_v37 = vld [vmem:[%s247_s5] sm:$0xff] }
   0x5   :  { %33 = vadd.xlane.f32.xlu0 %v32_v2  ;;  %v159_v47 = vld [vmem:[%s244_s3] ss:$0 sm:$0xff] }
   0x6   :  { %132 = vmatpush.bf16.msra.mxu0 %v154_v37  ;;  %v160_v50 = vld [vmem:[%s245_s4] ss:$0 sm:$0xff] }
   0x7   :  { %v163_v4 = vpop.eup %162  ;;  %v161_v54 = vld [vmem:[%s246_s6] ss:$0 sm:$0xff] }
   0x8   :  { %v36_v5 = vmul.f32 32.0, %v163_v4  ;;  %vm40_vm1 = vweird.f32 %v163_v4 }
   0xa   :  { %v37_v6 = vsub.f32 1.0, %v36_v5 }
   0xc   :  { %v38_v7 = vmul.f32 %v163_v4, %v37_v6 }
   0xe   :  { %v39_v8 = vadd.f32 %v163_v4, %v38_v7 }
  0x10   :  { %v41_v9 = vsel %vm40_vm1, %v163_v4, %v39_v8 }
  0x78   :  { %v34_v10 = vpop.xlane.xlu0 %33 }
  0x79   :  { %v42_v11 = vmul.f32 %v41_v9, %v34_v10 }
  0x7b   :  { %v43_v12 = vsub.f32 %v28_v1, %v42_v11 }
  0x7d   :  { %v44_v13 = vmul.f32 %v43_v12, %v43_v12 }
  0x7f   :  { %v45_v14 = vsel %vm31_vm0, %v44_v13, 0.0 }
  0x80   :  { %46 = vadd.xlane.f32.xlu0 %v45_v14 }
  0xf3   :  { %v47_v15 = vpop.xlane.xlu0 %46 }
  0xf4   :  { %v48_v16 = vmul.f32 %v47_v15, %v41_v9 }
  0xf6   :  { %v49_v17 = vadd.f32 1e-05, %v48_v16 }
  0xf8   :  { %164 = vrsqrt.f32 %v49_v17  ;;  %vm56_vm3 = vweird.f32 %v49_v17 }
  0xfe   :  { %v165_v18 = vpop.eup %164 }
  0xff   :  { %v51_v19 = vmul.f32 %v165_v18, %v49_v17  ;;  %vm57_vm2 = vweird.f32 %v165_v18 }
 0x100   :  { %vm58_vm4 = vmor %vm56_vm3, %vm57_vm2 }
 0x101   :  { %v52_v20 = vmul.f32 %v165_v18, %v51_v19 }
 0x103   :  { %v53_v21 = vmul.f32 0.5, %v52_v20 }
 0x105   :  { %v54_v22 = vsub.f32 1.5, %v53_v21 }
 0x107   :  { %v55_v23 = vmul.f32 %v165_v18, %v54_v22 }
 0x109   :  { %v59_v25 = vsel %vm58_vm4, %v165_v18, %v55_v23 }
 0x10a   :  { %v60_v26 = vmul.f32 %v59_v25, %v43_v12 }
 0x10c   :  { %v64_v28 = vmul.f32 %v157_v24, %v60_v26 }
 0x10e   :  { %v68_v29 = vadd.f32 %v158_v27, %v64_v28 }
 0x110   :  { %v71_v30 = vsel %vm31_vm0, %v68_v29, 0.0 }
 0x111   :  { %72 = vadd.xlane.f32.xlu1 %v71_v30 }
 0x184   :  { %v73_v31 = vpop.xlane.xlu1 %72 }
 0x185   :  { %v74_v32 = vmul.f32 %v73_v31, %v41_v9 }
 0x187   :  { %v75_v33 = vsub.f32 %v68_v29, %v74_v32 }
 0x189   :  { %v76_v34 = vmul.f32 %v75_v33, %v75_v33 }
 0x18b   :  { %v77_v35 = vsel %vm31_vm0, %v76_v34, 0.0 }
 0x18c   :  { %78 = vadd.xlane.f32.xlu1 %v77_v35 }
 0x1ff   :  { %v79_v38 = vpop.xlane.xlu1 %78 }
 0x200   :  { %v80_v39 = vmul.f32 %v79_v38, %v41_v9 }
 0x202   :  { %v81_v40 = vadd.f32 1e-05, %v80_v39 }
 0x204   :  { %166 = vrsqrt.f32 %v81_v40  ;;  %vm88_vm6 = vweird.f32 %v81_v40 }
 0x20a   :  { %v167_v41 = vpop.eup %166 }
 0x20b   :  { %v83_v42 = vmul.f32 %v167_v41, %v81_v40  ;;  %vm89_vm5 = vweird.f32 %v167_v41 }
 0x20c   :  { %vm90_vm7 = vmor %vm88_vm6, %vm89_vm5 }
 0x20d   :  { %v84_v43 = vmul.f32 %v167_v41, %v83_v42 }
 0x20f   :  { %v85_v44 = vmul.f32 0.5, %v84_v43 }
 0x211   :  { %v86_v45 = vsub.f32 1.5, %v85_v44 }
 0x213   :  { %v87_v46 = vmul.f32 %v167_v41, %v86_v45 }
 0x215   :  { %v91_v48 = vsel %vm90_vm7, %v167_v41, %v87_v46 }
 0x216   :  { %v92_v49 = vmul.f32 %v91_v48, %v75_v33 }
 0x218   :  { %v96_v51 = vmul.f32 %v159_v47, %v92_v49 }
 0x21a   :  { %v100_v52 = vadd.f32 %v160_v50, %v96_v51 }
 0x21c   :  { %v105_v53 = vpack.c.bf16 %v100_v52, %v100_v52 }
 0x21e   :  { %153 = vmatmul.msk.bf16.vlgmr.msra.gmra.mxu0 %vm31_vm0, %v105_v53 }
 0x29b   :  { %v134_v55 = vpop.f32.mrf.mxu0 }
 0x29c   :  { %v135_v56 = vadd.f32 %v161_v54, %v134_v55 }
 0x29e   :  { %v138_v57 = vpack.c.bf16 %v135_v56, %v135_v56 }
 0x2a0   :  { %140 = vst.msk [vmem:[%s248_s7] sm:$0xf] %vm139_vm8, %v138_v57 }
 0x2a3   :  { %v136_v58 = vpop.f32.mrf.mxu0 }

// kernel: model_forward.9
= control target key start
LH: loop header
LB: loop body
LE: loop exit
PB: predicated region body
PF: predicated region fallthrough
CT: control target
= control target key end

     0   :  { %s804_s24 = smov 0   ;;  %s914_s0 = inlined_call_operand.vmem [shape: bf16[64,32], index: 0, kind: input, shape index: {}]   ;;  %s915_s1 = inlined_call_operand.vmem [shape: f32[1,32], index: 1, kind: input, shape index: {}]   ;;  %s916_s2 = inlined_call_operand.vmem [shape: f32[1,32], index: 2, kind: input, shape index: {}]   ;;  %s917_s3 = inlined_call_operand.vmem [shape: bf16[32,128], index: 3, kind: input, shape index: {}]   ;;  %s918_s4 = inlined_call_operand.vmem [shape: f32[1,128], index: 4, kind: input, shape index: {}]   ;;  %s919_s5 = inlined_call_operand.vmem [shape: bf16[128,32], index: 5, kind: input, shape index: {}]   ;;  %s920_s6 = inlined_call_operand.vmem [shape: f32[1,32], index: 6, kind: input, shape index: {}]   ;;  %s921_s7 = inlined_call_operand.vmem [shape: bf16[64,32], index: 7, kind: output, shape index: {}]  }
   0x1 LB: > { %s644_s25 = sadd.s32 4294967295, %s761_s24   ;;  %p648_p0 = scmp.ge.s32.totalorder %s761_s24, 1  ;;  %s761_s24 = sphi %s804_s24, %s17_s24  }
   0x2   : > { %p238_p1 = scmp.lt.s32.totalorder %s761_s24, 3 }
   0x4   : > { %p239_p2 = pnand %p648_p0, %p238_p1 }
   0x5   : > { %s649_s26 = sshll.u32 (!%p239_p2), %s644_s25, 2 }
   0x6   : > { %242 = sbr.rel (%p239_p2) target bundleno = 620 (0x26c), region = 48  ;;  %p271_p3 = scmp.lt.s32.totalorder (!%p239_p2), %s649_s26, 7 }
   0xb   : > { %s923_s26 = smov (!%p271_p3, %s649_s26), 7  ;;  %vm293_vm0 = vcmask 261120   ;;  %v763_v10 = vmov 32.0   ;;  %v698_v37 = vld [vmem:[%s917_s3 + $0x8] sm:$0xff]  ;;  %v697_v41 = vld [vmem:[%s917_s3] sm:$0xff]  ;;  %vm583_vm14 = vcmask 257024  }
   0xc   : > { %s650_s27 = sshll.u32 %s923_s26, 2  ;;  %737 = vrcp.f32 %v763_v10  ;;  %437 = vmatpush.bf16.msra.mxu0 %v698_v37  ;;  %v706_v37 = vld [vmem:[%s919_s5 + $0x38] sm:$0xff] }
   0xd   : > { %s274_s30 = scalar_lea.vmem %s914_s0, %s650_s27  ;;  %556 = vmatpush.bf16.msra.mxu1 %v706_v37  ;;  %716 = vmatpush.bf16.msra.mxu2 %v706_v37  ;;  %s280_s18 = scalar_lea.vmem %s921_s7, %s650_s27 }
   0xe   : > { %v715_v0 = vld [vmem:[%s274_s30 + $0x8] sm:$0xff]   ;;  %v708_v1 = vld [vmem:[%s274_s30] sm:$0xff]  }
   0xf   : > { %v820_v2 = vunpack.c.l.bf16 %v715_v0  ;;  %v822_v3 = vunpack.c.l.bf16 %v708_v1  ;;  %v828_v6 = vunpack.c.h.bf16 %v715_v0  ;;  %v830_v7 = vunpack.c.h.bf16 %v708_v1 }
  0x10   : > { %438 = vmatpush.bf16.msra.mxu0 %v697_v41  ;;  %v700_v41 = vld [vmem:[%s919_s5 + $0x8] sm:$0xff] }
  0x11   : > { %v300_v4 = vsel %vm293_vm0, %v820_v2, 0.0  ;;  %v294_v5 = vsel %vm293_vm0, %v822_v3, 0.0  ;;  %v303_v8 = vsel %vm293_vm0, %v828_v6, 0.0  ;;  %v297_v9 = vsel %vm293_vm0, %v830_v7, 0.0 }
  0x12   : > { %301 = vadd.xlane.f32.xlu1 %v300_v4  ;;  %295 = vadd.xlane.f32.xlu0 %v294_v5  ;;  %v738_v11 = vpop.eup %737 }
  0x13   : > { %v307_v12 = vmul.f32 32.0, %v738_v11  ;;  %vm311_vm1 = vweird.f32 %v738_v11 }
  0x15   : > { %v308_v13 = vsub.f32 1.0, %v307_v12 }
  0x17   : > { %v309_v14 = vmul.f32 %v738_v11, %v308_v13 }
  0x19   : > { %v310_v15 = vadd.f32 %v738_v11, %v309_v14 }
  0x1a   : > { %304 = vadd.xlane.f32.xlu1 %v303_v8  ;;  %298 = vadd.xlane.f32.xlu0 %v297_v9 }
  0x1b   : > { %v312_v16 = vsel %vm311_vm1, %v738_v11, %v310_v15  ;;  %v733_v11 = vld [vmem:[%s915_s1] ss:$0 sm:$0xff] }
  0x85   : > { %v302_v17 = vpop.xlane.xlu1 %301  ;;  %v296_v18 = vpop.xlane.xlu0 %295 }
  0x86   : > { %v315_v19 = vmul.f32 %v312_v16, %v302_v17  ;;  %v313_v20 = vmul.f32 %v312_v16, %v296_v18  ;;  %v734_v18 = vld [vmem:[%s916_s2] ss:$0 sm:$0xff] }
  0x88   : > { %v837_v21 = vsub.f32 %v820_v2, %v315_v19  ;;  %v317_v22 = vsub.f32 %v822_v3, %v313_v20 }
  0x8a   : > { %v323_v23 = vmul.f32 %v837_v21, %v837_v21  ;;  %v321_v24 = vmul.f32 %v317_v22, %v317_v22 }
  0x8c   : > { %v331_v25 = vsel %vm293_vm0, %v323_v23, 0.0  ;;  %v325_v26 = vsel %vm293_vm0, %v321_v24, 0.0 }
  0x8d   : > { %v305_v27 = vpop.xlane.xlu1 %304  ;;  %332 = vadd.xlane.f32.xlu0 %v331_v25  ;;  %326 = vadd.xlane.f32.xlu2 %v325_v26  ;;  %v299_v28 = vpop.xlane.xlu0 %298 }
  0x8e   : > { %v316_v29 = vmul.f32 %v312_v16, %v305_v27  ;;  %v314_v30 = vmul.f32 %v312_v16, %v299_v28 }
  0x90   : > { %v845_v31 = vsub.f32 %v828_v6, %v316_v29  ;;  %v318_v32 = vsub.f32 %v830_v7, %v314_v30 }
  0x92   : > { %v324_v33 = vmul.f32 %v845_v31, %v845_v31  ;;  %v322_v34 = vmul.f32 %v318_v32, %v318_v32 }
  0x94   : > { %v334_v35 = vsel %vm293_vm0, %v324_v33, 0.0  ;;  %v328_v36 = vsel %vm293_vm0, %v322_v34, 0.0 }
  0x95   : > { %335 = vadd.xlane.f32.xlu1 %v334_v35  ;;  %329 = vadd.xlane.f32.xlu2 %v328_v36 }
 0x100   : > { %v327_v38 = vpop.xlane.xlu2 %326  ;;  %v333_v40 = vpop.xlane.xlu0 %332 }
 0x101   : > { %v337_v39 = vmul.f32 %v327_v38, %v312_v16  ;;  %v339_v43 = vmul.f32 %v333_v40, %v312_v16  ;;  %v705_v38 = vld [vmem:[%s919_s5 + $0x30] sm:$0xff] }
 0x102   : > { %557 = vmatpush.bf16.msra.mxu1 %v705_v38  ;;  %717 = vmatpush.bf16.msra.mxu2 %v705_v38  ;;  %v701_v40 = vld [vmem:[%s919_s5 + $0x10] sm:$0xff] }
 0x103   : > { %v341_v42 = vadd.f32 1e-05, %v337_v39  ;;  %v343_v44 = vadd.f32 1e-05, %v339_v43  ;;  %v702_v39 = vld [vmem:[%s919_s5 + $0x18] sm:$0xff]  ;;  %v699_v43 = vld [vmem:[%s919_s5] sm:$0xff] }
 0x105   : > { %739 = vrsqrt.f32 %v341_v42  ;;  %vm351_vm3 = vweird.f32 %v341_v42  ;;  %vm371_vm10 = vweird.f32 %v343_v44 }
 0x106   : > { %741 = vrsqrt.f32 %v343_v44 }
 0x108   : > { %v336_v45 = vpop.xlane.xlu1 %335  ;;  %v330_v46 = vpop.xlane.xlu2 %329 }
 0x109   : > { %v340_v47 = vmul.f32 %v336_v45, %v312_v16  ;;  %v338_v48 = vmul.f32 %v330_v46, %v312_v16 }
 0x10b   : > { %v740_v49 = vpop.eup %739  ;;  %v344_v50 = vadd.f32 1e-05, %v340_v47  ;;  %v342_v51 = vadd.f32 1e-05, %v338_v48 }
 0x10c   : > { %v346_v52 = vmul.f32 %v740_v49, %v341_v42  ;;  %v742_v55 = vpop.eup %741  ;;  %vm352_vm2 = vweird.f32 %v740_v49  ;;  %v735_v42 = vld [vmem:[%s918_s4] ss:$0 sm:$0xff] }
 0x10d   : > { %743 = vrsqrt.f32 %v344_v50  ;;  %v366_v61 = vmul.f32 %v742_v55, %v343_v44  ;;  %vm353_vm4 = vmor %vm351_vm3, %vm352_vm2  ;;  %vm361_vm6 = vweird.f32 %v342_v51  ;;  %vm381_vm8 = vweird.f32 %v344_v50 }
 0x10e   : > { %v347_v53 = vmul.f32 %v740_v49, %v346_v52  ;;  %745 = vrsqrt.f32 %v342_v51  ;;  %vm372_vm11 = vweird.f32 %v742_v55 }
 0x10f   : > { %v367_v4 = vmul.f32 %v742_v55, %v366_v61  ;;  %vm373_vm13 = vmor %vm371_vm10, %vm372_vm11 }
 0x110   : > { %v348_v54 = vmul.f32 0.5, %v347_v53 }
 0x111   : > { %v368_v12 = vmul.f32 0.5, %v367_v4 }
 0x112   : > { %v349_v56 = vsub.f32 1.5, %v348_v54 }
 0x113   : > { %v744_v57 = vpop.eup %743  ;;  %v369_v19 = vsub.f32 1.5, %v368_v12 }
 0x114   : > { %v746_v58 = vpop.eup %745  ;;  %v376_v59 = vmul.f32 %v744_v57, %v344_v50  ;;  %v350_v60 = vmul.f32 %v740_v49, %v349_v56  ;;  %vm382_vm9 = vweird.f32 %v744_v57 }
 0x115   : > { %v356_v62 = vmul.f32 %v746_v58, %v342_v51  ;;  %vm362_vm5 = vweird.f32 %v746_v58  ;;  %vm383_vm12 = vmor %vm381_vm8, %vm382_vm9  ;;  %v370_v25 = vmul.f32 %v742_v55, %v369_v19 }
 0x116   : > { %v377_v63 = vmul.f32 %v744_v57, %v376_v59  ;;  %v354_v1 = vsel %vm353_vm4, %v740_v49, %v350_v60  ;;  %vm363_vm7 = vmor %vm361_vm6, %vm362_vm5 }
 0x117   : > { %v357_v0 = vmul.f32 %v746_v58, %v356_v62  ;;  %v385_v10 = vmul.f32 %v354_v1, %v317_v22  ;;  %v374_v28 = vsel %vm373_vm13, %v742_v55, %v370_v25 }
 0x118   : > { %v378_v8 = vmul.f32 0.5, %v377_v63  ;;  %v387_v30 = vmul.f32 %v374_v28, %v837_v21  ;;  %v704_v21 = vld [vmem:[%s919_s5 + $0x28] sm:$0xff] }
 0x119   : > { %v358_v5 = vmul.f32 0.5, %v357_v0  ;;  %v392_v17 = vmul.f32 %v733_v11, %v385_v10  ;;  %558 = vmatpush.bf16.msra.mxu1 %v704_v21  ;;  %718 = vmatpush.bf16.msra.mxu2 %v704_v21 }
 0x11a   : > { %v379_v14 = vsub.f32 1.5, %v378_v8  ;;  %v394_v33 = vmul.f32 %v733_v11, %v387_v30 }
 0x11b   : > { %v359_v9 = vsub.f32 1.5, %v358_v5  ;;  %v399_v23 = vadd.f32 %v734_v18, %v392_v17 }
 0x11c   : > { %v380_v22 = vmul.f32 %v744_v57, %v379_v14  ;;  %v401_v35 = vadd.f32 %v734_v18, %v394_v33 }
 0x11d   : > { %v360_v13 = vmul.f32 %v746_v58, %v359_v9 }
 0x11e   : > { %v384_v27 = vsel %vm383_vm12, %v744_v57, %v380_v22 }
 0x11f   : > { %v364_v15 = vsel %vm363_vm7, %v746_v58, %v360_v13  ;;  %v388_v29 = vmul.f32 %v384_v27, %v845_v31  ;;  %v703_v31 = vld [vmem:[%s919_s5 + $0x20] sm:$0xff] }
 0x120   : > { %v386_v16 = vmul.f32 %v364_v15, %v318_v32  ;;  %559 = vmatpush.bf16.msra.mxu1 %v703_v31  ;;  %719 = vmatpush.bf16.msra.mxu2 %v703_v31 }
 0x121   : > { %v395_v32 = vmul.f32 %v733_v11, %v388_v29 }
 0x122   : > { %v393_v20 = vmul.f32 %v733_v11, %v386_v16 }
 0x123   : > { %v402_v34 = vadd.f32 %v734_v18, %v395_v32  ;;  %v736_v32 = vld [vmem:[%s920_s6] ss:$0 sm:$0xff] }
 0x124   : > { %v400_v24 = vadd.f32 %v734_v18, %v393_v20  ;;  %560 = vmatpush.bf16.msra.mxu1 %v702_v39  ;;  %720 = vmatpush.bf16.msra.mxu2 %v702_v39 }
 0x125   : > { %v408_v36 = vpack.c.bf16 %v402_v34, %v401_v35 }
 0x126   : > { %v407_v26 = vpack.c.bf16 %v400_v24, %v399_v23 }
 0x128   : > { %661 = vmatmul.msk.bf16.vlgmr.msra.gmra.mxu0 %vm293_vm0, %v407_v26  ;;  %561 = vmatpush.bf16.msra.mxu1 %v701_v40 }
 0x129   : > { %721 = vmatpush.bf16.msra.mxu2 %v701_v40 }
 0x12c   : > { %562 = vmatpush.bf16.msra.mxu1 %v700_v41 }
 0x12d   : > { %722 = vmatpush.bf16.msra.mxu2 %v700_v41 }
 0x130   : > { %563 = vmatpush.bf16.msra.mxu1 %v699_v43 }
 0x131   : > { %723 = vmatpush.bf16.msra.mxu2 %v699_v43 }
 0x138   : > { %662 = vmatmul.msk.bf16.gmra.mxu0 %vm293_vm0, %v408_v36 }
 0x1a5   : > { %v440_v44 = vpop.f32.mrf.mxu0 }
 0x1a6   : > { %v441_v45 = vadd.f32 %v735_v42, %v440_v44 }
 0x1a8   : > { %v450_v46 = vmul.f32 %v441_v45, %v441_v45 }
 0x1aa   : > { %v454_v47 = vmul.f32 %v450_v46, %v441_v45 }
 0x1ac   : > { %v458_v48 = vmul.f32 0.044715, %v454_v47 }
 0x1ad   : > { %v442_v49 = vpop.f32.mrf.mxu0 }
 0x1ae   : > { %v462_v50 = vadd.f32 %v458_v48, %v441_v45  ;;  %v443_v51 = vadd.f32 %v735_v42, %v442_v49 }
 0x1b0   : > { %v451_v52 = vmul.f32 %v443_v51, %v443_v51  ;;  %v466_v53 = vmul.f32 0.7978846, %v462_v50 }
 0x1b2   : > { %v455_v54 = vmul.f32 %v451_v52, %v443_v51  ;;  %747 = vtanh.f32 %v466_v53 }
 0x1b4   : > { %v459_v55 = vmul.f32 0.044715, %v455_v54 }
 0x1b5   : > { %v445_v56 = vpop.f32.mrf.mxu0 }
 0x1b6   : > { %v463_v57 = vadd.f32 %v459_v55, %v443_v51  ;;  %v446_v58 = vadd.f32 %v735_v42, %v445_v56 }
 0x1b8   : > { %v452_v59 = vmul.f32 %v446_v58, %v446_v58  ;;  %v467_v60 = vmul.f32 0.7978846, %v463_v57  ;;  %v748_v61 = vpop.eup %747 }
 0x1b9   : > { %v474_v1 = vadd.f32 1.0, %v748_v61 }
 0x1ba   : > { %v456_v62 = vmul.f32 %v452_v59, %v446_v58  ;;  %749 = vtanh.f32 %v467_v60 }
 0x1bb   : > { %v478_v12 = vmul.f32 0.5, %v474_v1 }
 0x1bc   : > { %v460_v63 = vmul.f32 0.044715, %v456_v62 }
 0x1bd   : > { %v447_v0 = vpop.f32.mrf.mxu0  ;;  %v482_v16 = vmul.f32 %v478_v12, %v441_v45 }
 0x1be   : > { %v464_v4 = vadd.f32 %v460_v63, %v446_v58  ;;  %v448_v5 = vadd.f32 %v735_v42, %v447_v0 }
 0x1c0   : > { %v750_v8 = vpop.eup %749  ;;  %v453_v9 = vmul.f32 %v448_v5, %v448_v5  ;;  %v468_v10 = vmul.f32 0.7978846, %v464_v4 }
 0x1c1   : > { %v475_v11 = vadd.f32 1.0, %v750_v8 }
 0x1c2   : > { %v457_v13 = vmul.f32 %v453_v9, %v448_v5  ;;  %751 = vtanh.f32 %v468_v10 }
 0x1c3   : > { %v479_v14 = vmul.f32 0.5, %v475_v11 }
 0x1c4   : > { %v461_v15 = vmul.f32 0.044715, %v457_v13 }
 0x1c5   : > { %v483_v17 = vmul.f32 %v479_v14, %v443_v51 }
 0x1c6   : > { %v465_v18 = vadd.f32 %v461_v15, %v448_v5 }
 0x1c7   : > { %v502_v19 = vpack.c.bf16 %v483_v17, %v482_v16 }
 0x1c8   : > { %v469_v20 = vmul.f32 0.7978846, %v465_v18  ;;  %v752_v22 = vpop.eup %751 }
 0x1c9   : > { %564 = vmatmul.bf16.vlgmr.msra.gmra.mxu1 %v502_v19  ;;  %v476_v23 = vadd.f32 1.0, %v752_v22 }
 0x1ca   : > { %753 = vtanh.f32 %v469_v20 }
 0x1cb   : > { %v480_v26 = vmul.f32 0.5, %v476_v23 }
 0x1cd   : > { %v484_v28 = vmul.f32 %v480_v26, %v446_v58 }
 0x1d0   : > { %v754_v24 = vpop.eup %753 }
 0x1d1   : > { %v477_v25 = vadd.f32 1.0, %v754_v24 }
 0x1d3   : > { %v481_v27 = vmul.f32 0.5, %v477_v25 }
 0x1d5   : > { %v485_v29 = vmul.f32 %v481_v27, %v448_v5 }
 0x1d7   : > { %v503_v30 = vpack.c.bf16 %v485_v29, %v484_v28 }
 0x1d9   : > { %569 = vmatmul.bf16.vlgmr.msra.gmra.mxu2 %v503_v30 }
 0x246   : > { %v565_v33 = vpop.f32.mrf.mxu1 }
 0x247   : > { %v566_v34 = vadd.f32 %v736_v32, %v565_v33 }
 0x249   : > { %v575_v35 = vadd.f32 %v822_v3, %v566_v34 }
 0x24b   : > { %v579_v36 = vpack.c.bf16 %v575_v35, %v575_v35 }
 0x24d   : > { %584 = vst.msk [vmem:[%s280_s18] sm:$0xf] %vm583_vm14, %v579_v36 }
 0x24e   : > { %v567_v37 = vpop.f32.mrf.mxu1 }
 0x24f   : > { %v568_v38 = vadd.f32 %v736_v32, %v567_v37 }
 0x251   : > { %v576_v21 = vadd.f32 %v830_v7, %v568_v38 }
 0x253   : > { %v580_v31 = vpack.c.bf16 %v576_v21, %v576_v21 }
 0x255   : > { %585 = vst.msk [vmem:[%s280_s18 + $0x4] sm:$0xf] %vm583_vm14, %v580_v31 }
 0x25c   : > { %v570_v39 = vpop.f32.mrf.mxu2 }
 0x25d   : > { %v571_v40 = vadd.f32 %v736_v32, %v570_v39 }
 0x25f   : > { %v577_v3 = vadd.f32 %v820_v2, %v571_v40 }
 0x261   : > { %v581_v41 = vpack.c.bf16 %v577_v3, %v577_v3 }
 0x263   : > { %586 = vst.msk [vmem:[%s280_s18 + $0x8] sm:$0xf] %vm583_vm14, %v581_v41 }
 0x264   : > { %v572_v42 = vpop.f32.mrf.mxu2 }
 0x265   : > { %v573_v43 = vadd.f32 %v736_v32, %v572_v42 }
 0x267   : > { %v578_v44 = vadd.f32 %v828_v6, %v573_v43 }
 0x269   : > { %v582_v45 = vpack.c.bf16 %v578_v44, %v578_v44 }
 0x26b   : > { %587 = vst.msk [vmem:[%s280_s18 + $0xc] sm:$0xf] %vm583_vm14, %v582_v45 }
 0x26c PF: > { %s17_s24 = sadd.s32 1, %s761_s24  }
 0x26d   : > { %p14_p4 = scmp.ge.s32.totalorder %s17_s24, 4  }
 0x26f   :  { %16 = sbr.rel (!%p14_p4) target bundleno = 1 (0x1), region = 78 }

// kernel: model_forward.8
= control target key start
LH: loop header
LB: loop body
LE: loop exit
PB: predicated region body
PF: predicated region fallthrough
CT: control target
= control target key end

     0   :  { %s943_s27 = smov 0   ;;  %s1066_s0 = inlined_call_operand.vmem [shape: bf16[8,8,32], index: 0, kind: input, shape index: {}]   ;;  %s1067_s1 = inlined_call_operand.vmem [shape: s32[8,1,8], index: 1, kind: input, shape index: {}]   ;;  %s1068_s2 = inlined_call_operand.vmem [shape: f32[1,32], index: 2, kind: input, shape index: {}]   ;;  %s1069_s3 = inlined_call_operand.vmem [shape: f32[1,32], index: 3, kind: input, shape index: {}]   ;;  %s1070_s4 = inlined_call_operand.vmem [shape: bf16[32,96], index: 4, kind: input, shape index: {}]   ;;  %s1071_s5 = inlined_call_operand.vmem [shape: f32[1,96], index: 5, kind: input, shape index: {}]   ;;  %s1072_s6 = inlined_call_operand.vmem [shape: bf16[32,32], index: 6, kind: input, shape index: {}]   ;;  %s1073_s7 = inlined_call_operand.vmem [shape: f32[1,32], index: 7, kind: input, shape index: {}]   ;;  %s1074_s8 = inlined_call_operand.vmem [shape: bf16[8,8,32], index: 8, kind: output, shape index: {}]  }
   0x1 LB: > { %s800_s28 = sadd.s32 4294967295, %s883_s27   ;;  %p804_p0 = scmp.ge.s32.totalorder %s883_s27, 1  ;;  %s883_s27 = sphi %s943_s27, %s18_s27  }
   0x2   : > { %p269_p1 = scmp.lt.s32.totalorder %s883_s27, 9 }
   0x4   : > { %p270_p2 = pnand %p804_p0, %p269_p1 }
   0x5   : > { %p304_p3 = scmp.lt.s32.totalorder (!%p270_p2), %s800_s28, 7  ;;  %s886_s21 = smov (!%p270_p2), 88  }
   0x6   : > { %273 = sbr.rel (%p270_p2) target bundleno = 1736 (0x6c8), region = 52  ;;  %s887_s22 = smov (!%p270_p2), 96  }
   0x7   : > { %s888_s23 = smov (!%p270_p2), 80   ;;  %s889_s24 = smov (!%p270_p2), 112  }
   0x8   : > { %s891_s9 = smov (!%p270_p2), 64   ;;  %s893_s11 = smov (!%p270_p2), 72  }
   0x9   : > { %s894_s12 = smov (!%p270_p2), 104   ;;  %s895_s15 = smov (!%p270_p2), 40  }
   0xa   : > { %s896_s16 = smov (!%p270_p2), 56   ;;  %s897_s17 = smov (!%p270_p2), 48  }
   0xb   : > { %s1078_s28 = smov (!%p304_p3, %s800_s28), 7  ;;  %vm320_vm0 = vcmask 261120   ;;  %v885_v3 = vmov 32.0   ;;  %v831_v15 = vld [vmem:[%s1070_s4 + $0x8] sm:$0xff]  ;;  %v830_v16 = vld [vmem:[%s1070_s4] sm:$0xff]  ;;  %vm414_vm5 = vcmask 64512   ;;  %v397_v51 = vlaneseq }
   0xc   : > { %s805_s29 = sshll.u32 %s1078_s28, 2  ;;  %857 = vrcp.f32 %v885_v3  ;;  %388 = vmatpush.bf16.msra.mxu0 %v831_v15  ;;  %v853_v26 = vld [vmem:[%s1068_s2] ss:$0 sm:$0xff]  ;;  %s310_s30 = scalar_lea.vmem %s1067_s1, %s1078_s28  ;;  %v890_v52 = vmov 0   ;;  %vm452_vm10 = vcmask 1043456   ;;  %vm736_vm11 = vcmask 257024  }
   0xd   : > { %s307_s10 = scalar_lea.vmem %s1066_s0, %s805_s29  ;;  %v854_v29 = vld [vmem:[%s1069_s3] ss:$0 sm:$0xff]  ;;  %v398_v54 = vshrl.u32 %v397_v51, 7  ;;  %v400_v55 = vand.u32 127, %v397_v51 }
   0xe   : > { %v316_v0 = vld [vmem:[%s307_s10] sm:$0xf]  ;;  %s892_s10 = smov 120  }
   0xf   : > { %v959_v1 = vunpack.c.l.bf16 %v316_v0  ;;  %v855_v33 = vld [vmem:[%s1071_s5] ss:$0 sm:$0xff]  ;;  %vm401_vm7 = vcmp.le.s32.totalorder %v400_v55, %v398_v54 }
  0x10   : > { %389 = vmatpush.bf16.msra.mxu0 %v830_v16  ;;  %v395_v50 = vld [vmem:[%s310_s30] sm:$0x1] }
  0x11   : > { %v321_v2 = vsel %vm320_vm0, %v959_v1, 0.0  ;;  %vm396_vm6 = vcmp.ne.s32.totalorder %v395_v50, 0 }
  0x12   : > { %322 = vadd.xlane.f32.xlu0 %v321_v2  ;;  %v858_v4 = vpop.eup %857  ;;  %v402_v53 = vsel %vm396_vm6, 1, %v890_v52 }
  0x13   : > { %v325_v5 = vmul.f32 32.0, %v858_v4  ;;  %vm329_vm1 = vweird.f32 %v858_v4  ;;  %v403_v56 = vperm.slane %v402_v53, 0 }
  0x15   : > { %v326_v6 = vsub.f32 1.0, %v325_v5  ;;  %vm404_vm8 = vcmp.eq.s32.totalorder %v403_v56, 1 }
  0x16   : > { %vm994_vm9 = vmand %vm404_vm8, %vm401_vm7 }
  0x17   : > { %v327_v7 = vmul.f32 %v858_v4, %v326_v6 }
  0x19   : > { %v328_v8 = vadd.f32 %v858_v4, %v327_v7 }
  0x1b   : > { %v330_v9 = vsel %vm329_vm1, %v858_v4, %v328_v8  ;;  %v470_v4 = vld [vmem:[%s1072_s6] sm:$0xf] }
  0x1c   : > { %v556_v5 = vsel %vm452_vm10, %v470_v4, 0 }
  0x85   : > { %v323_v10 = vpop.xlane.xlu0 %322 }
  0x86   : > { %v331_v11 = vmul.f32 %v330_v9, %v323_v10 }
  0x88   : > { %v332_v12 = vsub.f32 %v959_v1, %v331_v11 }
  0x8a   : > { %v333_v13 = vmul.f32 %v332_v12, %v332_v12 }
  0x8c   : > { %v334_v14 = vsel %vm320_vm0, %v333_v13, 0.0 }
  0x8d   : > { %335 = vadd.xlane.f32.xlu0 %v334_v14 }
 0x100   : > { %v336_v17 = vpop.xlane.xlu0 %335 }
 0x101   : > { %v337_v18 = vmul.f32 %v336_v17, %v330_v9 }
 0x103   : > { %v338_v19 = vadd.f32 1e-05, %v337_v18 }
 0x105   : > { %859 = vrsqrt.f32 %v338_v19  ;;  %vm345_vm3 = vweird.f32 %v338_v19 }
 0x10b   : > { %v860_v20 = vpop.eup %859 }
 0x10c   : > { %v340_v21 = vmul.f32 %v860_v20, %v338_v19  ;;  %vm346_vm2 = vweird.f32 %v860_v20 }
 0x10d   : > { %vm347_vm4 = vmor %vm345_vm3, %vm346_vm2 }
 0x10e   : > { %v341_v22 = vmul.f32 %v860_v20, %v340_v21 }
 0x110   : > { %v342_v23 = vmul.f32 0.5, %v341_v22 }
 0x112   : > { %v343_v24 = vsub.f32 1.5, %v342_v23 }
 0x114   : > { %v344_v25 = vmul.f32 %v860_v20, %v343_v24 }
 0x116   : > { %v348_v27 = vsel %vm347_vm4, %v860_v20, %v344_v25 }
 0x117   : > { %v349_v28 = vmul.f32 %v348_v27, %v332_v12 }
 0x119   : > { %v353_v30 = vmul.f32 %v853_v26, %v349_v28 }
 0x11b   : > { %v357_v31 = vadd.f32 %v854_v29, %v353_v30 }
 0x11d   : > { %v362_v32 = vpack.c.bf16 %v357_v31, %v357_v31 }
 0x11f   : > { %815 = vmatmul.msk.bf16.vlgmr.msra.gmra.mxu0 %vm320_vm0, %v362_v32 }
 0x19c   : > { %v391_v34 = vpop.f32.mrf.mxu0 }
 0x19d   : > { %v392_v35 = vadd.f32 %v855_v33, %v391_v34 }
 0x19f   : > { %v408_v36 = vpack.c.bf16 %v392_v35, %v392_v35  ;;  %v406_v40 = vmul.f32 0.35355338, %v392_v35 }
 0x1a1   : > { %v410_v37 = vunpack.c.l.b16 %v408_v36  ;;  %v407_v41 = vpack.c.bf16 %v406_v40, %v406_v40 }
 0x1a3   : > { %v981_v38 = vpack.c.b16 %v410_v37, %v410_v37  ;;  %v472_v42 = vunpack.c.l.b16 %v407_v41 }
 0x1a4   : > { %v393_v39 = vpop.f32.mrf.mxu0 }
 0x1a5   : > { %476 = vrot.lane.b32.xlu0 %v981_v38, %s886_s21  ;;  %412 = vrot.lane.b32.xlu1 %v981_v38, %s887_s22  ;;  %v473_v43 = vpack.c.b16 %v472_v42, %v472_v42 }
 0x1ad   : > { %573 = vrot.lane.b32.xlu0 %v981_v38, %s888_s23 }
 0x1b5   : > { %571 = vrot.lane.b32.xlu0 %v473_v43, %s889_s24 }
 0x217   : > { %v477_v44 = vpop.permute.xlu0 %476  ;;  %v413_v45 = vpop.permute.xlu1 %412 }
 0x218   : > { %v419_v46 = vsel %vm414_vm5, %v413_v45, 0  ;;  %v482_v47 = vsel %vm414_vm5, %v477_v44, 0 }
 0x219   : > { %428 = vmatpush.bf16.xpose.msra.mxu1 %v419_v46  ;;  %491 = vmatpush.bf16.xpose.msra.mxu3 %v482_v47 }
 0x21f   : > { %v574_v48 = vpop.permute.xlu0 %573 }
 0x220   : > { %816 = vmatmul.msk.bf16.vlgmr.msra.gmra.mxu1 %vm414_vm5, %v407_v41  ;;  %v579_v49 = vsel %vm414_vm5, %v574_v48, 0 }
 0x221   : > { %588 = vmatpush.bf16.xpose.msrb.mxu3 %v579_v49  ;;  %565 = vmatpush.bf16.msrb.mxu1 %v556_v5 }
 0x227   : > { %v572_v15 = vpop.permute.xlu0 %571 }
 0x29d   : > { %v430_v58 = vpop.f32.mrf.mxu1 }
 0x29e   : > { %v434_v59 = vsel %vm994_vm9, %v430_v58, -1e+09 }
 0x29f   : > { %v435_v60 = vsel %vm414_vm5, %v434_v59, -inf }
 0x2a0   : > { %436 = vmax.xlane.f32.xlu1 %v435_v60 }
 0x2a5   : > { %v432_v61 = vpop.f32.mrf.mxu1 }
 0x313   : > { %v437_v62 = vpop.xlane.xlu1 %436 }
 0x314   : > { %v438_v63 = vsub.f32 %v434_v59, %v437_v62 }
 0x316   : > { %v439_v0 = vmul.f32 1.442695, %v438_v63  ;;  %v532_v63 = vld [vmem:[%s1072_s6 + $0x4] sm:$0xf] }
 0x318   : > { %861 = vpow2.f32 %v439_v0  ;;  %v537_v0 = vsel %vm452_vm10, %v532_v63, 0 }
 0x319   : > { %546 = vmatpush.bf16.msrb.mxu0 %v537_v0 }
 0x31e   : > { %v862_v2 = vpop.eup %861 }
 0x31f   : > { %v441_v3 = vsel %vm414_vm5, %v862_v2, 0.0 }
 0x320   : > { %442 = vadd.xlane.f32.xlu2 %v441_v3  ;;  %v629_v3 = vld [vmem:[%s1072_s6 + $0x8] sm:$0xf] }
 0x321   : > { %v634_v4 = vsel %vm452_vm10, %v629_v3, 0 }
 0x322   : > { %643 = vmatpush.bf16.msra.mxu0 %v634_v4 }
 0x338   : > { %447 = vrot.lane.b32.xlu2 %v981_v38, %s891_s9  ;;  %s314_s9 = scalar_lea.vmem %s1074_s8, %s805_s29 }
 0x340   : > { %474 = vrot.lane.b32.xlu2 %v473_v43, %s892_s10 }
 0x348   : > { %652 = vrot.lane.b32.xlu2 %v981_v38, %s893_s11 }
 0x350   : > { %650 = vrot.lane.b32.xlu2 %v473_v43, %s894_s12 }
 0x393   : > { %v443_v6 = vpop.xlane.xlu2 %442 }
 0x394   : > { %863 = vrcp.f32 %v443_v6 }
 0x39a   : > { %v864_v7 = vpop.eup %863 }
 0x39b   : > { %v448_v8 = vpop.permute.xlu2 %447  ;;  %v445_v9 = vmul.f32 %v864_v7, %v862_v2 }
 0x39c   : > { %v454_v10 = vsel %vm452_vm10, %v448_v8, 0  ;;  %v708_v8 = vld [vmem:[%s1072_s6 + $0xc] sm:$0xf] }
 0x39d   : > { %463 = vmatpush.bf16.msra.mxu2 %v454_v10  ;;  %v446_v11 = vpack.c.bf16 %v445_v9, %v445_v9  ;;  %v713_v9 = vsel %vm452_vm10, %v708_v8, 0 }
 0x3a0   : > { %817 = vmatmul.msk.bf16.vlgmr.msra.gmra.mxu2 %vm414_vm5, %v446_v11 }
 0x3a3   : > { %v475_v12 = vpop.permute.xlu2 %474 }
 0x3a4   : > { %818 = vmatmul.msk.bf16.vlgmr.msra.gmra.mxu3 %vm414_vm5, %v475_v12 }
 0x3ab   : > { %v653_v13 = vpop.permute.xlu2 %652 }
 0x3ac   : > { %v658_v14 = vsel %vm414_vm5, %v653_v13, 0 }
 0x3ad   : > { %667 = vmatpush.bf16.xpose.msra.mxu1 %v658_v14 }
 0x3b3   : > { %v651_v23 = vpop.permute.xlu2 %650 }
 0x3b4   : > { %822 = vmatmul.msk.bf16.vlgmr.msrb.gmra.mxu3 %vm414_vm5, %v572_v15 }
 0x423   : > { %v465_v16 = vpop.f32.mrf.mxu2 }
 0x424   : > { %v469_v17 = vpack.c.bf16 %v465_v16, %v465_v16 }
 0x426   : > { %821 = vmatmul.msk.bf16.vlgmr.msrb.gmra.mxu1 %vm414_vm5, %v469_v17 }
 0x427   : > { %v493_v18 = vpop.f32.mrf.mxu3 }
 0x428   : > { %v497_v19 = vsel %vm994_vm9, %v493_v18, -1e+09 }
 0x429   : > { %v498_v20 = vsel %vm414_vm5, %v497_v19, -inf }
 0x42a   : > { %499 = vmax.xlane.f32.xlu1 %v498_v20 }
 0x42b   : > { %v467_v21 = vpop.f32.mrf.mxu2 }
 0x42f   : > { %v495_v22 = vpop.f32.mrf.mxu3 }
 0x436   : > { %825 = vmatmul.msk.bf16.vlgmr.msra.gmra.mxu1 %vm414_vm5, %v651_v23 }
 0x437   : > { %v590_v24 = vpop.f32.mrf.mxu3 }
 0x438   : > { %v594_v25 = vsel %vm994_vm9, %v590_v24, -1e+09 }
 0x439   : > { %v595_v26 = vsel %vm414_vm5, %v594_v25, -inf }
 0x43a   : > { %596 = vmax.xlane.f32.xlu2 %v595_v26 }
 0x43f   : > { %v592_v27 = vpop.f32.mrf.mxu3 }
 0x440   : > { %v856_v27 = vld [vmem:[%s1073_s7] ss:$0 sm:$0xff] }
 0x452   : > { %686 = vrot.lane.b32.xlu2 %v981_v38, %s895_s15 }
 0x49d   : > { %v500_v28 = vpop.xlane.xlu1 %499 }
 0x49e   : > { %v501_v29 = vsub.f32 %v497_v19, %v500_v28 }
 0x4a0   : > { %v502_v30 = vmul.f32 1.442695, %v501_v29 }
 0x4a2   : > { %865 = vpow2.f32 %v502_v30 }
 0x4a3   : > { %v1022_v31 = vpop.f32.mrf.mxu1 }
 0x4a8   : > { %v866_v32 = vpop.eup %865 }
 0x4a9   : > { %v504_v33 = vsel %vm414_vm5, %v866_v32, 0.0 }
 0x4aa   : > { %505 = vadd.xlane.f32.xlu1 %v504_v33 }
 0x4ab   : > { %v569_v34 = vpop.f32.mrf.mxu1 }
 0x4ad   : > { %v597_v35 = vpop.xlane.xlu2 %596 }
 0x4ae   : > { %v598_v36 = vsub.f32 %v594_v25, %v597_v35 }
 0x4b0   : > { %v599_v37 = vmul.f32 1.442695, %v598_v36 }
 0x4b2   : > { %867 = vpow2.f32 %v599_v37 }
 0x4b3   : > { %v669_v39 = vpop.f32.mrf.mxu1 }
 0x4b4   : > { %v673_v40 = vsel %vm994_vm9, %v669_v39, -1e+09 }
 0x4b5   : > { %v687_v41 = vpop.permute.xlu2 %686  ;;  %v674_v42 = vsel %vm414_vm5, %v673_v40, -inf }
 0x4b6   : > { %v692_v43 = vsel %vm452_vm10, %v687_v41, 0  ;;  %675 = vmax.xlane.f32.xlu0 %v674_v42 }
 0x4b7   : > { %701 = vmatpush.bf16.msra.mxu3 %v692_v43 }
 0x4b8   : > { %v868_v44 = vpop.eup %867 }
 0x4b9   : > { %v601_v46 = vsel %vm414_vm5, %v868_v44, 0.0 }
 0x4bb   : > { %v671_v45 = vpop.f32.mrf.mxu1 }
 0x4be   : > { %602 = vadd.xlane.f32.xlu0 %v601_v46 }
 0x4c3   : > { %510 = vrot.lane.b32.xlu1 %v981_v38, %s896_s16 }
 0x4d2   : > { %607 = vrot.lane.b32.xlu0 %v981_v38, %s897_s17 }
 0x51d   : > { %v506_v47 = vpop.xlane.xlu1 %505 }
 0x51e   : > { %869 = vrcp.f32 %v506_v47 }
 0x524   : > { %v870_v51 = vpop.eup %869 }
 0x525   : > { %v508_v53 = vmul.f32 %v870_v51, %v866_v32 }
 0x527   : > { %v509_v58 = vpack.c.bf16 %v508_v53, %v508_v53 }
 0x529   : > { %v676_v48 = vpop.xlane.xlu0 %675 }
 0x52a   : > { %v677_v49 = vsub.f32 %v673_v40, %v676_v48 }
 0x52c   : > { %v678_v50 = vmul.f32 1.442695, %v677_v49 }
 0x52e   : > { %871 = vpow2.f32 %v678_v50 }
 0x531   : > { %v603_v57 = vpop.xlane.xlu0 %602 }
 0x532   : > { %873 = vrcp.f32 %v603_v57 }
 0x534   : > { %v872_v52 = vpop.eup %871 }
 0x535   : > { %v511_v54 = vpop.permute.xlu1 %510  ;;  %v680_v55 = vsel %vm414_vm5, %v872_v52, 0.0 }
 0x536   : > { %681 = vadd.xlane.f32.xlu1 %v680_v55  ;;  %v516_v56 = vsel %vm452_vm10, %v511_v54, 0 }
 0x537   : > { %525 = vmatpush.bf16.msrb.mxu2 %v516_v56 }
 0x538   : > { %v874_v38 = vpop.eup %873 }
 0x539   : > { %v605_v59 = vmul.f32 %v874_v38, %v868_v44 }
 0x53a   : > { %819 = vmatmul.msk.bf16.vlgmr.msrb.gmra.mxu2 %vm414_vm5, %v509_v58 }
 0x53b   : > { %v606_v62 = vpack.c.bf16 %v605_v59, %v605_v59 }
 0x544   : > { %v608_v60 = vpop.permute.xlu0 %607 }
 0x545   : > { %v613_v61 = vsel %vm452_vm10, %v608_v60, 0 }
 0x546   : > { %622 = vmatpush.bf16.msra.mxu2 %v613_v61 }
 0x54a   : > { %823 = vmatmul.msk.bf16.vlgmr.msra.gmra.mxu2 %vm414_vm5, %v606_v62 }
 0x54b   : > { %722 = vmatpush.bf16.msrb.mxu2 %v713_v9 }
 0x5a9   : > { %v682_v2 = vpop.xlane.xlu1 %681 }
 0x5aa   : > { %875 = vrcp.f32 %v682_v2 }
 0x5b0   : > { %v876_v5 = vpop.eup %875 }
 0x5b1   : > { %v684_v6 = vmul.f32 %v876_v5, %v872_v52 }
 0x5b3   : > { %v685_v7 = vpack.c.bf16 %v684_v6, %v684_v6 }
 0x5b5   : > { %826 = vmatmul.msk.bf16.vlgmr.msra.gmra.mxu3 %vm414_vm5, %v685_v7 }
 0x5bd   : > { %v527_v10 = vpop.f32.mrf.mxu2 }
 0x5be   : > { %v531_v11 = vpack.c.bf16 %v527_v10, %v527_v10 }
 0x5c0   : > { %820 = vmatmul.msk.bf16.vlgmr.msrb.gmra.mxu0 %vm414_vm5, %v531_v11 }
 0x5c5   : > { %v529_v12 = vpop.f32.mrf.mxu2 }
 0x5cd   : > { %v624_v13 = vpop.f32.mrf.mxu2 }
 0x5ce   : > { %v628_v14 = vpack.c.bf16 %v624_v13, %v624_v13 }
 0x5d0   : > { %824 = vmatmul.msk.bf16.vlgmr.msra.gmra.mxu0 %vm414_vm5, %v628_v14 }
 0x5d5   : > { %v626_v15 = vpop.f32.mrf.mxu2 }
 0x638   : > { %v703_v16 = vpop.f32.mrf.mxu3 }
 0x639   : > { %v707_v17 = vpack.c.bf16 %v703_v16, %v703_v16 }
 0x63b   : > { %827 = vmatmul.msk.bf16.vlgmr.msrb.gmra.mxu2 %vm414_vm5, %v707_v17 }
 0x63d   : > { %v548_v18 = vpop.f32.mrf.mxu0 }
 0x63e   : > { %v568_v21 = vadd.f32 %v1022_v31, %v548_v18 }
 0x640   : > { %v705_v19 = vpop.f32.mrf.mxu3 }
 0x645   : > { %v550_v20 = vpop.f32.mrf.mxu0 }
 0x64d   : > { %v645_v22 = vpop.f32.mrf.mxu0 }
 0x64e   : > { %v649_v23 = vadd.f32 %v645_v22, %v568_v21 }
 0x655   : > { %v647_v24 = vpop.f32.mrf.mxu0 }
 0x6be   : > { %v724_v25 = vpop.f32.mrf.mxu2 }
 0x6bf   : > { %v728_v26 = vadd.f32 %v724_v25, %v649_v23 }
 0x6c1   : > { %v729_v28 = vadd.f32 %v728_v26, %v959_v1 }
 0x6c3   : > { %v734_v29 = vadd.f32 %v856_v27, %v729_v28 }
 0x6c5   : > { %v735_v30 = vpack.c.bf16 %v734_v29, %v734_v29 }
 0x6c6   : > { %v726_v31 = vpop.f32.mrf.mxu2 }
 0x6c7   : > { %737 = vst.msk [vmem:[%s314_s9] sm:$0xf] %vm736_vm11, %v735_v30 }
 0x6c8 PF: > { %s18_s27 = sadd.s32 1, %s883_s27  }
 0x6c9   : > { %p15_p4 = scmp.ge.s32.totalorder %s18_s27, 10  }
 0x6cb   :  { %17 = sbr.rel (!%p15_p4) target bundleno = 1 (0x1), region = 85 }

// kernel: model_forward.15
= control target key start
LH: loop header
LB: loop body
LE: loop exit
PB: predicated region body
PF: predicated region fallthrough
CT: control target
= control target key end

     0   :  { %vm26_vm0 = vcmask 123904   ;;  %s205_s0 = inlined_call_operand.vmem [shape: bf16[2,16], index: 0, kind: input, shape index: {}]   ;;  %s206_s1 = inlined_call_operand.vmem [shape: f32[1,16], index: 1, kind: input, shape index: {}]   ;;  %s207_s2 = inlined_call_operand.vmem [shape: f32[1,16], index: 2, kind: input, shape index: {}]   ;;  %s208_s3 = inlined_call_operand.vmem [shape: bf16[16,5], index: 3, kind: input, shape index: {}]   ;;  %s209_s4 = inlined_call_operand.vmem [shape: f32[1,5], index: 4, kind: input, shape index: {}]   ;;  %s210_s5 = inlined_call_operand.hbm [shape: f32[2,5], index: 5, kind: output, shape index: {}]  }
   0x1   :  { %v22_v0 = vld [vmem:[%s205_s0] sm:$0x1] }
   0x2   :  { %v23_v1 = vunpack.c.l.bf16 %v22_v0 }
   0x3   :  { %10 = vsyncpa [#allocation3], 0  ;;  %v153_v3 = vmov 16.0   ;;  %v117_v15 = vld [vmem:[%s208_s3] sm:$0xff]  ;;  %vm77_vm5 = vcmask 130048   ;;  %s154_s26 = smov [#allocation2]  }
   0x4   :  { %v27_v2 = vsel %vm26_vm0, %v23_v1, 0.0  ;;  %123 = vrcp.f32 %v153_v3  ;;  %88 = vmatpush.bf16.msra.mxu0 %v117_v15  ;;  %v120_v25 = vld [vmem:[%s206_s1] ss:$0 sm:$0xff]  ;;  %s101_s27 = sshll.u32 %s154_s26, 4  ;;  %s103_s1 = sshll.u32 %s210_s5, 4  ;;  %vm94_vm6 = vcmask 33792   ;;  %s102_s27 = int_to_ptr.vmem [resolvable:$true] %s101_s27  ;;  %s104_s1 = int_to_ptr.hbm [resolvable:$true] %s103_s1 }
   0x5   :  { %28 = vadd.xlane.f32.xlu0 %v27_v2  ;;  %v121_v28 = vld [vmem:[%s207_s2] ss:$0 sm:$0xff] }
   0x6   :  { %v122_v32 = vld [vmem:[%s209_s4] ss:$0 sm:$0xff] }
   0xa   :  { %v124_v4 = vpop.eup %123 }
   0xb   :  { %v31_v5 = vmul.f32 16.0, %v124_v4  ;;  %vm35_vm1 = vweird.f32 %v124_v4 }
   0xd   :  { %v32_v6 = vsub.f32 1.0, %v31_v5 }
   0xf   :  { %v33_v7 = vmul.f32 %v124_v4, %v32_v6 }
  0x11   :  { %v34_v8 = vadd.f32 %v124_v4, %v33_v7 }
  0x13   :  { %v36_v9 = vsel %vm35_vm1, %v124_v4, %v34_v8 }
  0x78   :  { %v29_v10 = vpop.xlane.xlu0 %28 }
  0x79   :  { %v37_v11 = vmul.f32 %v36_v9, %v29_v10 }
  0x7b   :  { %v38_v12 = vsub.f32 %v23_v1, %v37_v11 }
  0x7d   :  { %v39_v13 = vmul.f32 %v38_v12, %v38_v12 }
  0x7f   :  { %v40_v14 = vsel %vm26_vm0, %v39_v13, 0.0 }
  0x80   :  { %41 = vadd.xlane.f32.xlu0 %v40_v14 }
  0xf3   :  { %v42_v16 = vpop.xlane.xlu0 %41 }
  0xf4   :  { %v43_v17 = vmul.f32 %v42_v16, %v36_v9 }
  0xf6   :  { %v44_v18 = vadd.f32 1e-05, %v43_v17 }
  0xf8   :  { %125 = vrsqrt.f32 %v44_v18  ;;  %vm51_vm3 = vweird.f32 %v44_v18 }
  0xfe   :  { %v126_v19 = vpop.eup %125 }
  0xff   :  { %v46_v20 = vmul.f32 %v126_v19, %v44_v18  ;;  %vm52_vm2 = vweird.f32 %v126_v19 }
 0x100   :  { %vm53_vm4 = vmor %vm51_vm3, %vm52_vm2 }
 0x101   :  { %v47_v21 = vmul.f32 %v126_v19, %v46_v20 }
 0x103   :  { %v48_v22 = vmul.f32 0.5, %v47_v21 }
 0x105   :  { %v49_v23 = vsub.f32 1.5, %v48_v22 }
 0x107   :  { %v50_v24 = vmul.f32 %v126_v19, %v49_v23 }
 0x109   :  { %v54_v26 = vsel %vm53_vm4, %v126_v19, %v50_v24 }
 0x10a   :  { %v55_v27 = vmul.f32 %v54_v26, %v38_v12 }
 0x10c   :  { %v59_v29 = vmul.f32 %v120_v25, %v55_v27 }
 0x10e   :  { %v63_v30 = vadd.f32 %v121_v28, %v59_v29 }
 0x110   :  { %v66_v31 = vpack.c.bf16 %v63_v30, %v63_v30 }
 0x112   :  { %116 = vmatmul.msk.bf16.vlgmr.msra.gmra.mxu0 %vm77_vm5, %v66_v31 }
 0x18f   :  { %v90_v33 = vpop.f32.mrf.mxu0 }
 0x190   :  { %v91_v34 = vadd.f32 %v122_v32, %v90_v33 }
 0x192   :  { %95 = vst.msk [vmem:[#allocation2] sm:$0x3] %vm94_vm6, %v91_v34 }
 0x193   :  { %106 = dma.vmem_to_hbm [thread:$0]  %s102_s27, 32, %s104_s1, [#allocation3]  }
 0x197   :  { %v92_v35 = vpop.f32.mrf.mxu0 }
 0x198   :  { %151 = dma.done.wait [#allocation3], 32  }
 0x199   :  { %152 = vsyncadd [#allocation3], 4294967264 }
 0x19a   :  { %111 = vsyncpa [#allocation3], 1 }

// kernel: model_forward.13
= control target key start
LH: loop header
LB: loop body
LE: loop exit
PB: predicated region body
PF: predicated region fallthrough
CT: control target
= control target key end

     0   :  { %s863_s30 = smov 0   ;;  %s934_s0 = inlined_call_operand.vmem [shape: bf16[2,5,16], index: 0, kind: input, shape index: {}]   ;;  %s935_s1 = inlined_call_operand.vmem [shape: s32[2,1,5], index: 1, kind: input, shape index: {}]   ;;  %s936_s2 = inlined_call_operand.vmem [shape: bf16[16,48], index: 2, kind: input, shape index: {}]   ;;  %s937_s3 = inlined_call_operand.vmem [shape: f32[1,48], index: 3, kind: input, shape index: {}]   ;;  %s938_s4 = inlined_call_operand.vmem [shape: bf16[16,16], index: 4, kind: input, shape index: {}]   ;;  %s939_s5 = inlined_call_operand.vmem [shape: f32[1,16], index: 5, kind: input, shape index: {}]   ;;  %s940_s6 = inlined_call_operand.vmem [shape: f32[1,16], index: 6, kind: input, shape index: {}]   ;;  %s941_s7 = inlined_call_operand.vmem [shape: f32[1,16], index: 7, kind: input, shape index: {}]   ;;  %s942_s8 = inlined_call_operand.vmem [shape: bf16[2,5,16], index: 8, kind: output, shape index: {0}]   ;;  %s943_s9 = inlined_call_operand.vmem [shape: f32[2,2,5,5], index: 9, kind: output, shape index: {1}]  }
   0x1 LB: > { %s740_s10 = sadd.s32 4294967295, %s803_s30   ;;  %p744_p0 = scmp.ge.s32.totalorder %s803_s30, 1  ;;  %s803_s30 = sphi %s863_s30, %s20_s30  }
   0x2   : > { %p297_p1 = scmp.lt.s32.totalorder %s803_s30, 3 }
   0x4   : > { %p298_p2 = pnand %p744_p0, %p297_p1 }
   0x5   : > { %p339_p3 = scmp.lt.s32.totalorder (!%p298_p2), %s740_s10, 1  ;;  %s805_s19 = smov (!%p298_p2), 104  }
   0x6   : > { %301 = sbr.rel (%p298_p2) target bundleno = 1211 (0x4bb), region = 52  ;;  %s806_s20 = smov (!%p298_p2), 120  }
   0x7   : > { %s807_s21 = smov (!%p298_p2), 112   ;;  %s809_s25 = smov (!%p298_p2), 96  }
   0x8   : > { %s810_s26 = smov (!%p298_p2), 88  }
   0xb   : > { %v764_v0 = vld [vmem:[%s936_s2] sm:$0xff]  ;;  %s945_s10 = smov (!%p339_p3, %s740_s10), 1  ;;  %vm370_vm0 = vcmask 130048   ;;  %vm397_vm1 = vcmask 64512   ;;  %v808_v19 = vmov 0   ;;  %vm421_vm4 = vcmask 36864  }
   0xc   : > { %381 = vmatpush.bf16.msra.mxu0 %v764_v0  ;;  %s745_s13 = sshll.u32 %s945_s10, 2  ;;  %v781_v2 = vld [vmem:[%s937_s3] ss:$0 sm:$0xff]  ;;  %s345_s24 = scalar_lea.vmem %s935_s1, %s945_s10  ;;  %vm454_vm5 = vcmask 1041408   ;;  %vm455_vm6 = vcmask 1042432   ;;  %v811_v42 = vmov 65535  }
   0xd   : > { %s342_s16 = scalar_lea.vmem %s934_s0, %s745_s13  ;;  %v387_v18 = vld [vmem:[%s345_s24] sm:$0x1]  ;;  %v456_v43 = vsel %vm454_vm5, 4294967295, %v811_v42  ;;  %s763_s27 = sshll.u32 %s945_s10, 4  ;;  %vm450_vm15 = vcmask 39936  }
   0xe   : > { %v882_v1 = vld [vmem:[%s342_s16] sm:$0x7]  ;;  %vm388_vm2 = vcmp.ne.s32.totalorder %v387_v18, 0  ;;  %v457_v46 = vsel %vm455_vm6, %v456_v43, 0  ;;  %s354_s11 = scalar_lea.vmem %s943_s9, %s763_s27  ;;  %vm639_vm6 = vcmask 124928  }
   0xf   : > { %753 = vmatmul.msk.bf16.vlgmr.msra.gmra.mxu0 %vm370_vm0, %v882_v1  ;;  %v417_v20 = vsel %vm388_vm2, 1, %v808_v19  ;;  %vm556_vm0 = vcmask 1043456   ;;  %vm600_vm2 = vcmask 126976  }
  0x10   : > { %v418_v21 = vperm.slane %v417_v20, 0  ;;  %v357_v20 = vunpack.c.l.bf16 %v882_v1 }
  0x12   : > { %vm419_vm3 = vcmp.eq.s32.totalorder %v418_v21, 1 }
  0x8c   : > { %v383_v3 = vpop.f32.mrf.mxu0 }
  0x8d   : > { %v384_v4 = vadd.f32 %v781_v2, %v383_v3 }
  0x8f   : > { %v389_v5 = vmul.f32 0.35355338, %v384_v4  ;;  %v391_v6 = vpack.c.bf16 %v384_v4, %v384_v4 }
  0x91   : > { %v390_v7 = vpack.c.bf16 %v389_v5, %v389_v5  ;;  %v393_v8 = vunpack.c.l.b16 %v391_v6 }
  0x93   : > { %v394_v9 = vpack.c.b16 %v393_v8, %v393_v8  ;;  %v477_v10 = vunpack.c.l.b16 %v390_v7 }
  0x94   : > { %v385_v11 = vpop.f32.mrf.mxu0 }
  0x95   : > { %481 = vrot.lane.b32.xlu0 %v394_v9, %s805_s19  ;;  %v478_v12 = vpack.c.b16 %v477_v10, %v477_v10  ;;  %v552_v10 = vld [vmem:[%s938_s4 + $0x4] sm:$0xf] }
  0x96   : > { %v558_v11 = vsel %vm556_vm0, %v552_v10, 0 }
  0x97   : > { %479 = vrot.lane.b32.xlu1 %v478_v12, %s806_s20  ;;  %v475_v12 = vld [vmem:[%s938_s4] sm:$0xf] }
  0x9d   : > { %395 = vrot.lane.b32.xlu0 %v394_v9, %s807_s21 }
 0x107   : > { %v482_v13 = vpop.permute.xlu0 %481 }
 0x108   : > { %v487_v14 = vsel %vm397_vm1, %v482_v13, 0  ;;  %v577_v13 = vsel %vm556_vm0, %v475_v12, 0 }
 0x109   : > { %496 = vmatpush.bf16.xpose.msra.mxu3 %v487_v14  ;;  %v480_v15 = vpop.permute.xlu1 %479 }
 0x10f   : > { %v396_v16 = vpop.permute.xlu0 %395 }
 0x110   : > { %756 = vmatmul.msk.bf16.vlgmr.msra.gmra.mxu3 %vm397_vm1, %v480_v15  ;;  %v402_v17 = vsel %vm397_vm1, %v396_v16, 0 }
 0x111   : > { %411 = vmatpush.bf16.xpose.msra.mxu1 %v402_v17 }
 0x118   : > { %754 = vmatmul.msk.bf16.vlgmr.msra.gmra.mxu1 %vm397_vm1, %v390_v7 }
 0x119   : > { %586 = vmatpush.bf16.msrb.mxu1 %v577_v13 }
 0x193   : > { %v498_v22 = vpop.f32.mrf.mxu3 }
 0x194   : > { %v502_v23 = vsel %vm419_vm3, %v498_v22, -1e+09 }
 0x195   : > { %v413_v24 = vpop.f32.mrf.mxu1  ;;  %v503_v25 = vsel %vm421_vm4, %v502_v23, -inf }
 0x196   : > { %v420_v26 = vsel %vm419_vm3, %v413_v24, -1e+09  ;;  %504 = vmax.xlane.f32.xlu2 %v503_v25  ;;  %v782_v24 = vld [vmem:[%s939_s5] ss:$0 sm:$0xff] }
 0x197   : > { %v422_v27 = vsel %vm421_vm4, %v420_v26, -inf }
 0x198   : > { %423 = vmax.xlane.f32.xlu1 %v422_v27 }
 0x19b   : > { %v500_v28 = vpop.f32.mrf.mxu3 }
 0x19d   : > { %v415_v29 = vpop.f32.mrf.mxu1 }
 0x209   : > { %v505_v30 = vpop.xlane.xlu2 %504 }
 0x20a   : > { %v506_v31 = vsub.f32 %v502_v23, %v505_v30  ;;  %v812_v30 = vmov 16.0  }
 0x20b   : > { %v424_v32 = vpop.xlane.xlu1 %423 }
 0x20c   : > { %v507_v33 = vmul.f32 1.442695, %v506_v31  ;;  %v425_v34 = vsub.f32 %v420_v26, %v424_v32 }
 0x20e   : > { %785 = vpow2.f32 %v507_v33  ;;  %v426_v35 = vmul.f32 1.442695, %v425_v34 }
 0x210   : > { %787 = vpow2.f32 %v426_v35 }
 0x214   : > { %v786_v36 = vpop.eup %785 }
 0x215   : > { %v509_v37 = vsel %vm421_vm4, %v786_v36, 0.0 }
 0x216   : > { %v788_v38 = vpop.eup %787  ;;  %510 = vadd.xlane.f32.xlu0 %v509_v37 }
 0x217   : > { %v428_v39 = vsel %vm421_vm4, %v788_v38, 0.0 }
 0x218   : > { %429 = vadd.xlane.f32.xlu2 %v428_v39 }
 0x230   : > { %448 = vrot.lane.b32.xlu2 %v394_v9, %s809_s25  ;;  %s349_s25 = scalar_lea.vmem %s942_s8, %s745_s13 }
 0x238   : > { %530 = vrot.lane.b32.xlu2 %v394_v9, %s810_s26 }
 0x289   : > { %v511_v40 = vpop.xlane.xlu0 %510 }
 0x28a   : > { %789 = vrcp.f32 %v511_v40  ;;  %v523_v51 = vand.u32 2147483648, %v511_v40  ;;  %v521_v54 = vand.u32 2147483647, %v511_v40  ;;  %vm517_vm8 = vweird.f32 %v511_v40 }
 0x28b   : > { %v430_v41 = vpop.xlane.xlu2 %429 }
 0x28c   : > { %791 = vrcp.f32 %v430_v41  ;;  %v442_v56 = vand.u32 2147483648, %v430_v41  ;;  %v440_v59 = vand.u32 2147483647, %v430_v41  ;;  %v524_v60 = vor.u32 1.1754944e-38, %v523_v51 }
 0x28d   : > { %vm522_vm11 = vcmp.eq.f32.partialorder %v521_v54, 8.507059e+37  ;;  %vm436_vm12 = vweird.f32 %v430_v41  ;;  %793 = vrcp.f32 %v812_v30 }
 0x28e   : > { %v443_v0 = vor.u32 1.1754944e-38, %v442_v56  ;;  %vm441_vm14 = vcmp.eq.f32.partialorder %v440_v59, 8.507059e+37  ;;  %v642_v56 = vld [vmem:[%s349_s25] sm:$0x7] }
 0x290   : > { %v790_v44 = vpop.eup %789 }
 0x291   : > { %v513_v45 = vmul.f32 %v790_v44, %v511_v40  ;;  %vm518_vm7 = vweird.f32 %v790_v44 }
 0x292   : > { %v792_v47 = vpop.eup %791  ;;  %vm519_vm10 = vmor %vm517_vm8, %vm518_vm7  ;;  %vm640_vm7 = vsmask.f32 2304 }
 0x293   : > { %v514_v48 = vsub.f32 1.0, %v513_v45  ;;  %v432_v49 = vmul.f32 %v792_v47, %v430_v41  ;;  %v449_v50 = vpop.permute.xlu2 %448  ;;  %vm437_vm9 = vweird.f32 %v792_v47  ;;  %v794_v31 = vpop.eup %793  ;;  %vm641_vm8 = vmand %vm639_vm6, %vm640_vm7 }
 0x294   : > { %v459_v52 = vand.u32 %v457_v46, %v449_v50  ;;  %vm438_vm13 = vmor %vm436_vm12, %vm437_vm9  ;;  %v605_v32 = vmul.f32 16.0, %v794_v31  ;;  %v783_v50 = vld [vmem:[%s940_s6] ss:$0 sm:$0xff] }
 0x295   : > { %v515_v53 = vmul.f32 %v790_v44, %v514_v48  ;;  %v433_v55 = vsub.f32 1.0, %v432_v49 }
 0x296   : > { %468 = vmatpush.bf16.msra.mxu2 %v459_v52  ;;  %v606_v1 = vsub.f32 1.0, %v605_v32  ;;  %v784_v52 = vld [vmem:[%s941_s7] ss:$0 sm:$0xff] }
 0x297   : > { %v516_v57 = vadd.f32 %v790_v44, %v515_v53  ;;  %v434_v58 = vmul.f32 %v792_v47, %v433_v55 }
 0x298   : > { %v607_v33 = vmul.f32 %v794_v31, %v606_v1 }
 0x299   : > { %v520_v61 = vsel %vm519_vm10, %v790_v44, %v516_v57  ;;  %v435_v62 = vadd.f32 %v792_v47, %v434_v58 }
 0x29a   : > { %v525_v63 = vsel %vm522_vm11, %v524_v60, %v520_v61  ;;  %567 = vmatpush.bf16.msrb.mxu2 %v558_v11  ;;  %v608_v34 = vadd.f32 %v794_v31, %v607_v33 }
 0x29b   : > { %v531_v2 = vpop.permute.xlu2 %530  ;;  %v439_v3 = vsel %vm438_vm13, %v792_v47, %v435_v62  ;;  %v526_v4 = vmul.f32 %v786_v36, %v525_v63 }
 0x29c   : > { %v536_v5 = vand.u32 %v531_v2, %v457_v46  ;;  %v444_v6 = vsel %vm441_vm14, %v443_v0, %v439_v3 }
 0x29d   : > { %v445_v7 = vmul.f32 %v788_v38, %v444_v6  ;;  %757 = vst.msk [vmem:[%s354_s11 + $0x8] sm:$0x1f] %vm421_vm4, %v526_v4  ;;  %v529_v9 = vpack.c.bf16 %v526_v4, %v526_v4 }
 0x29e   : > { %545 = vmatpush.bf16.msrb.mxu0 %v536_v5 }
 0x29f   : > { %446 = vst.msk [vmem:[%s354_s11] sm:$0x1f] %vm421_vm4, %v445_v7  ;;  %v447_v8 = vpack.c.bf16 %v445_v7, %v445_v7 }
 0x2a1   : > { %755 = vmatmul.msk.bf16.vlgmr.msra.gmra.mxu2 %vm450_vm15, %v447_v8  ;;  %758 = vmatmul.msk.bf16.vlgmr.msrb.gmra.mxu0 %vm450_vm15, %v529_v9 }
 0x31e   : > { %v547_v14 = vpop.f32.mrf.mxu0 }
 0x31f   : > { %v551_v15 = vpack.c.bf16 %v547_v14, %v547_v14 }
 0x321   : > { %759 = vmatmul.msk.bf16.vlgmr.msrb.gmra.mxu2 %vm397_vm1, %v551_v15 }
 0x324   : > { %v470_v16 = vpop.f32.mrf.mxu2 }
 0x325   : > { %v474_v17 = vpack.c.bf16 %v470_v16, %v470_v16 }
 0x326   : > { %v549_v18 = vpop.f32.mrf.mxu0 }
 0x327   : > { %760 = vmatmul.msk.bf16.vlgmr.msrb.gmra.mxu1 %vm397_vm1, %v474_v17  ;;  %vm609_vm1 = vweird.f32 %v794_v31 }
 0x328   : > { %v610_v35 = vsel %vm609_vm1, %v794_v31, %v608_v34 }
 0x32c   : > { %v472_v19 = vpop.f32.mrf.mxu2 }
 0x3a4   : > { %v569_v21 = vpop.f32.mrf.mxu2  ;;  %v588_v22 = vpop.f32.mrf.mxu1 }
 0x3a5   : > { %v589_v23 = vadd.f32 %v588_v22, %v569_v21 }
 0x3a7   : > { %v592_v25 = vadd.f32 %v589_v23, %v357_v20 }
 0x3a9   : > { %v597_v26 = vadd.f32 %v782_v24, %v592_v25 }
 0x3ab   : > { %v601_v27 = vsel %vm600_vm2, %v597_v26, 0.0 }
 0x3ac   : > { %v571_v28 = vpop.f32.mrf.mxu2  ;;  %v590_v29 = vpop.f32.mrf.mxu1  ;;  %602 = vadd.xlane.f32.xlu2 %v601_v27 }
 0x41f   : > { %v603_v36 = vpop.xlane.xlu2 %602 }
 0x420   : > { %v611_v37 = vmul.f32 %v610_v35, %v603_v36 }
 0x422   : > { %v612_v38 = vsub.f32 %v597_v26, %v611_v37 }
 0x424   : > { %v613_v39 = vmul.f32 %v612_v38, %v612_v38 }
 0x426   : > { %v614_v40 = vsel %vm600_vm2, %v613_v39, 0.0 }
 0x427   : > { %615 = vadd.xlane.f32.xlu1 %v614_v40 }
 0x49a   : > { %v616_v41 = vpop.xlane.xlu1 %615 }
 0x49b   : > { %v617_v42 = vmul.f32 %v616_v41, %v610_v35 }
 0x49d   : > { %v618_v43 = vadd.f32 1e-05, %v617_v42 }
 0x49f   : > { %795 = vrsqrt.f32 %v618_v43  ;;  %vm625_vm4 = vweird.f32 %v618_v43 }
 0x4a5   : > { %v796_v44 = vpop.eup %795 }
 0x4a6   : > { %v620_v45 = vmul.f32 %v796_v44, %v618_v43  ;;  %vm626_vm3 = vweird.f32 %v796_v44 }
 0x4a7   : > { %vm627_vm5 = vmor %vm625_vm4, %vm626_vm3 }
 0x4a8   : > { %v621_v46 = vmul.f32 %v796_v44, %v620_v45 }
 0x4aa   : > { %v622_v47 = vmul.f32 0.5, %v621_v46 }
 0x4ac   : > { %v623_v48 = vsub.f32 1.5, %v622_v47 }
 0x4ae   : > { %v624_v49 = vmul.f32 %v796_v44, %v623_v48 }
 0x4b0   : > { %v628_v51 = vsel %vm627_vm5, %v796_v44, %v624_v49 }
 0x4b1   : > { %v629_v53 = vmul.f32 %v628_v51, %v612_v38 }
 0x4b3   : > { %v633_v54 = vmul.f32 %v783_v50, %v629_v53 }
 0x4b5   : > { %v637_v55 = vadd.f32 %v784_v52, %v633_v54 }
 0x4b7   : > { %v638_v57 = vpack.c.bf16 %v637_v55, %v637_v55 }
 0x4b9   : > { %v643_v58 = vsel %vm641_vm8, %v638_v57, %v642_v56 }
 0x4ba   : > { %644 = vst [vmem:[%s349_s25] sm:$0x7] %v643_v58 }
 0x4bb PF: > { %s20_s30 = sadd.s32 1, %s803_s30  }
 0x4bc   : > { %p17_p4 = scmp.ge.s32.totalorder %s20_s30, 4  }
 0x4be   :  { %19 = sbr.rel (!%p17_p4) target bundleno = 1 (0x1), region = 98 }

// kernel: model_forward.14
= control target key start
LH: loop header
LB: loop body
LE: loop exit
PB: predicated region body
PF: predicated region fallthrough
CT: control target
= control target key end

     0   :  { %vm48_vm0 = vcmask 130048   ;;  %vm158_vm1 = vcmask 123904   ;;  %v289_v33 = vmov 16.0   ;;  %vm219_vm7 = vcmask 125952   ;;  %s392_s1 = inlined_call_operand.vmem [shape: bf16[16,128], index: 1, kind: input, shape index: {}]   ;;  %s393_s0 = inlined_call_operand.vmem [shape: bf16[10,16], index: 0, kind: input, shape index: {}]   ;;  %s394_s3 = inlined_call_operand.vmem [shape: bf16[128,16], index: 3, kind: input, shape index: {}]   ;;  %s395_s2 = inlined_call_operand.vmem [shape: f32[1,128], index: 2, kind: input, shape index: {}]   ;;  %s396_s4 = inlined_call_operand.vmem [shape: f32[1,16], index: 4, kind: input, shape index: {}]   ;;  %s397_s5 = inlined_call_operand.vmem [shape: f32[1,16], index: 5, kind: input, shape index: {}]   ;;  %s398_s6 = inlined_call_operand.vmem [shape: f32[1,16], index: 6, kind: input, shape index: {}]   ;;  %s399_s7 = inlined_call_operand.vmem [shape: bf16[10,16], index: 7, kind: output, shape index: {}]  }
   0x1   :  { %v269_v0 = vld [vmem:[%s392_s1] sm:$0xff]  ;;  %v277_v4 = vld [vmem:[%s394_s3 + $0x38] sm:$0xff]  ;;  %v276_v5 = vld [vmem:[%s394_s3 + $0x30] sm:$0xff]  ;;  %283 = vrcp.f32 %v289_v33  ;;  %vm221_vm10 = vcmask 122880  }
   0x2   :  { %v229_v1 = vld [vmem:[%s393_s0] sm:$0xf]  ;;  %v268_v2 = vld [vmem:[%s393_s0] sm:$0x10]  ;;  %59 = vmatpush.bf16.msra.mxu0 %v269_v0  ;;  %137 = vmatpush.bf16.msra.mxu1 %v277_v4  ;;  %v275_v6 = vld [vmem:[%s394_s3 + $0x28] sm:$0xff] }
   0x3   :  { %v230_v3 = vor.u32 %v268_v2, %v229_v1  ;;  %v274_v7 = vld [vmem:[%s394_s3 + $0x20] sm:$0xff]  ;;  %v273_v8 = vld [vmem:[%s394_s3 + $0x18] sm:$0xff]  ;;  %v272_v9 = vld [vmem:[%s394_s3 + $0x10] sm:$0xff] }
   0x4   :  { %v271_v10 = vld [vmem:[%s394_s3 + $0x8] sm:$0xff]  ;;  %v270_v11 = vld [vmem:[%s394_s3] sm:$0xff] }
   0x5   :  { %235 = vmatmul.msk.bf16.vlgmr.msra.gmra.mxu0 %vm48_vm0, %v230_v3  ;;  %v279_v13 = vld [vmem:[%s395_s2] ss:$0 sm:$0xff]  ;;  %v28_v26 = vld [vmem:[%s393_s0 + $0x4] sm:$0x1] }
   0x6   :  { %138 = vmatpush.bf16.msra.mxu1 %v276_v5  ;;  %v27_v20 = vld [vmem:[%s393_s0] sm:$0xf]  ;;  %v30_v28 = vunpack.c.l.bf16 %v28_v26 }
   0x7   :  { %v280_v21 = vld [vmem:[%s396_s4] ss:$0 sm:$0xff]  ;;  %v29_v22 = vunpack.c.l.bf16 %v27_v20  ;;  %v284_v34 = vpop.eup %283 }
   0x8   :  { %v163_v35 = vmul.f32 16.0, %v284_v34  ;;  %vm167_vm2 = vweird.f32 %v284_v34  ;;  %v281_v0 = vld [vmem:[%s397_s5] ss:$0 sm:$0xff] }
   0x9   :  { %v282_v3 = vld [vmem:[%s398_s6] ss:$0 sm:$0xff] }
   0xa   :  { %139 = vmatpush.bf16.msra.mxu1 %v275_v6  ;;  %v164_v36 = vsub.f32 1.0, %v163_v35 }
   0xc   :  { %v165_v37 = vmul.f32 %v284_v34, %v164_v36 }
   0xe   :  { %140 = vmatpush.bf16.msra.mxu1 %v274_v7  ;;  %v166_v38 = vadd.f32 %v284_v34, %v165_v37 }
  0x10   :  { %v168_v39 = vsel %vm167_vm2, %v284_v34, %v166_v38 }
  0x12   :  { %141 = vmatpush.bf16.msra.mxu1 %v273_v8 }
  0x16   :  { %142 = vmatpush.bf16.msra.mxu1 %v272_v9 }
  0x1a   :  { %143 = vmatpush.bf16.msra.mxu1 %v271_v10 }
  0x1e   :  { %144 = vmatpush.bf16.msra.mxu1 %v270_v11 }
  0x82   :  { %v61_v12 = vpop.f32.mrf.mxu0 }
  0x83   :  { %v62_v14 = vadd.f32 %v279_v13, %v61_v12 }
  0x85   :  { %v66_v17 = vmax.f32 %v62_v14, 0.0 }
  0x8a   :  { %v63_v15 = vpop.f32.mrf.mxu0 }
  0x8b   :  { %v64_v16 = vadd.f32 %v279_v13, %v63_v15 }
  0x8d   :  { %v67_v18 = vmax.f32 %v64_v16, 0.0 }
  0x8f   :  { %v84_v19 = vpack.c.bf16 %v67_v18, %v66_v17 }
  0x91   :  { %145 = vmatmul.bf16.vlgmr.msra.gmra.mxu1 %v84_v19 }
 0x10e   :  { %v146_v23 = vpop.f32.mrf.mxu1 }
 0x10f   :  { %v147_v24 = vadd.f32 %v280_v21, %v146_v23 }
 0x111   :  { %v151_v25 = vadd.f32 %v147_v24, %v29_v22 }
 0x113   :  { %v155_v27 = vsel %vm48_vm0, %v151_v25, 0.0 }
 0x114   :  { %156 = vadd.xlane.f32.xlu0 %v155_v27 }
 0x116   :  { %v148_v29 = vpop.f32.mrf.mxu1 }
 0x117   :  { %v149_v30 = vadd.f32 %v280_v21, %v148_v29 }
 0x119   :  { %v152_v31 = vadd.f32 %v149_v30, %v30_v28 }
 0x11b   :  { %v159_v32 = vsel %vm158_vm1, %v152_v31, 0.0 }
 0x11c   :  { %160 = vadd.xlane.f32.xlu0 %v159_v32 }
 0x187   :  { %v157_v40 = vpop.xlane.xlu0 %156 }
 0x188   :  { %v169_v41 = vmul.f32 %v168_v39, %v157_v40 }
 0x18a   :  { %v171_v42 = vsub.f32 %v151_v25, %v169_v41 }
 0x18c   :  { %v173_v43 = vmul.f32 %v171_v42, %v171_v42 }
 0x18e   :  { %v175_v44 = vsel %vm48_vm0, %v173_v43, 0.0 }
 0x18f   :  { %176 = vadd.xlane.f32.xlu1 %v175_v44  ;;  %v161_v45 = vpop.xlane.xlu0 %160 }
 0x190   :  { %v170_v46 = vmul.f32 %v168_v39, %v161_v45 }
 0x192   :  { %v172_v47 = vsub.f32 %v152_v31, %v170_v46 }
 0x194   :  { %v174_v48 = vmul.f32 %v172_v47, %v172_v47 }
 0x196   :  { %v178_v49 = vsel %vm158_vm1, %v174_v48, 0.0 }
 0x197   :  { %179 = vadd.xlane.f32.xlu1 %v178_v49 }
 0x202   :  { %v177_v50 = vpop.xlane.xlu1 %176 }
 0x203   :  { %v181_v51 = vmul.f32 %v177_v50, %v168_v39 }
 0x205   :  { %v183_v52 = vadd.f32 1e-05, %v181_v51 }
 0x207   :  { %285 = vrsqrt.f32 %v183_v52  ;;  %vm191_vm4 = vweird.f32 %v183_v52 }
 0x20a   :  { %v180_v53 = vpop.xlane.xlu1 %179 }
 0x20b   :  { %v182_v54 = vmul.f32 %v180_v53, %v168_v39 }
 0x20d   :  { %v286_v55 = vpop.eup %285  ;;  %v184_v56 = vadd.f32 1e-05, %v182_v54 }
 0x20e   :  { %v186_v57 = vmul.f32 %v286_v55, %v183_v52  ;;  %vm192_vm3 = vweird.f32 %v286_v55 }
 0x20f   :  { %287 = vrsqrt.f32 %v184_v56  ;;  %vm193_vm5 = vmor %vm191_vm4, %vm192_vm3  ;;  %vm201_vm8 = vweird.f32 %v184_v56 }
 0x210   :  { %v187_v58 = vmul.f32 %v286_v55, %v186_v57 }
 0x212   :  { %v188_v59 = vmul.f32 0.5, %v187_v58 }
 0x214   :  { %v189_v60 = vsub.f32 1.5, %v188_v59 }
 0x215   :  { %v288_v61 = vpop.eup %287 }
 0x216   :  { %v190_v62 = vmul.f32 %v286_v55, %v189_v60  ;;  %v196_v63 = vmul.f32 %v288_v61, %v184_v56  ;;  %vm202_vm6 = vweird.f32 %v288_v61 }
 0x217   :  { %vm203_vm9 = vmor %vm201_vm8, %vm202_vm6 }
 0x218   :  { %v194_v1 = vsel %vm193_vm5, %v286_v55, %v190_v62  ;;  %v197_v2 = vmul.f32 %v288_v61, %v196_v63 }
 0x219   :  { %v205_v4 = vmul.f32 %v194_v1, %v171_v42 }
 0x21a   :  { %v198_v5 = vmul.f32 0.5, %v197_v2 }
 0x21b   :  { %v210_v6 = vmul.f32 %v281_v0, %v205_v4 }
 0x21c   :  { %v199_v7 = vsub.f32 1.5, %v198_v5 }
 0x21d   :  { %v215_v8 = vadd.f32 %v282_v3, %v210_v6 }
 0x21e   :  { %v200_v9 = vmul.f32 %v288_v61, %v199_v7 }
 0x21f   :  { %v217_v10 = vpack.c.bf16 %v215_v8, %v215_v8 }
 0x220   :  { %v204_v11 = vsel %vm203_vm9, %v288_v61, %v200_v9 }
 0x221   :  { %220 = vst.msk [vmem:[%s399_s7] sm:$0xf] %vm219_vm7, %v217_v10  ;;  %v206_v12 = vmul.f32 %v204_v11, %v172_v47 }
 0x223   :  { %v211_v13 = vmul.f32 %v281_v0, %v206_v12 }
 0x225   :  { %v216_v14 = vadd.f32 %v282_v3, %v211_v13 }
 0x227   :  { %v218_v15 = vpack.c.bf16 %v216_v14, %v216_v14 }
 0x229   :  { %222 = vst.msk [vmem:[%s399_s7 + $0x4] sm:$0x1] %vm221_vm10, %v218_v15 }

</bundles_post_ra>
